<compile_context>
chip_gen: v7x
topology: tpu7x:2x2x1
jax: 0.10.0
libtpu: 0.0.40
codegen_flags: <defaults>
</compile_context>

<pallas_src>
import jax
import jax.numpy as jnp
from jax.experimental import pallas as pl
from jax.experimental.pallas import tpu as pltpu

LN_EPS = 1e-5  # RobertaConfig.layer_norm_eps


# --------------------------------------------------------------------------
# In-kernel math helpers.
# --------------------------------------------------------------------------
def _gelu(x):
    # tanh-form GELU; |err| <= ~3e-4 vs the exact erf form (negligible at the
    # activation scales here) and the tanh goes to the otherwise-idle EUP slot
    # instead of ~12 VALU ops per element on the (tile_b, inter) tensor.
    c = 0.7978845608028654  # sqrt(2/pi)
    return 0.5 * x * (1.0 + jnp.tanh(c * (x + 0.044715 * (x * x * x))))


def _layer_norm(h, g, b):
    mu = jnp.mean(h, axis=-1, keepdims=True)
    var = jnp.mean((h - mu) ** 2, axis=-1, keepdims=True)
    return (h - mu) * jax.lax.rsqrt(var + LN_EPS) * g + b


# --------------------------------------------------------------------------
# The fused kernel: embeddings + 6 encoder layers + mean-pool + classifier.
# Q/K projections and softmax are provably dead for seq_len == 1; the V and O
# projections are pre-folded into a single (H, H) matrix per layer.
# --------------------------------------------------------------------------
def roberta_nslkdd_kernel(
    x_ref, in_w_ref, emb_bias_ref, emb_g_ref, emb_b_ref,
    wvo_ref, bvo_ref, ln1_g_ref, ln1_b_ref,
    w1_ref, b1_ref, w2_ref, b2_ref, ln2_g_ref, ln2_b_ref,
    cls_w_ref, cls_b_ref, out_ref,
):
    cdt = in_w_ref.dtype  # matmul/MXU dtype (bf16 by default, f32 for checks)

    # input_layer (Linear F->H) + folded (in_b + token_type_emb[0] + pos_emb[pad+1]),
    # then embedding LayerNorm.  (Dropout skipped: eval semantics.)
    x = x_ref[...].astype(cdt)
    h = jnp.dot(x, in_w_ref[...], preferred_element_type=jnp.float32) + emb_bias_ref[...]
    h = _layer_norm(h, emb_g_ref[...], emb_b_ref[...])

    num_layers = wvo_ref.shape[0]

    # Static unroll over the 6 layers; weights stay resident in VMEM.
    # TODO(synk): if a bundle dump shows vreg spill traffic from the unroll,
    # switch to lax.fori_loop over layers with dynamic wvo_ref[l] indexing.
    for l in range(num_layers):
        # ------------- self-attention over a length-1 sequence --------------
        # softmax over a single key is identically 1 for every head, so the
        # attention context equals V exactly and (Wv, Wo) fold into one matmul.
        attn = jnp.dot(h.astype(cdt), wvo_ref[l],
                       preferred_element_type=jnp.float32) + bvo_ref[l]
        h = _layer_norm(attn + h, ln1_g_ref[l], ln1_b_ref[l])

        # ---------------- feed-forward (tanh-form GELU) ----------------------
        f = jnp.dot(h.astype(cdt), w1_ref[l],
                    preferred_element_type=jnp.float32) + b1_ref[l]
        f = _gelu(f)
        f = jnp.dot(f.astype(cdt), w2_ref[l],
                    preferred_element_type=jnp.float32) + b2_ref[l]
        h = _layer_norm(f + h, ln2_g_ref[l], ln2_b_ref[l])

    # pooled_output = last_hidden_state.mean(dim=1); seq_len == 1 -> identity.
    # Classifier weight/bias are lane-padded (zeros) so the store is lane-dense.
    out_ref[...] = (
        jnp.dot(h.astype(cdt), cls_w_ref[...], preferred_element_type=jnp.float32)
        + cls_b_ref[...]
    )


# --------------------------------------------------------------------------
# Wrapper: BlockSpecs / grid + parameter plumbing.
# --------------------------------------------------------------------------
def modified_roberta_forward(x, params, *, tile_b=None, weight_dtype=jnp.bfloat16,
                             single_buffer_weights=True, vmem_limit_bytes=None):
    batch, num_features = x.shape
    hidden = params["in_w"].shape[1]
    layers, _, inter = params["w1"].shape
    num_classes = params["cls_w"].shape[1]

    # ---- batch tiling: pad batch up to a multiple of tile_b (sublane aligned) ----
    b8 = ((batch + 7) // 8) * 8
    if tile_b is None:
        # 256-row LHS tiles keep the 2x256^2 MXU (v6e/v7x) full; 128 already
        # saturates v5e's 4x128^2.  Small batches use one aligned tile.
        tile_b = 256 if b8 >= 256 else (128 if b8 >= 128 else b8)
    padded_batch = ((batch + tile_b - 1) // tile_b) * tile_b
    assert tile_b % 8 == 0 or tile_b == padded_batch
    x_p = jnp.pad(x, ((0, padded_batch - batch), (0, 0))) if padded_batch != batch else x
    grid = (padded_batch // tile_b,)

    cdt = weight_dtype

    # ---- fold the three embedding additive terms into one (1, H) bias ----
    emb_bias = params["in_b"] + params["tok_row"] + params["pos_row"]

    # ---- fold V and O projections (exact for seq_len == 1), in f32 ----
    wvo = jnp.matmul(params["wv"], params["wo"])                    # (L, H, H)
    bvo = jnp.matmul(params["bv"], params["wo"]) + params["bo"]     # (L, 1, H)

    # ---- lane-dense classifier: zero-pad classes to a multiple of 128 ----
    c_pad = ((num_classes + 127) // 128) * 128
    cls_w = jnp.pad(params["cls_w"], ((0, 0), (0, c_pad - num_classes)))
    cls_b = jnp.pad(params["cls_b"], ((0, 0), (0, c_pad - num_classes)))

    # NOTE: wq/bq/wk/bk are intentionally NOT passed (dead for seq_len == 1).
    # Matmul-side weights go to bf16; biases / LN params stay f32.
    # TODO(synk): if resident bf16 weights ever exceed the VMEM budget (much
    # deeper models on v7x's 64 MiB/TC), add a layer grid axis ("arbitrary")
    # and stream one layer's weights per step with h in a VMEM scratch.
    flat = [
        x_p,
        params["in_w"].astype(cdt), emb_bias,
        params["emb_g"], params["emb_b"],
        wvo.astype(cdt), bvo,
        params["ln1_g"], params["ln1_b"],
        params["w1"].astype(cdt), params["b1"],
        params["w2"].astype(cdt), params["b2"],
        params["ln2_g"], params["ln2_b"],
        cls_w.astype(cdt), cls_b,
    ]

    # ---- cost estimate (post V/O fold, bf16 weights) ----
    flops = 2 * padded_batch * (
        num_features * hidden
        + layers * (hidden * hidden + 2 * hidden * inter)
        + hidden * c_pad
    )
    transcendentals = padded_batch * layers * inter          # one tanh per FFN element
    bytes_accessed = (
        sum(int(a.size) * a.dtype.itemsize for a in flat)
        + padded_batch * c_pad * 4
    )

    # ---- explicit VMEM budget from the actual resident footprint ----
    if vmem_limit_bytes is None:
        weight_bytes = sum(int(a.size) * a.dtype.itemsize for a in flat[1:])
        act_bytes = 4 * tile_b * (2 * num_features + 2 * c_pad + inter + 6 * hidden)
        vmem_limit_bytes = int(
            max(32 << 20, min(100 << 20, 2 * weight_bytes + act_bytes + (8 << 20))))

    compiler_params = pltpu.CompilerParams(
        dimension_semantics=("parallel",),
        vmem_limit_bytes=vmem_limit_bytes,
    )

    def build(weight_pipeline_mode):
        def invariant_spec(arr):
            nd = arr.ndim
            if weight_pipeline_mode is None:
                return pl.BlockSpec(arr.shape, lambda i, nd=nd: (0,) * nd)
            return pl.BlockSpec(arr.shape, lambda i, nd=nd: (0,) * nd,
                                pipeline_mode=weight_pipeline_mode)

        in_specs = [pl.BlockSpec((tile_b, num_features), lambda i: (i, 0))]
        in_specs += [invariant_spec(a) for a in flat[1:]]
        out_spec = pl.BlockSpec((tile_b, c_pad), lambda i: (i, 0))

        return pl.pallas_call(
            roberta_nslkdd_kernel,
            out_shape=jax.ShapeDtypeStruct((padded_batch, c_pad), jnp.float32),
            grid=grid,
            in_specs=in_specs,
            out_specs=out_spec,
            compiler_params=compiler_params,
            cost_estimate=pl.CostEstimate(
                flops=flops,
                transcendentals=transcendentals,
                bytes_accessed=bytes_accessed,
            ),
        )

    if single_buffer_weights:
        try:
            # Grid-invariant inputs single-buffered: default double-buffering
            # would duplicate the whole resident weight set for nothing.
            logits_padded = build(pl.Buffered(1))(*flat)
        except Exception:
            # TODO(synk): pl.Buffered(1) not supported on this jax build; fall
            # back to default (double-buffered) invariant inputs.
            logits_padded = build(None)(*flat)
    else:
        logits_padded = build(None)(*flat)

    return logits_padded[:batch, :num_classes]


# --------------------------------------------------------------------------
# Deterministic parameter init (synthetic weights; shapes follow __init__).
# wq/bq/wk/bk are created (they exist in the PyTorch module) but the kernel
# never consumes them -- they are provably dead when seq_len == 1.
# --------------------------------------------------------------------------
def init_params(key, *, num_features, hidden, inter, layers, num_classes, pad_idx):
    keys = iter(jax.random.split(key, 64))

    def nrm(shape, scale=0.02):
        return scale * jax.random.normal(next(keys), shape, dtype=jnp.float32)

    pos_table = nrm((num_features, hidden))   # max_position_embeddings = num_features
    tok_table = nrm((1, hidden))              # type_vocab_size = 1

    return dict(
        in_w=nrm((num_features, hidden)), in_b=nrm((1, hidden)),
        pos_row=pos_table[pad_idx + 1: pad_idx + 2],   # position id = pad_idx + 1
        tok_row=tok_table[0:1],
        emb_g=jnp.ones((1, hidden), jnp.float32) + nrm((1, hidden)),
        emb_b=nrm((1, hidden)),
        wq=nrm((layers, hidden, hidden)), bq=nrm((layers, 1, hidden)),
        wk=nrm((layers, hidden, hidden)), bk=nrm((layers, 1, hidden)),
        wv=nrm((layers, hidden, hidden)), bv=nrm((layers, 1, hidden)),
        wo=nrm((layers, hidden, hidden)), bo=nrm((layers, 1, hidden)),
        ln1_g=jnp.ones((layers, 1, hidden), jnp.float32) + nrm((layers, 1, hidden)),
        ln1_b=nrm((layers, 1, hidden)),
        w1=nrm((layers, hidden, inter)), b1=nrm((layers, 1, inter)),
        w2=nrm((layers, inter, hidden)), b2=nrm((layers, 1, hidden)),
        ln2_g=jnp.ones((layers, 1, hidden), jnp.float32) + nrm((layers, 1, hidden)),
        ln2_b=nrm((layers, 1, hidden)),
        cls_w=nrm((hidden, num_classes)), cls_b=nrm((1, num_classes)),
    )


# --------------------------------------------------------------------------
# Pure-JAX reference: FULL multi-head attention (Q/K + softmax) and exact-erf
# GELU spelled out, so the kernel's Q/K pruning + V/O fold are verified
# against the unpruned math.
# --------------------------------------------------------------------------
def reference_forward(x, p, *, num_heads):
    def ln(h, g, b):
        mu = jnp.mean(h, -1, keepdims=True)
        var = jnp.mean((h - mu) ** 2, -1, keepdims=True)
        return (h - mu) * jax.lax.rsqrt(var + LN_EPS) * g + b

    h = x @ p["in_w"] + p["in_b"][0]
    h = h + p["tok_row"][0] + p["pos_row"][0]
    h = ln(h, p["emb_g"][0], p["emb_b"][0])
    L, H = p["wq"].shape[0], p["wq"].shape[1]
    B = x.shape[0]
    hd = H // num_heads
    for l in range(L):
        q = (h @ p["wq"][l] + p["bq"][l, 0]).reshape(B, num_heads, 1, hd)
        k = (h @ p["wk"][l] + p["bk"][l, 0]).reshape(B, num_heads, 1, hd)
        v = (h @ p["wv"][l] + p["bv"][l, 0]).reshape(B, num_heads, 1, hd)
        s = jnp.einsum("bhqd,bhkd->bhqk", q, k) / jnp.sqrt(jnp.float32(hd))
        ctx = jnp.einsum("bhqk,bhkd->bhqd", jax.nn.softmax(s, -1), v).reshape(B, H)
        h = ln(ctx @ p["wo"][l] + p["bo"][l, 0] + h, p["ln1_g"][l, 0], p["ln1_b"][l, 0])
        f = jax.nn.gelu(h @ p["w1"][l] + p["b1"][l, 0], approximate=False)
        f = f @ p["w2"][l] + p["b2"][l, 0]
        h = ln(f + h, p["ln2_g"][l, 0], p["ln2_b"][l, 0])
    return h @ p["cls_w"] + p["cls_b"][0]


if __name__ == "__main__":
    # Small config consistent with the module's structure (validate here;
    # benchmark/tune at the production H=256 / inter=3072 shape instead).
    BATCH = 16
    NUM_FEATURES = 16      # vocab_size == max_position_embeddings == num_features
    HIDDEN = 32            # (256 in the original module)
    NUM_HEADS = 8
    INTER = 128            # (3072 in the original module)
    LAYERS = 6
    NUM_CLASSES = 5
    PAD_IDX = 1            # roberta pad_token_id
    TILE_B = 8             # exercises a 2-step parallel batch grid at this size

    root = jax.random.PRNGKey(0)
    kx, kp = jax.random.split(root)
    x = jax.random.normal(kx, (BATCH, NUM_FEATURES), dtype=jnp.float32)
    params = init_params(kp, num_features=NUM_FEATURES, hidden=HIDDEN, inter=INTER,
                         layers=LAYERS, num_classes=NUM_CLASSES, pad_idx=PAD_IDX)

    ref = jax.block_until_ready(reference_forward(x, params, num_heads=NUM_HEADS))

    # Exactness of the structural simplifications (Q/K pruning, V/O fold,
    # folded embedding bias, lane-padded classifier): f32-weight kernel vs.
    # the full multi-head-attention reference.
    logits_f32 = jax.block_until_ready(
        modified_roberta_forward(x, params, tile_b=TILE_B, weight_dtype=jnp.float32))
    assert logits_f32.shape == (BATCH, NUM_CLASSES)
    assert bool(jnp.max(jnp.abs(logits_f32 - ref)) < 2e-3), "f32 kernel/reference mismatch"

    # Performance path: bf16 weights / matmuls with f32 accumulation.
    logits = jax.block_until_ready(modified_roberta_forward(x, params, tile_b=TILE_B))
    assert logits.shape == (BATCH, NUM_CLASSES)
    assert bool(jnp.max(jnp.abs(logits - ref)) < 3e-2), "bf16 kernel/reference mismatch"

    # TODO(synk): dropout layers (embedding/attention/hidden) are eval-mode no-ops here.
    print("KERNEL_OK")
</pallas_src>

<mosaic_0001>
module attributes {stable_mosaic.version = 11 : i64} {
  func.func @roberta_nslkdd_kernel(%arg0: i32, %arg1: memref<8x16xf32, #tpu.memory_space<vmem>>, %arg2: memref<16x32xf32, #tpu.memory_space<vmem>>, %arg3: memref<1x32xf32, #tpu.memory_space<vmem>>, %arg4: memref<1x32xf32, #tpu.memory_space<vmem>>, %arg5: memref<1x32xf32, #tpu.memory_space<vmem>>, %arg6: memref<6x32x32xf32, #tpu.memory_space<vmem>>, %arg7: memref<6x1x32xf32, #tpu.memory_space<vmem>>, %arg8: memref<6x1x32xf32, #tpu.memory_space<vmem>>, %arg9: memref<6x1x32xf32, #tpu.memory_space<vmem>>, %arg10: memref<6x32x128xf32, #tpu.memory_space<vmem>>, %arg11: memref<6x1x128xf32, #tpu.memory_space<vmem>>, %arg12: memref<6x128x32xf32, #tpu.memory_space<vmem>>, %arg13: memref<6x1x32xf32, #tpu.memory_space<vmem>>, %arg14: memref<6x1x32xf32, #tpu.memory_space<vmem>>, %arg15: memref<6x1x32xf32, #tpu.memory_space<vmem>>, %arg16: memref<32x128xf32, #tpu.memory_space<vmem>>, %arg17: memref<1x128xf32, #tpu.memory_space<vmem>>, %arg18: memref<8x128xf32, #tpu.memory_space<vmem>>) attributes {dimension_semantics = [#tpu.dimension_semantics<parallel>], iteration_bounds = array<i64: 2>, scalar_prefetch = 0 : i64, scratch_operands = 0 : i64, tpu.core_type = #tpu.core_type<tc>, window_params = [{transform_indices = @transform_0, window_bounds = array<i64: 8, 16>}, {pipeline_mode = #tpu.pipeline_mode<synchronous>, transform_indices = @transform_1, window_bounds = array<i64: 16, 32>}, {pipeline_mode = #tpu.pipeline_mode<synchronous>, transform_indices = @transform_2, window_bounds = array<i64: 1, 32>}, {pipeline_mode = #tpu.pipeline_mode<synchronous>, transform_indices = @transform_3, window_bounds = array<i64: 1, 32>}, {pipeline_mode = #tpu.pipeline_mode<synchronous>, transform_indices = @transform_4, window_bounds = array<i64: 1, 32>}, {pipeline_mode = #tpu.pipeline_mode<synchronous>, transform_indices = @transform_5, window_bounds = array<i64: 6, 32, 32>}, {pipeline_mode = #tpu.pipeline_mode<synchronous>, transform_indices = @transform_6, window_bounds = array<i64: 6, 1, 32>}, {pipeline_mode = #tpu.pipeline_mode<synchronous>, transform_indices = @transform_7, window_bounds = array<i64: 6, 1, 32>}, {pipeline_mode = #tpu.pipeline_mode<synchronous>, transform_indices = @transform_8, window_bounds = array<i64: 6, 1, 32>}, {pipeline_mode = #tpu.pipeline_mode<synchronous>, transform_indices = @transform_9, window_bounds = array<i64: 6, 32, 128>}, {pipeline_mode = #tpu.pipeline_mode<synchronous>, transform_indices = @transform_10, window_bounds = array<i64: 6, 1, 128>}, {pipeline_mode = #tpu.pipeline_mode<synchronous>, transform_indices = @transform_11, window_bounds = array<i64: 6, 128, 32>}, {pipeline_mode = #tpu.pipeline_mode<synchronous>, transform_indices = @transform_12, window_bounds = array<i64: 6, 1, 32>}, {pipeline_mode = #tpu.pipeline_mode<synchronous>, transform_indices = @transform_13, window_bounds = array<i64: 6, 1, 32>}, {pipeline_mode = #tpu.pipeline_mode<synchronous>, transform_indices = @transform_14, window_bounds = array<i64: 6, 1, 32>}, {pipeline_mode = #tpu.pipeline_mode<synchronous>, transform_indices = @transform_15, window_bounds = array<i64: 32, 128>}, {pipeline_mode = #tpu.pipeline_mode<synchronous>, transform_indices = @transform_16, window_bounds = array<i64: 1, 128>}, {transform_indices = @transform_17, window_bounds = array<i64: 8, 128>}]} {
    %c0 = arith.constant 0 : index
    %c0_0 = arith.constant 0 : index
    %0 = vector.load %arg1[%c0, %c0_0] : memref<8x16xf32, #tpu.memory_space<vmem>>, vector<8x16xf32>
    %c0_1 = arith.constant 0 : index
    %c0_2 = arith.constant 0 : index
    %1 = vector.load %arg2[%c0_1, %c0_2] : memref<16x32xf32, #tpu.memory_space<vmem>>, vector<16x32xf32>
    %cst = arith.constant dense<0.000000e+00> : vector<8x32xf32>
    %2 = tpu.matmul %0, %1, %cst {dimension_numbers = #tpu.dot_dimension_numbers<[1], [0], [0], [1], [0, 0, 1, 1], [], []>} : vector<8x16xf32>, vector<16x32xf32>, vector<8x32xf32> -> vector<8x32xf32>
    %c0_3 = arith.constant 0 : index
    %c0_4 = arith.constant 0 : index
    %3 = vector.load %arg3[%c0_3, %c0_4] : memref<1x32xf32, #tpu.memory_space<vmem>>, vector<1x32xf32>
    %4 = vector.broadcast %3 : vector<1x32xf32> to vector<8x32xf32>
    %5 = arith.addf %2, %4 : vector<8x32xf32>
    %c0_5 = arith.constant 0 : index
    %c0_6 = arith.constant 0 : index
    %6 = vector.load %arg4[%c0_5, %c0_6] : memref<1x32xf32, #tpu.memory_space<vmem>>, vector<1x32xf32>
    %c0_7 = arith.constant 0 : index
    %c0_8 = arith.constant 0 : index
    %7 = vector.load %arg5[%c0_7, %c0_8] : memref<1x32xf32, #tpu.memory_space<vmem>>, vector<1x32xf32>
    %cst_9 = arith.constant dense<0.000000e+00> : vector<8xf32>
    %8 = vector.multi_reduction <add>, %5, %cst_9 [1] : vector<8x32xf32> to vector<8xf32>
    %9 = vector.shape_cast %8 : vector<8xf32> to vector<8x1xf32>
    %cst_10 = arith.constant 3.200000e+01 : f32
    %10 = vector.broadcast %cst_10 : f32 to vector<8x1xf32>
    %11 = arith.divf %9, %10 : vector<8x1xf32>
    %12 = vector.broadcast %11 : vector<8x1xf32> to vector<8x32xf32>
    %13 = arith.subf %5, %12 : vector<8x32xf32>
    %14 = arith.mulf %13, %13 : vector<8x32xf32>
    %cst_11 = arith.constant dense<0.000000e+00> : vector<8xf32>
    %15 = vector.multi_reduction <add>, %14, %cst_11 [1] : vector<8x32xf32> to vector<8xf32>
    %16 = vector.shape_cast %15 : vector<8xf32> to vector<8x1xf32>
    %cst_12 = arith.constant 3.200000e+01 : f32
    %17 = vector.broadcast %cst_12 : f32 to vector<8x1xf32>
    %18 = arith.divf %16, %17 : vector<8x1xf32>
    %19 = vector.broadcast %11 : vector<8x1xf32> to vector<8x32xf32>
    %20 = arith.subf %5, %19 : vector<8x32xf32>
    %cst_13 = arith.constant 9.99999974E-6 : f32
    %21 = vector.broadcast %cst_13 : f32 to vector<8x1xf32>
    %22 = arith.addf %18, %21 : vector<8x1xf32>
    %23 = math.rsqrt %22 : vector<8x1xf32>
    %24 = vector.broadcast %23 : vector<8x1xf32> to vector<8x32xf32>
    %25 = arith.mulf %20, %24 : vector<8x32xf32>
    %26 = vector.broadcast %6 : vector<1x32xf32> to vector<8x32xf32>
    %27 = arith.mulf %25, %26 : vector<8x32xf32>
    %28 = vector.broadcast %7 : vector<1x32xf32> to vector<8x32xf32>
    %29 = arith.addf %27, %28 : vector<8x32xf32>
    %c0_14 = arith.constant 0 : index
    %c0_15 = arith.constant 0 : index
    %c0_16 = arith.constant 0 : index
    %30 = vector.load %arg6[%c0_14, %c0_15, %c0_16] : memref<6x32x32xf32, #tpu.memory_space<vmem>>, vector<1x32x32xf32>
    %31 = vector.shape_cast %30 : vector<1x32x32xf32> to vector<32x32xf32>
    %cst_17 = arith.constant dense<0.000000e+00> : vector<8x32xf32>
    %32 = tpu.matmul %29, %31, %cst_17 {dimension_numbers = #tpu.dot_dimension_numbers<[1], [0], [0], [1], [0, 0, 1, 1], [], []>} : vector<8x32xf32>, vector<32x32xf32>, vector<8x32xf32> -> vector<8x32xf32>
    %c0_18 = arith.constant 0 : index
    %c0_19 = arith.constant 0 : index
    %c0_20 = arith.constant 0 : index
    %33 = vector.load %arg7[%c0_18, %c0_19, %c0_20] : memref<6x1x32xf32, #tpu.memory_space<vmem>>, vector<1x1x32xf32>
    %34 = vector.shape_cast %33 : vector<1x1x32xf32> to vector<1x32xf32>
    %35 = vector.broadcast %34 : vector<1x32xf32> to vector<8x32xf32>
    %36 = arith.addf %32, %35 : vector<8x32xf32>
    %37 = arith.addf %36, %29 : vector<8x32xf32>
    %c0_21 = arith.constant 0 : index
    %c0_22 = arith.constant 0 : index
    %c0_23 = arith.constant 0 : index
    %38 = vector.load %arg8[%c0_21, %c0_22, %c0_23] : memref<6x1x32xf32, #tpu.memory_space<vmem>>, vector<1x1x32xf32>
    %39 = vector.shape_cast %38 : vector<1x1x32xf32> to vector<1x32xf32>
    %c0_24 = arith.constant 0 : index
    %c0_25 = arith.constant 0 : index
    %c0_26 = arith.constant 0 : index
    %40 = vector.load %arg9[%c0_24, %c0_25, %c0_26] : memref<6x1x32xf32, #tpu.memory_space<vmem>>, vector<1x1x32xf32>
    %41 = vector.shape_cast %40 : vector<1x1x32xf32> to vector<1x32xf32>
    %cst_27 = arith.constant dense<0.000000e+00> : vector<8xf32>
    %42 = vector.multi_reduction <add>, %37, %cst_27 [1] : vector<8x32xf32> to vector<8xf32>
    %43 = vector.shape_cast %42 : vector<8xf32> to vector<8x1xf32>
    %cst_28 = arith.constant 3.200000e+01 : f32
    %44 = vector.broadcast %cst_28 : f32 to vector<8x1xf32>
    %45 = arith.divf %43, %44 : vector<8x1xf32>
    %46 = vector.broadcast %45 : vector<8x1xf32> to vector<8x32xf32>
    %47 = arith.subf %37, %46 : vector<8x32xf32>
    %48 = arith.mulf %47, %47 : vector<8x32xf32>
    %cst_29 = arith.constant dense<0.000000e+00> : vector<8xf32>
    %49 = vector.multi_reduction <add>, %48, %cst_29 [1] : vector<8x32xf32> to vector<8xf32>
    %50 = vector.shape_cast %49 : vector<8xf32> to vector<8x1xf32>
    %cst_30 = arith.constant 3.200000e+01 : f32
    %51 = vector.broadcast %cst_30 : f32 to vector<8x1xf32>
    %52 = arith.divf %50, %51 : vector<8x1xf32>
    %53 = vector.broadcast %45 : vector<8x1xf32> to vector<8x32xf32>
    %54 = arith.subf %37, %53 : vector<8x32xf32>
    %cst_31 = arith.constant 9.99999974E-6 : f32
    %55 = vector.broadcast %cst_31 : f32 to vector<8x1xf32>
    %56 = arith.addf %52, %55 : vector<8x1xf32>
    %57 = math.rsqrt %56 : vector<8x1xf32>
    %58 = vector.broadcast %57 : vector<8x1xf32> to vector<8x32xf32>
    %59 = arith.mulf %54, %58 : vector<8x32xf32>
    %60 = vector.broadcast %39 : vector<1x32xf32> to vector<8x32xf32>
    %61 = arith.mulf %59, %60 : vector<8x32xf32>
    %62 = vector.broadcast %41 : vector<1x32xf32> to vector<8x32xf32>
    %63 = arith.addf %61, %62 : vector<8x32xf32>
    %c0_32 = arith.constant 0 : index
    %c0_33 = arith.constant 0 : index
    %c0_34 = arith.constant 0 : index
    %64 = vector.load %arg10[%c0_32, %c0_33, %c0_34] : memref<6x32x128xf32, #tpu.memory_space<vmem>>, vector<1x32x128xf32>
    %65 = vector.shape_cast %64 : vector<1x32x128xf32> to vector<32x128xf32>
    %cst_35 = arith.constant dense<0.000000e+00> : vector<8x128xf32>
    %66 = tpu.matmul %63, %65, %cst_35 {dimension_numbers = #tpu.dot_dimension_numbers<[1], [0], [0], [1], [0, 0, 1, 1], [], []>} : vector<8x32xf32>, vector<32x128xf32>, vector<8x128xf32> -> vector<8x128xf32>
    %c0_36 = arith.constant 0 : index
    %c0_37 = arith.constant 0 : index
    %c0_38 = arith.constant 0 : index
    %67 = vector.load %arg11[%c0_36, %c0_37, %c0_38] : memref<6x1x128xf32, #tpu.memory_space<vmem>>, vector<1x1x128xf32>
    %68 = vector.shape_cast %67 : vector<1x1x128xf32> to vector<1x128xf32>
    %69 = vector.broadcast %68 : vector<1x128xf32> to vector<8x128xf32>
    %70 = arith.addf %66, %69 : vector<8x128xf32>
    %cst_39 = arith.constant 5.000000e-01 : f32
    %71 = vector.broadcast %cst_39 : f32 to vector<8x128xf32>
    %72 = arith.mulf %71, %70 : vector<8x128xf32>
    %73 = arith.mulf %70, %70 : vector<8x128xf32>
    %74 = arith.mulf %73, %70 : vector<8x128xf32>
    %cst_40 = arith.constant 4.471500e-02 : f32
    %75 = vector.broadcast %cst_40 : f32 to vector<8x128xf32>
    %76 = arith.mulf %75, %74 : vector<8x128xf32>
    %77 = arith.addf %70, %76 : vector<8x128xf32>
    %cst_41 = arith.constant 0.797884583 : f32
    %78 = vector.broadcast %cst_41 : f32 to vector<8x128xf32>
    %79 = arith.mulf %78, %77 : vector<8x128xf32>
    %80 = math.tanh %79 : vector<8x128xf32>
    %cst_42 = arith.constant 1.000000e+00 : f32
    %81 = vector.broadcast %cst_42 : f32 to vector<8x128xf32>
    %82 = arith.addf %81, %80 : vector<8x128xf32>
    %83 = arith.mulf %72, %82 : vector<8x128xf32>
    %c0_43 = arith.constant 0 : index
    %c0_44 = arith.constant 0 : index
    %c0_45 = arith.constant 0 : index
    %84 = vector.load %arg12[%c0_43, %c0_44, %c0_45] : memref<6x128x32xf32, #tpu.memory_space<vmem>>, vector<1x128x32xf32>
    %85 = vector.shape_cast %84 : vector<1x128x32xf32> to vector<128x32xf32>
    %cst_46 = arith.constant dense<0.000000e+00> : vector<8x32xf32>
    %86 = tpu.matmul %83, %85, %cst_46 {dimension_numbers = #tpu.dot_dimension_numbers<[1], [0], [0], [1], [0, 0, 1, 1], [], []>} : vector<8x128xf32>, vector<128x32xf32>, vector<8x32xf32> -> vector<8x32xf32>
    %c0_47 = arith.constant 0 : index
    %c0_48 = arith.constant 0 : index
    %c0_49 = arith.constant 0 : index
    %87 = vector.load %arg13[%c0_47, %c0_48, %c0_49] : memref<6x1x32xf32, #tpu.memory_space<vmem>>, vector<1x1x32xf32>
    %88 = vector.shape_cast %87 : vector<1x1x32xf32> to vector<1x32xf32>
    %89 = vector.broadcast %88 : vector<1x32xf32> to vector<8x32xf32>
    %90 = arith.addf %86, %89 : vector<8x32xf32>
    %91 = arith.addf %90, %63 : vector<8x32xf32>
    %c0_50 = arith.constant 0 : index
    %c0_51 = arith.constant 0 : index
    %c0_52 = arith.constant 0 : index
    %92 = vector.load %arg14[%c0_50, %c0_51, %c0_52] : memref<6x1x32xf32, #tpu.memory_space<vmem>>, vector<1x1x32xf32>
    %93 = vector.shape_cast %92 : vector<1x1x32xf32> to vector<1x32xf32>
    %c0_53 = arith.constant 0 : index
    %c0_54 = arith.constant 0 : index
    %c0_55 = arith.constant 0 : index
    %94 = vector.load %arg15[%c0_53, %c0_54, %c0_55] : memref<6x1x32xf32, #tpu.memory_space<vmem>>, vector<1x1x32xf32>
    %95 = vector.shape_cast %94 : vector<1x1x32xf32> to vector<1x32xf32>
    %cst_56 = arith.constant dense<0.000000e+00> : vector<8xf32>
    %96 = vector.multi_reduction <add>, %91, %cst_56 [1] : vector<8x32xf32> to vector<8xf32>
    %97 = vector.shape_cast %96 : vector<8xf32> to vector<8x1xf32>
    %cst_57 = arith.constant 3.200000e+01 : f32
    %98 = vector.broadcast %cst_57 : f32 to vector<8x1xf32>
    %99 = arith.divf %97, %98 : vector<8x1xf32>
    %100 = vector.broadcast %99 : vector<8x1xf32> to vector<8x32xf32>
    %101 = arith.subf %91, %100 : vector<8x32xf32>
    %102 = arith.mulf %101, %101 : vector<8x32xf32>
    %cst_58 = arith.constant dense<0.000000e+00> : vector<8xf32>
    %103 = vector.multi_reduction <add>, %102, %cst_58 [1] : vector<8x32xf32> to vector<8xf32>
    %104 = vector.shape_cast %103 : vector<8xf32> to vector<8x1xf32>
    %cst_59 = arith.constant 3.200000e+01 : f32
    %105 = vector.broadcast %cst_59 : f32 to vector<8x1xf32>
    %106 = arith.divf %104, %105 : vector<8x1xf32>
    %107 = vector.broadcast %99 : vector<8x1xf32> to vector<8x32xf32>
    %108 = arith.subf %91, %107 : vector<8x32xf32>
    %cst_60 = arith.constant 9.99999974E-6 : f32
    %109 = vector.broadcast %cst_60 : f32 to vector<8x1xf32>
    %110 = arith.addf %106, %109 : vector<8x1xf32>
    %111 = math.rsqrt %110 : vector<8x1xf32>
    %112 = vector.broadcast %111 : vector<8x1xf32> to vector<8x32xf32>
    %113 = arith.mulf %108, %112 : vector<8x32xf32>
    %114 = vector.broadcast %93 : vector<1x32xf32> to vector<8x32xf32>
    %115 = arith.mulf %113, %114 : vector<8x32xf32>
    %116 = vector.broadcast %95 : vector<1x32xf32> to vector<8x32xf32>
    %117 = arith.addf %115, %116 : vector<8x32xf32>
    %c1 = arith.constant 1 : index
    %c0_61 = arith.constant 0 : index
    %c0_62 = arith.constant 0 : index
    %118 = vector.load %arg6[%c1, %c0_61, %c0_62] : memref<6x32x32xf32, #tpu.memory_space<vmem>>, vector<1x32x32xf32>
    %119 = vector.shape_cast %118 : vector<1x32x32xf32> to vector<32x32xf32>
    %cst_63 = arith.constant dense<0.000000e+00> : vector<8x32xf32>
    %120 = tpu.matmul %117, %119, %cst_63 {dimension_numbers = #tpu.dot_dimension_numbers<[1], [0], [0], [1], [0, 0, 1, 1], [], []>} : vector<8x32xf32>, vector<32x32xf32>, vector<8x32xf32> -> vector<8x32xf32>
    %c1_64 = arith.constant 1 : index
    %c0_65 = arith.constant 0 : index
    %c0_66 = arith.constant 0 : index
    %121 = vector.load %arg7[%c1_64, %c0_65, %c0_66] : memref<6x1x32xf32, #tpu.memory_space<vmem>>, vector<1x1x32xf32>
    %122 = vector.shape_cast %121 : vector<1x1x32xf32> to vector<1x32xf32>
    %123 = vector.broadcast %122 : vector<1x32xf32> to vector<8x32xf32>
    %124 = arith.addf %120, %123 : vector<8x32xf32>
    %125 = arith.addf %124, %117 : vector<8x32xf32>
    %c1_67 = arith.constant 1 : index
    %c0_68 = arith.constant 0 : index
    %c0_69 = arith.constant 0 : index
    %126 = vector.load %arg8[%c1_67, %c0_68, %c0_69] : memref<6x1x32xf32, #tpu.memory_space<vmem>>, vector<1x1x32xf32>
    %127 = vector.shape_cast %126 : vector<1x1x32xf32> to vector<1x32xf32>
    %c1_70 = arith.constant 1 : index
    %c0_71 = arith.constant 0 : index
    %c0_72 = arith.constant 0 : index
    %128 = vector.load %arg9[%c1_70, %c0_71, %c0_72] : memref<6x1x32xf32, #tpu.memory_space<vmem>>, vector<1x1x32xf32>
    %129 = vector.shape_cast %128 : vector<1x1x32xf32> to vector<1x32xf32>
    %cst_73 = arith.constant dense<0.000000e+00> : vector<8xf32>
    %130 = vector.multi_reduction <add>, %125, %cst_73 [1] : vector<8x32xf32> to vector<8xf32>
    %131 = vector.shape_cast %130 : vector<8xf32> to vector<8x1xf32>
    %cst_74 = arith.constant 3.200000e+01 : f32
    %132 = vector.broadcast %cst_74 : f32 to vector<8x1xf32>
    %133 = arith.divf %131, %132 : vector<8x1xf32>
    %134 = vector.broadcast %133 : vector<8x1xf32> to vector<8x32xf32>
    %135 = arith.subf %125, %134 : vector<8x32xf32>
    %136 = arith.mulf %135, %135 : vector<8x32xf32>
    %cst_75 = arith.constant dense<0.000000e+00> : vector<8xf32>
    %137 = vector.multi_reduction <add>, %136, %cst_75 [1] : vector<8x32xf32> to vector<8xf32>
    %138 = vector.shape_cast %137 : vector<8xf32> to vector<8x1xf32>
    %cst_76 = arith.constant 3.200000e+01 : f32
    %139 = vector.broadcast %cst_76 : f32 to vector<8x1xf32>
    %140 = arith.divf %138, %139 : vector<8x1xf32>
    %141 = vector.broadcast %133 : vector<8x1xf32> to vector<8x32xf32>
    %142 = arith.subf %125, %141 : vector<8x32xf32>
    %cst_77 = arith.constant 9.99999974E-6 : f32
    %143 = vector.broadcast %cst_77 : f32 to vector<8x1xf32>
    %144 = arith.addf %140, %143 : vector<8x1xf32>
    %145 = math.rsqrt %144 : vector<8x1xf32>
    %146 = vector.broadcast %145 : vector<8x1xf32> to vector<8x32xf32>
    %147 = arith.mulf %142, %146 : vector<8x32xf32>
    %148 = vector.broadcast %127 : vector<1x32xf32> to vector<8x32xf32>
    %149 = arith.mulf %147, %148 : vector<8x32xf32>
    %150 = vector.broadcast %129 : vector<1x32xf32> to vector<8x32xf32>
    %151 = arith.addf %149, %150 : vector<8x32xf32>
    %c1_78 = arith.constant 1 : index
    %c0_79 = arith.constant 0 : index
    %c0_80 = arith.constant 0 : index
    %152 = vector.load %arg10[%c1_78, %c0_79, %c0_80] : memref<6x32x128xf32, #tpu.memory_space<vmem>>, vector<1x32x128xf32>
    %153 = vector.shape_cast %152 : vector<1x32x128xf32> to vector<32x128xf32>
    %cst_81 = arith.constant dense<0.000000e+00> : vector<8x128xf32>
    %154 = tpu.matmul %151, %153, %cst_81 {dimension_numbers = #tpu.dot_dimension_numbers<[1], [0], [0], [1], [0, 0, 1, 1], [], []>} : vector<8x32xf32>, vector<32x128xf32>, vector<8x128xf32> -> vector<8x128xf32>
    %c1_82 = arith.constant 1 : index
    %c0_83 = arith.constant 0 : index
    %c0_84 = arith.constant 0 : index
    %155 = vector.load %arg11[%c1_82, %c0_83, %c0_84] : memref<6x1x128xf32, #tpu.memory_space<vmem>>, vector<1x1x128xf32>
    %156 = vector.shape_cast %155 : vector<1x1x128xf32> to vector<1x128xf32>
    %157 = vector.broadcast %156 : vector<1x128xf32> to vector<8x128xf32>
    %158 = arith.addf %154, %157 : vector<8x128xf32>
    %cst_85 = arith.constant 5.000000e-01 : f32
    %159 = vector.broadcast %cst_85 : f32 to vector<8x128xf32>
    %160 = arith.mulf %159, %158 : vector<8x128xf32>
    %161 = arith.mulf %158, %158 : vector<8x128xf32>
    %162 = arith.mulf %161, %158 : vector<8x128xf32>
    %cst_86 = arith.constant 4.471500e-02 : f32
    %163 = vector.broadcast %cst_86 : f32 to vector<8x128xf32>
    %164 = arith.mulf %163, %162 : vector<8x128xf32>
    %165 = arith.addf %158, %164 : vector<8x128xf32>
    %cst_87 = arith.constant 0.797884583 : f32
    %166 = vector.broadcast %cst_87 : f32 to vector<8x128xf32>
    %167 = arith.mulf %166, %165 : vector<8x128xf32>
    %168 = math.tanh %167 : vector<8x128xf32>
    %cst_88 = arith.constant 1.000000e+00 : f32
    %169 = vector.broadcast %cst_88 : f32 to vector<8x128xf32>
    %170 = arith.addf %169, %168 : vector<8x128xf32>
    %171 = arith.mulf %160, %170 : vector<8x128xf32>
    %c1_89 = arith.constant 1 : index
    %c0_90 = arith.constant 0 : index
    %c0_91 = arith.constant 0 : index
    %172 = vector.load %arg12[%c1_89, %c0_90, %c0_91] : memref<6x128x32xf32, #tpu.memory_space<vmem>>, vector<1x128x32xf32>
    %173 = vector.shape_cast %172 : vector<1x128x32xf32> to vector<128x32xf32>
    %cst_92 = arith.constant dense<0.000000e+00> : vector<8x32xf32>
    %174 = tpu.matmul %171, %173, %cst_92 {dimension_numbers = #tpu.dot_dimension_numbers<[1], [0], [0], [1], [0, 0, 1, 1], [], []>} : vector<8x128xf32>, vector<128x32xf32>, vector<8x32xf32> -> vector<8x32xf32>
    %c1_93 = arith.constant 1 : index
    %c0_94 = arith.constant 0 : index
    %c0_95 = arith.constant 0 : index
    %175 = vector.load %arg13[%c1_93, %c0_94, %c0_95] : memref<6x1x32xf32, #tpu.memory_space<vmem>>, vector<1x1x32xf32>
    %176 = vector.shape_cast %175 : vector<1x1x32xf32> to vector<1x32xf32>
    %177 = vector.broadcast %176 : vector<1x32xf32> to vector<8x32xf32>
    %178 = arith.addf %174, %177 : vector<8x32xf32>
    %179 = arith.addf %178, %151 : vector<8x32xf32>
    %c1_96 = arith.constant 1 : index
    %c0_97 = arith.constant 0 : index
    %c0_98 = arith.constant 0 : index
    %180 = vector.load %arg14[%c1_96, %c0_97, %c0_98] : memref<6x1x32xf32, #tpu.memory_space<vmem>>, vector<1x1x32xf32>
    %181 = vector.shape_cast %180 : vector<1x1x32xf32> to vector<1x32xf32>
    %c1_99 = arith.constant 1 : index
    %c0_100 = arith.constant 0 : index
    %c0_101 = arith.constant 0 : index
    %182 = vector.load %arg15[%c1_99, %c0_100, %c0_101] : memref<6x1x32xf32, #tpu.memory_space<vmem>>, vector<1x1x32xf32>
    %183 = vector.shape_cast %182 : vector<1x1x32xf32> to vector<1x32xf32>
    %cst_102 = arith.constant dense<0.000000e+00> : vector<8xf32>
    %184 = vector.multi_reduction <add>, %179, %cst_102 [1] : vector<8x32xf32> to vector<8xf32>
    %185 = vector.shape_cast %184 : vector<8xf32> to vector<8x1xf32>
    %cst_103 = arith.constant 3.200000e+01 : f32
    %186 = vector.broadcast %cst_103 : f32 to vector<8x1xf32>
    %187 = arith.divf %185, %186 : vector<8x1xf32>
    %188 = vector.broadcast %187 : vector<8x1xf32> to vector<8x32xf32>
    %189 = arith.subf %179, %188 : vector<8x32xf32>
    %190 = arith.mulf %189, %189 : vector<8x32xf32>
    %cst_104 = arith.constant dense<0.000000e+00> : vector<8xf32>
    %191 = vector.multi_reduction <add>, %190, %cst_104 [1] : vector<8x32xf32> to vector<8xf32>
    %192 = vector.shape_cast %191 : vector<8xf32> to vector<8x1xf32>
    %cst_105 = arith.constant 3.200000e+01 : f32
    %193 = vector.broadcast %cst_105 : f32 to vector<8x1xf32>
    %194 = arith.divf %192, %193 : vector<8x1xf32>
    %195 = vector.broadcast %187 : vector<8x1xf32> to vector<8x32xf32>
    %196 = arith.subf %179, %195 : vector<8x32xf32>
    %cst_106 = arith.constant 9.99999974E-6 : f32
    %197 = vector.broadcast %cst_106 : f32 to vector<8x1xf32>
    %198 = arith.addf %194, %197 : vector<8x1xf32>
    %199 = math.rsqrt %198 : vector<8x1xf32>
    %200 = vector.broadcast %199 : vector<8x1xf32> to vector<8x32xf32>
    %201 = arith.mulf %196, %200 : vector<8x32xf32>
    %202 = vector.broadcast %181 : vector<1x32xf32> to vector<8x32xf32>
    %203 = arith.mulf %201, %202 : vector<8x32xf32>
    %204 = vector.broadcast %183 : vector<1x32xf32> to vector<8x32xf32>
    %205 = arith.addf %203, %204 : vector<8x32xf32>
    %c2 = arith.constant 2 : index
    %c0_107 = arith.constant 0 : index
    %c0_108 = arith.constant 0 : index
    %206 = vector.load %arg6[%c2, %c0_107, %c0_108] : memref<6x32x32xf32, #tpu.memory_space<vmem>>, vector<1x32x32xf32>
    %207 = vector.shape_cast %206 : vector<1x32x32xf32> to vector<32x32xf32>
    %cst_109 = arith.constant dense<0.000000e+00> : vector<8x32xf32>
    %208 = tpu.matmul %205, %207, %cst_109 {dimension_numbers = #tpu.dot_dimension_numbers<[1], [0], [0], [1], [0, 0, 1, 1], [], []>} : vector<8x32xf32>, vector<32x32xf32>, vector<8x32xf32> -> vector<8x32xf32>
    %c2_110 = arith.constant 2 : index
    %c0_111 = arith.constant 0 : index
    %c0_112 = arith.constant 0 : index
    %209 = vector.load %arg7[%c2_110, %c0_111, %c0_112] : memref<6x1x32xf32, #tpu.memory_space<vmem>>, vector<1x1x32xf32>
    %210 = vector.shape_cast %209 : vector<1x1x32xf32> to vector<1x32xf32>
    %211 = vector.broadcast %210 : vector<1x32xf32> to vector<8x32xf32>
    %212 = arith.addf %208, %211 : vector<8x32xf32>
    %213 = arith.addf %212, %205 : vector<8x32xf32>
    %c2_113 = arith.constant 2 : index
    %c0_114 = arith.constant 0 : index
    %c0_115 = arith.constant 0 : index
    %214 = vector.load %arg8[%c2_113, %c0_114, %c0_115] : memref<6x1x32xf32, #tpu.memory_space<vmem>>, vector<1x1x32xf32>
    %215 = vector.shape_cast %214 : vector<1x1x32xf32> to vector<1x32xf32>
    %c2_116 = arith.constant 2 : index
    %c0_117 = arith.constant 0 : index
    %c0_118 = arith.constant 0 : index
    %216 = vector.load %arg9[%c2_116, %c0_117, %c0_118] : memref<6x1x32xf32, #tpu.memory_space<vmem>>, vector<1x1x32xf32>
    %217 = vector.shape_cast %216 : vector<1x1x32xf32> to vector<1x32xf32>
    %cst_119 = arith.constant dense<0.000000e+00> : vector<8xf32>
    %218 = vector.multi_reduction <add>, %213, %cst_119 [1] : vector<8x32xf32> to vector<8xf32>
    %219 = vector.shape_cast %218 : vector<8xf32> to vector<8x1xf32>
    %cst_120 = arith.constant 3.200000e+01 : f32
    %220 = vector.broadcast %cst_120 : f32 to vector<8x1xf32>
    %221 = arith.divf %219, %220 : vector<8x1xf32>
    %222 = vector.broadcast %221 : vector<8x1xf32> to vector<8x32xf32>
    %223 = arith.subf %213, %222 : vector<8x32xf32>
    %224 = arith.mulf %223, %223 : vector<8x32xf32>
    %cst_121 = arith.constant dense<0.000000e+00> : vector<8xf32>
    %225 = vector.multi_reduction <add>, %224, %cst_121 [1] : vector<8x32xf32> to vector<8xf32>
    %226 = vector.shape_cast %225 : vector<8xf32> to vector<8x1xf32>
    %cst_122 = arith.constant 3.200000e+01 : f32
    %227 = vector.broadcast %cst_122 : f32 to vector<8x1xf32>
    %228 = arith.divf %226, %227 : vector<8x1xf32>
    %229 = vector.broadcast %221 : vector<8x1xf32> to vector<8x32xf32>
    %230 = arith.subf %213, %229 : vector<8x32xf32>
    %cst_123 = arith.constant 9.99999974E-6 : f32
    %231 = vector.broadcast %cst_123 : f32 to vector<8x1xf32>
    %232 = arith.addf %228, %231 : vector<8x1xf32>
    %233 = math.rsqrt %232 : vector<8x1xf32>
    %234 = vector.broadcast %233 : vector<8x1xf32> to vector<8x32xf32>
    %235 = arith.mulf %230, %234 : vector<8x32xf32>
    %236 = vector.broadcast %215 : vector<1x32xf32> to vector<8x32xf32>
    %237 = arith.mulf %235, %236 : vector<8x32xf32>
    %238 = vector.broadcast %217 : vector<1x32xf32> to vector<8x32xf32>
    %239 = arith.addf %237, %238 : vector<8x32xf32>
    %c2_124 = arith.constant 2 : index
    %c0_125 = arith.constant 0 : index
    %c0_126 = arith.constant 0 : index
    %240 = vector.load %arg10[%c2_124, %c0_125, %c0_126] : memref<6x32x128xf32, #tpu.memory_space<vmem>>, vector<1x32x128xf32>
    %241 = vector.shape_cast %240 : vector<1x32x128xf32> to vector<32x128xf32>
    %cst_127 = arith.constant dense<0.000000e+00> : vector<8x128xf32>
    %242 = tpu.matmul %239, %241, %cst_127 {dimension_numbers = #tpu.dot_dimension_numbers<[1], [0], [0], [1], [0, 0, 1, 1], [], []>} : vector<8x32xf32>, vector<32x128xf32>, vector<8x128xf32> -> vector<8x128xf32>
    %c2_128 = arith.constant 2 : index
    %c0_129 = arith.constant 0 : index
    %c0_130 = arith.constant 0 : index
    %243 = vector.load %arg11[%c2_128, %c0_129, %c0_130] : memref<6x1x128xf32, #tpu.memory_space<vmem>>, vector<1x1x128xf32>
    %244 = vector.shape_cast %243 : vector<1x1x128xf32> to vector<1x128xf32>
    %245 = vector.broadcast %244 : vector<1x128xf32> to vector<8x128xf32>
    %246 = arith.addf %242, %245 : vector<8x128xf32>
    %cst_131 = arith.constant 5.000000e-01 : f32
    %247 = vector.broadcast %cst_131 : f32 to vector<8x128xf32>
    %248 = arith.mulf %247, %246 : vector<8x128xf32>
    %249 = arith.mulf %246, %246 : vector<8x128xf32>
    %250 = arith.mulf %249, %246 : vector<8x128xf32>
    %cst_132 = arith.constant 4.471500e-02 : f32
    %251 = vector.broadcast %cst_132 : f32 to vector<8x128xf32>
    %252 = arith.mulf %251, %250 : vector<8x128xf32>
    %253 = arith.addf %246, %252 : vector<8x128xf32>
    %cst_133 = arith.constant 0.797884583 : f32
    %254 = vector.broadcast %cst_133 : f32 to vector<8x128xf32>
    %255 = arith.mulf %254, %253 : vector<8x128xf32>
    %256 = math.tanh %255 : vector<8x128xf32>
    %cst_134 = arith.constant 1.000000e+00 : f32
    %257 = vector.broadcast %cst_134 : f32 to vector<8x128xf32>
    %258 = arith.addf %257, %256 : vector<8x128xf32>
    %259 = arith.mulf %248, %258 : vector<8x128xf32>
    %c2_135 = arith.constant 2 : index
    %c0_136 = arith.constant 0 : index
    %c0_137 = arith.constant 0 : index
    %260 = vector.load %arg12[%c2_135, %c0_136, %c0_137] : memref<6x128x32xf32, #tpu.memory_space<vmem>>, vector<1x128x32xf32>
    %261 = vector.shape_cast %260 : vector<1x128x32xf32> to vector<128x32xf32>
    %cst_138 = arith.constant dense<0.000000e+00> : vector<8x32xf32>
    %262 = tpu.matmul %259, %261, %cst_138 {dimension_numbers = #tpu.dot_dimension_numbers<[1], [0], [0], [1], [0, 0, 1, 1], [], []>} : vector<8x128xf32>, vector<128x32xf32>, vector<8x32xf32> -> vector<8x32xf32>
    %c2_139 = arith.constant 2 : index
    %c0_140 = arith.constant 0 : index
    %c0_141 = arith.constant 0 : index
    %263 = vector.load %arg13[%c2_139, %c0_140, %c0_141] : memref<6x1x32xf32, #tpu.memory_space<vmem>>, vector<1x1x32xf32>
    %264 = vector.shape_cast %263 : vector<1x1x32xf32> to vector<1x32xf32>
    %265 = vector.broadcast %264 : vector<1x32xf32> to vector<8x32xf32>
    %266 = arith.addf %262, %265 : vector<8x32xf32>
    %267 = arith.addf %266, %239 : vector<8x32xf32>
    %c2_142 = arith.constant 2 : index
    %c0_143 = arith.constant 0 : index
    %c0_144 = arith.constant 0 : index
    %268 = vector.load %arg14[%c2_142, %c0_143, %c0_144] : memref<6x1x32xf32, #tpu.memory_space<vmem>>, vector<1x1x32xf32>
    %269 = vector.shape_cast %268 : vector<1x1x32xf32> to vector<1x32xf32>
    %c2_145 = arith.constant 2 : index
    %c0_146 = arith.constant 0 : index
    %c0_147 = arith.constant 0 : index
    %270 = vector.load %arg15[%c2_145, %c0_146, %c0_147] : memref<6x1x32xf32, #tpu.memory_space<vmem>>, vector<1x1x32xf32>
    %271 = vector.shape_cast %270 : vector<1x1x32xf32> to vector<1x32xf32>
    %cst_148 = arith.constant dense<0.000000e+00> : vector<8xf32>
    %272 = vector.multi_reduction <add>, %267, %cst_148 [1] : vector<8x32xf32> to vector<8xf32>
    %273 = vector.shape_cast %272 : vector<8xf32> to vector<8x1xf32>
    %cst_149 = arith.constant 3.200000e+01 : f32
    %274 = vector.broadcast %cst_149 : f32 to vector<8x1xf32>
    %275 = arith.divf %273, %274 : vector<8x1xf32>
    %276 = vector.broadcast %275 : vector<8x1xf32> to vector<8x32xf32>
    %277 = arith.subf %267, %276 : vector<8x32xf32>
    %278 = arith.mulf %277, %277 : vector<8x32xf32>
    %cst_150 = arith.constant dense<0.000000e+00> : vector<8xf32>
    %279 = vector.multi_reduction <add>, %278, %cst_150 [1] : vector<8x32xf32> to vector<8xf32>
    %280 = vector.shape_cast %279 : vector<8xf32> to vector<8x1xf32>
    %cst_151 = arith.constant 3.200000e+01 : f32
    %281 = vector.broadcast %cst_151 : f32 to vector<8x1xf32>
    %282 = arith.divf %280, %281 : vector<8x1xf32>
    %283 = vector.broadcast %275 : vector<8x1xf32> to vector<8x32xf32>
    %284 = arith.subf %267, %283 : vector<8x32xf32>
    %cst_152 = arith.constant 9.99999974E-6 : f32
    %285 = vector.broadcast %cst_152 : f32 to vector<8x1xf32>
    %286 = arith.addf %282, %285 : vector<8x1xf32>
    %287 = math.rsqrt %286 : vector<8x1xf32>
    %288 = vector.broadcast %287 : vector<8x1xf32> to vector<8x32xf32>
    %289 = arith.mulf %284, %288 : vector<8x32xf32>
    %290 = vector.broadcast %269 : vector<1x32xf32> to vector<8x32xf32>
    %291 = arith.mulf %289, %290 : vector<8x32xf32>
    %292 = vector.broadcast %271 : vector<1x32xf32> to vector<8x32xf32>
    %293 = arith.addf %291, %292 : vector<8x32xf32>
    %c3 = arith.constant 3 : index
    %c0_153 = arith.constant 0 : index
    %c0_154 = arith.constant 0 : index
    %294 = vector.load %arg6[%c3, %c0_153, %c0_154] : memref<6x32x32xf32, #tpu.memory_space<vmem>>, vector<1x32x32xf32>
    %295 = vector.shape_cast %294 : vector<1x32x32xf32> to vector<32x32xf32>
    %cst_155 = arith.constant dense<0.000000e+00> : vector<8x32xf32>
    %296 = tpu.matmul %293, %295, %cst_155 {dimension_numbers = #tpu.dot_dimension_numbers<[1], [0], [0], [1], [0, 0, 1, 1], [], []>} : vector<8x32xf32>, vector<32x32xf32>, vector<8x32xf32> -> vector<8x32xf32>
    %c3_156 = arith.constant 3 : index
    %c0_157 = arith.constant 0 : index
    %c0_158 = arith.constant 0 : index
    %297 = vector.load %arg7[%c3_156, %c0_157, %c0_158] : memref<6x1x32xf32, #tpu.memory_space<vmem>>, vector<1x1x32xf32>
    %298 = vector.shape_cast %297 : vector<1x1x32xf32> to vector<1x32xf32>
    %299 = vector.broadcast %298 : vector<1x32xf32> to vector<8x32xf32>
    %300 = arith.addf %296, %299 : vector<8x32xf32>
    %301 = arith.addf %300, %293 : vector<8x32xf32>
    %c3_159 = arith.constant 3 : index
    %c0_160 = arith.constant 0 : index
    %c0_161 = arith.constant 0 : index
    %302 = vector.load %arg8[%c3_159, %c0_160, %c0_161] : memref<6x1x32xf32, #tpu.memory_space<vmem>>, vector<1x1x32xf32>
    %303 = vector.shape_cast %302 : vector<1x1x32xf32> to vector<1x32xf32>
    %c3_162 = arith.constant 3 : index
    %c0_163 = arith.constant 0 : index
    %c0_164 = arith.constant 0 : index
    %304 = vector.load %arg9[%c3_162, %c0_163, %c0_164] : memref<6x1x32xf32, #tpu.memory_space<vmem>>, vector<1x1x32xf32>
    %305 = vector.shape_cast %304 : vector<1x1x32xf32> to vector<1x32xf32>
    %cst_165 = arith.constant dense<0.000000e+00> : vector<8xf32>
    %306 = vector.multi_reduction <add>, %301, %cst_165 [1] : vector<8x32xf32> to vector<8xf32>
    %307 = vector.shape_cast %306 : vector<8xf32> to vector<8x1xf32>
    %cst_166 = arith.constant 3.200000e+01 : f32
    %308 = vector.broadcast %cst_166 : f32 to vector<8x1xf32>
    %309 = arith.divf %307, %308 : vector<8x1xf32>
    %310 = vector.broadcast %309 : vector<8x1xf32> to vector<8x32xf32>
    %311 = arith.subf %301, %310 : vector<8x32xf32>
    %312 = arith.mulf %311, %311 : vector<8x32xf32>
    %cst_167 = arith.constant dense<0.000000e+00> : vector<8xf32>
    %313 = vector.multi_reduction <add>, %312, %cst_167 [1] : vector<8x32xf32> to vector<8xf32>
    %314 = vector.shape_cast %313 : vector<8xf32> to vector<8x1xf32>
    %cst_168 = arith.constant 3.200000e+01 : f32
    %315 = vector.broadcast %cst_168 : f32 to vector<8x1xf32>
    %316 = arith.divf %314, %315 : vector<8x1xf32>
    %317 = vector.broadcast %309 : vector<8x1xf32> to vector<8x32xf32>
    %318 = arith.subf %301, %317 : vector<8x32xf32>
    %cst_169 = arith.constant 9.99999974E-6 : f32
    %319 = vector.broadcast %cst_169 : f32 to vector<8x1xf32>
    %320 = arith.addf %316, %319 : vector<8x1xf32>
    %321 = math.rsqrt %320 : vector<8x1xf32>
    %322 = vector.broadcast %321 : vector<8x1xf32> to vector<8x32xf32>
    %323 = arith.mulf %318, %322 : vector<8x32xf32>
    %324 = vector.broadcast %303 : vector<1x32xf32> to vector<8x32xf32>
    %325 = arith.mulf %323, %324 : vector<8x32xf32>
    %326 = vector.broadcast %305 : vector<1x32xf32> to vector<8x32xf32>
    %327 = arith.addf %325, %326 : vector<8x32xf32>
    %c3_170 = arith.constant 3 : index
    %c0_171 = arith.constant 0 : index
    %c0_172 = arith.constant 0 : index
    %328 = vector.load %arg10[%c3_170, %c0_171, %c0_172] : memref<6x32x128xf32, #tpu.memory_space<vmem>>, vector<1x32x128xf32>
    %329 = vector.shape_cast %328 : vector<1x32x128xf32> to vector<32x128xf32>
    %cst_173 = arith.constant dense<0.000000e+00> : vector<8x128xf32>
    %330 = tpu.matmul %327, %329, %cst_173 {dimension_numbers = #tpu.dot_dimension_numbers<[1], [0], [0], [1], [0, 0, 1, 1], [], []>} : vector<8x32xf32>, vector<32x128xf32>, vector<8x128xf32> -> vector<8x128xf32>
    %c3_174 = arith.constant 3 : index
    %c0_175 = arith.constant 0 : index
    %c0_176 = arith.constant 0 : index
    %331 = vector.load %arg11[%c3_174, %c0_175, %c0_176] : memref<6x1x128xf32, #tpu.memory_space<vmem>>, vector<1x1x128xf32>
    %332 = vector.shape_cast %331 : vector<1x1x128xf32> to vector<1x128xf32>
    %333 = vector.broadcast %332 : vector<1x128xf32> to vector<8x128xf32>
    %334 = arith.addf %330, %333 : vector<8x128xf32>
    %cst_177 = arith.constant 5.000000e-01 : f32
    %335 = vector.broadcast %cst_177 : f32 to vector<8x128xf32>
    %336 = arith.mulf %335, %334 : vector<8x128xf32>
    %337 = arith.mulf %334, %334 : vector<8x128xf32>
    %338 = arith.mulf %337, %334 : vector<8x128xf32>
    %cst_178 = arith.constant 4.471500e-02 : f32
    %339 = vector.broadcast %cst_178 : f32 to vector<8x128xf32>
    %340 = arith.mulf %339, %338 : vector<8x128xf32>
    %341 = arith.addf %334, %340 : vector<8x128xf32>
    %cst_179 = arith.constant 0.797884583 : f32
    %342 = vector.broadcast %cst_179 : f32 to vector<8x128xf32>
    %343 = arith.mulf %342, %341 : vector<8x128xf32>
    %344 = math.tanh %343 : vector<8x128xf32>
    %cst_180 = arith.constant 1.000000e+00 : f32
    %345 = vector.broadcast %cst_180 : f32 to vector<8x128xf32>
    %346 = arith.addf %345, %344 : vector<8x128xf32>
    %347 = arith.mulf %336, %346 : vector<8x128xf32>
    %c3_181 = arith.constant 3 : index
    %c0_182 = arith.constant 0 : index
    %c0_183 = arith.constant 0 : index
    %348 = vector.load %arg12[%c3_181, %c0_182, %c0_183] : memref<6x128x32xf32, #tpu.memory_space<vmem>>, vector<1x128x32xf32>
    %349 = vector.shape_cast %348 : vector<1x128x32xf32> to vector<128x32xf32>
    %cst_184 = arith.constant dense<0.000000e+00> : vector<8x32xf32>
    %350 = tpu.matmul %347, %349, %cst_184 {dimension_numbers = #tpu.dot_dimension_numbers<[1], [0], [0], [1], [0, 0, 1, 1], [], []>} : vector<8x128xf32>, vector<128x32xf32>, vector<8x32xf32> -> vector<8x32xf32>
    %c3_185 = arith.constant 3 : index
    %c0_186 = arith.constant 0 : index
    %c0_187 = arith.constant 0 : index
    %351 = vector.load %arg13[%c3_185, %c0_186, %c0_187] : memref<6x1x32xf32, #tpu.memory_space<vmem>>, vector<1x1x32xf32>
    %352 = vector.shape_cast %351 : vector<1x1x32xf32> to vector<1x32xf32>
    %353 = vector.broadcast %352 : vector<1x32xf32> to vector<8x32xf32>
    %354 = arith.addf %350, %353 : vector<8x32xf32>
    %355 = arith.addf %354, %327 : vector<8x32xf32>
    %c3_188 = arith.constant 3 : index
    %c0_189 = arith.constant 0 : index
    %c0_190 = arith.constant 0 : index
    %356 = vector.load %arg14[%c3_188, %c0_189, %c0_190] : memref<6x1x32xf32, #tpu.memory_space<vmem>>, vector<1x1x32xf32>
    %357 = vector.shape_cast %356 : vector<1x1x32xf32> to vector<1x32xf32>
    %c3_191 = arith.constant 3 : index
    %c0_192 = arith.constant 0 : index
    %c0_193 = arith.constant 0 : index
    %358 = vector.load %arg15[%c3_191, %c0_192, %c0_193] : memref<6x1x32xf32, #tpu.memory_space<vmem>>, vector<1x1x32xf32>
    %359 = vector.shape_cast %358 : vector<1x1x32xf32> to vector<1x32xf32>
    %cst_194 = arith.constant dense<0.000000e+00> : vector<8xf32>
    %360 = vector.multi_reduction <add>, %355, %cst_194 [1] : vector<8x32xf32> to vector<8xf32>
    %361 = vector.shape_cast %360 : vector<8xf32> to vector<8x1xf32>
    %cst_195 = arith.constant 3.200000e+01 : f32
    %362 = vector.broadcast %cst_195 : f32 to vector<8x1xf32>
    %363 = arith.divf %361, %362 : vector<8x1xf32>
    %364 = vector.broadcast %363 : vector<8x1xf32> to vector<8x32xf32>
    %365 = arith.subf %355, %364 : vector<8x32xf32>
    %366 = arith.mulf %365, %365 : vector<8x32xf32>
    %cst_196 = arith.constant dense<0.000000e+00> : vector<8xf32>
    %367 = vector.multi_reduction <add>, %366, %cst_196 [1] : vector<8x32xf32> to vector<8xf32>
    %368 = vector.shape_cast %367 : vector<8xf32> to vector<8x1xf32>
    %cst_197 = arith.constant 3.200000e+01 : f32
    %369 = vector.broadcast %cst_197 : f32 to vector<8x1xf32>
    %370 = arith.divf %368, %369 : vector<8x1xf32>
    %371 = vector.broadcast %363 : vector<8x1xf32> to vector<8x32xf32>
    %372 = arith.subf %355, %371 : vector<8x32xf32>
    %cst_198 = arith.constant 9.99999974E-6 : f32
    %373 = vector.broadcast %cst_198 : f32 to vector<8x1xf32>
    %374 = arith.addf %370, %373 : vector<8x1xf32>
    %375 = math.rsqrt %374 : vector<8x1xf32>
    %376 = vector.broadcast %375 : vector<8x1xf32> to vector<8x32xf32>
    %377 = arith.mulf %372, %376 : vector<8x32xf32>
    %378 = vector.broadcast %357 : vector<1x32xf32> to vector<8x32xf32>
    %379 = arith.mulf %377, %378 : vector<8x32xf32>
    %380 = vector.broadcast %359 : vector<1x32xf32> to vector<8x32xf32>
    %381 = arith.addf %379, %380 : vector<8x32xf32>
    %c4 = arith.constant 4 : index
    %c0_199 = arith.constant 0 : index
    %c0_200 = arith.constant 0 : index
    %382 = vector.load %arg6[%c4, %c0_199, %c0_200] : memref<6x32x32xf32, #tpu.memory_space<vmem>>, vector<1x32x32xf32>
    %383 = vector.shape_cast %382 : vector<1x32x32xf32> to vector<32x32xf32>
    %cst_201 = arith.constant dense<0.000000e+00> : vector<8x32xf32>
    %384 = tpu.matmul %381, %383, %cst_201 {dimension_numbers = #tpu.dot_dimension_numbers<[1], [0], [0], [1], [0, 0, 1, 1], [], []>} : vector<8x32xf32>, vector<32x32xf32>, vector<8x32xf32> -> vector<8x32xf32>
    %c4_202 = arith.constant 4 : index
    %c0_203 = arith.constant 0 : index
    %c0_204 = arith.constant 0 : index
    %385 = vector.load %arg7[%c4_202, %c0_203, %c0_204] : memref<6x1x32xf32, #tpu.memory_space<vmem>>, vector<1x1x32xf32>
    %386 = vector.shape_cast %385 : vector<1x1x32xf32> to vector<1x32xf32>
    %387 = vector.broadcast %386 : vector<1x32xf32> to vector<8x32xf32>
    %388 = arith.addf %384, %387 : vector<8x32xf32>
    %389 = arith.addf %388, %381 : vector<8x32xf32>
    %c4_205 = arith.constant 4 : index
    %c0_206 = arith.constant 0 : index
    %c0_207 = arith.constant 0 : index
    %390 = vector.load %arg8[%c4_205, %c0_206, %c0_207] : memref<6x1x32xf32, #tpu.memory_space<vmem>>, vector<1x1x32xf32>
    %391 = vector.shape_cast %390 : vector<1x1x32xf32> to vector<1x32xf32>
    %c4_208 = arith.constant 4 : index
    %c0_209 = arith.constant 0 : index
    %c0_210 = arith.constant 0 : index
    %392 = vector.load %arg9[%c4_208, %c0_209, %c0_210] : memref<6x1x32xf32, #tpu.memory_space<vmem>>, vector<1x1x32xf32>
    %393 = vector.shape_cast %392 : vector<1x1x32xf32> to vector<1x32xf32>
    %cst_211 = arith.constant dense<0.000000e+00> : vector<8xf32>
    %394 = vector.multi_reduction <add>, %389, %cst_211 [1] : vector<8x32xf32> to vector<8xf32>
    %395 = vector.shape_cast %394 : vector<8xf32> to vector<8x1xf32>
    %cst_212 = arith.constant 3.200000e+01 : f32
    %396 = vector.broadcast %cst_212 : f32 to vector<8x1xf32>
    %397 = arith.divf %395, %396 : vector<8x1xf32>
    %398 = vector.broadcast %397 : vector<8x1xf32> to vector<8x32xf32>
    %399 = arith.subf %389, %398 : vector<8x32xf32>
    %400 = arith.mulf %399, %399 : vector<8x32xf32>
    %cst_213 = arith.constant dense<0.000000e+00> : vector<8xf32>
    %401 = vector.multi_reduction <add>, %400, %cst_213 [1] : vector<8x32xf32> to vector<8xf32>
    %402 = vector.shape_cast %401 : vector<8xf32> to vector<8x1xf32>
    %cst_214 = arith.constant 3.200000e+01 : f32
    %403 = vector.broadcast %cst_214 : f32 to vector<8x1xf32>
    %404 = arith.divf %402, %403 : vector<8x1xf32>
    %405 = vector.broadcast %397 : vector<8x1xf32> to vector<8x32xf32>
    %406 = arith.subf %389, %405 : vector<8x32xf32>
    %cst_215 = arith.constant 9.99999974E-6 : f32
    %407 = vector.broadcast %cst_215 : f32 to vector<8x1xf32>
    %408 = arith.addf %404, %407 : vector<8x1xf32>
    %409 = math.rsqrt %408 : vector<8x1xf32>
    %410 = vector.broadcast %409 : vector<8x1xf32> to vector<8x32xf32>
    %411 = arith.mulf %406, %410 : vector<8x32xf32>
    %412 = vector.broadcast %391 : vector<1x32xf32> to vector<8x32xf32>
    %413 = arith.mulf %411, %412 : vector<8x32xf32>
    %414 = vector.broadcast %393 : vector<1x32xf32> to vector<8x32xf32>
    %415 = arith.addf %413, %414 : vector<8x32xf32>
    %c4_216 = arith.constant 4 : index
    %c0_217 = arith.constant 0 : index
    %c0_218 = arith.constant 0 : index
    %416 = vector.load %arg10[%c4_216, %c0_217, %c0_218] : memref<6x32x128xf32, #tpu.memory_space<vmem>>, vector<1x32x128xf32>
    %417 = vector.shape_cast %416 : vector<1x32x128xf32> to vector<32x128xf32>
    %cst_219 = arith.constant dense<0.000000e+00> : vector<8x128xf32>
    %418 = tpu.matmul %415, %417, %cst_219 {dimension_numbers = #tpu.dot_dimension_numbers<[1], [0], [0], [1], [0, 0, 1, 1], [], []>} : vector<8x32xf32>, vector<32x128xf32>, vector<8x128xf32> -> vector<8x128xf32>
    %c4_220 = arith.constant 4 : index
    %c0_221 = arith.constant 0 : index
    %c0_222 = arith.constant 0 : index
    %419 = vector.load %arg11[%c4_220, %c0_221, %c0_222] : memref<6x1x128xf32, #tpu.memory_space<vmem>>, vector<1x1x128xf32>
    %420 = vector.shape_cast %419 : vector<1x1x128xf32> to vector<1x128xf32>
    %421 = vector.broadcast %420 : vector<1x128xf32> to vector<8x128xf32>
    %422 = arith.addf %418, %421 : vector<8x128xf32>
    %cst_223 = arith.constant 5.000000e-01 : f32
    %423 = vector.broadcast %cst_223 : f32 to vector<8x128xf32>
    %424 = arith.mulf %423, %422 : vector<8x128xf32>
    %425 = arith.mulf %422, %422 : vector<8x128xf32>
    %426 = arith.mulf %425, %422 : vector<8x128xf32>
    %cst_224 = arith.constant 4.471500e-02 : f32
    %427 = vector.broadcast %cst_224 : f32 to vector<8x128xf32>
    %428 = arith.mulf %427, %426 : vector<8x128xf32>
    %429 = arith.addf %422, %428 : vector<8x128xf32>
    %cst_225 = arith.constant 0.797884583 : f32
    %430 = vector.broadcast %cst_225 : f32 to vector<8x128xf32>
    %431 = arith.mulf %430, %429 : vector<8x128xf32>
    %432 = math.tanh %431 : vector<8x128xf32>
    %cst_226 = arith.constant 1.000000e+00 : f32
    %433 = vector.broadcast %cst_226 : f32 to vector<8x128xf32>
    %434 = arith.addf %433, %432 : vector<8x128xf32>
    %435 = arith.mulf %424, %434 : vector<8x128xf32>
    %c4_227 = arith.constant 4 : index
    %c0_228 = arith.constant 0 : index
    %c0_229 = arith.constant 0 : index
    %436 = vector.load %arg12[%c4_227, %c0_228, %c0_229] : memref<6x128x32xf32, #tpu.memory_space<vmem>>, vector<1x128x32xf32>
    %437 = vector.shape_cast %436 : vector<1x128x32xf32> to vector<128x32xf32>
    %cst_230 = arith.constant dense<0.000000e+00> : vector<8x32xf32>
    %438 = tpu.matmul %435, %437, %cst_230 {dimension_numbers = #tpu.dot_dimension_numbers<[1], [0], [0], [1], [0, 0, 1, 1], [], []>} : vector<8x128xf32>, vector<128x32xf32>, vector<8x32xf32> -> vector<8x32xf32>
    %c4_231 = arith.constant 4 : index
    %c0_232 = arith.constant 0 : index
    %c0_233 = arith.constant 0 : index
    %439 = vector.load %arg13[%c4_231, %c0_232, %c0_233] : memref<6x1x32xf32, #tpu.memory_space<vmem>>, vector<1x1x32xf32>
    %440 = vector.shape_cast %439 : vector<1x1x32xf32> to vector<1x32xf32>
    %441 = vector.broadcast %440 : vector<1x32xf32> to vector<8x32xf32>
    %442 = arith.addf %438, %441 : vector<8x32xf32>
    %443 = arith.addf %442, %415 : vector<8x32xf32>
    %c4_234 = arith.constant 4 : index
    %c0_235 = arith.constant 0 : index
    %c0_236 = arith.constant 0 : index
    %444 = vector.load %arg14[%c4_234, %c0_235, %c0_236] : memref<6x1x32xf32, #tpu.memory_space<vmem>>, vector<1x1x32xf32>
    %445 = vector.shape_cast %444 : vector<1x1x32xf32> to vector<1x32xf32>
    %c4_237 = arith.constant 4 : index
    %c0_238 = arith.constant 0 : index
    %c0_239 = arith.constant 0 : index
    %446 = vector.load %arg15[%c4_237, %c0_238, %c0_239] : memref<6x1x32xf32, #tpu.memory_space<vmem>>, vector<1x1x32xf32>
    %447 = vector.shape_cast %446 : vector<1x1x32xf32> to vector<1x32xf32>
    %cst_240 = arith.constant dense<0.000000e+00> : vector<8xf32>
    %448 = vector.multi_reduction <add>, %443, %cst_240 [1] : vector<8x32xf32> to vector<8xf32>
    %449 = vector.shape_cast %448 : vector<8xf32> to vector<8x1xf32>
    %cst_241 = arith.constant 3.200000e+01 : f32
    %450 = vector.broadcast %cst_241 : f32 to vector<8x1xf32>
    %451 = arith.divf %449, %450 : vector<8x1xf32>
    %452 = vector.broadcast %451 : vector<8x1xf32> to vector<8x32xf32>
    %453 = arith.subf %443, %452 : vector<8x32xf32>
    %454 = arith.mulf %453, %453 : vector<8x32xf32>
    %cst_242 = arith.constant dense<0.000000e+00> : vector<8xf32>
    %455 = vector.multi_reduction <add>, %454, %cst_242 [1] : vector<8x32xf32> to vector<8xf32>
    %456 = vector.shape_cast %455 : vector<8xf32> to vector<8x1xf32>
    %cst_243 = arith.constant 3.200000e+01 : f32
    %457 = vector.broadcast %cst_243 : f32 to vector<8x1xf32>
    %458 = arith.divf %456, %457 : vector<8x1xf32>
    %459 = vector.broadcast %451 : vector<8x1xf32> to vector<8x32xf32>
    %460 = arith.subf %443, %459 : vector<8x32xf32>
    %cst_244 = arith.constant 9.99999974E-6 : f32
    %461 = vector.broadcast %cst_244 : f32 to vector<8x1xf32>
    %462 = arith.addf %458, %461 : vector<8x1xf32>
    %463 = math.rsqrt %462 : vector<8x1xf32>
    %464 = vector.broadcast %463 : vector<8x1xf32> to vector<8x32xf32>
    %465 = arith.mulf %460, %464 : vector<8x32xf32>
    %466 = vector.broadcast %445 : vector<1x32xf32> to vector<8x32xf32>
    %467 = arith.mulf %465, %466 : vector<8x32xf32>
    %468 = vector.broadcast %447 : vector<1x32xf32> to vector<8x32xf32>
    %469 = arith.addf %467, %468 : vector<8x32xf32>
    %c5 = arith.constant 5 : index
    %c0_245 = arith.constant 0 : index
    %c0_246 = arith.constant 0 : index
    %470 = vector.load %arg6[%c5, %c0_245, %c0_246] : memref<6x32x32xf32, #tpu.memory_space<vmem>>, vector<1x32x32xf32>
    %471 = vector.shape_cast %470 : vector<1x32x32xf32> to vector<32x32xf32>
    %cst_247 = arith.constant dense<0.000000e+00> : vector<8x32xf32>
    %472 = tpu.matmul %469, %471, %cst_247 {dimension_numbers = #tpu.dot_dimension_numbers<[1], [0], [0], [1], [0, 0, 1, 1], [], []>} : vector<8x32xf32>, vector<32x32xf32>, vector<8x32xf32> -> vector<8x32xf32>
    %c5_248 = arith.constant 5 : index
    %c0_249 = arith.constant 0 : index
    %c0_250 = arith.constant 0 : index
    %473 = vector.load %arg7[%c5_248, %c0_249, %c0_250] : memref<6x1x32xf32, #tpu.memory_space<vmem>>, vector<1x1x32xf32>
    %474 = vector.shape_cast %473 : vector<1x1x32xf32> to vector<1x32xf32>
    %475 = vector.broadcast %474 : vector<1x32xf32> to vector<8x32xf32>
    %476 = arith.addf %472, %475 : vector<8x32xf32>
    %477 = arith.addf %476, %469 : vector<8x32xf32>
    %c5_251 = arith.constant 5 : index
    %c0_252 = arith.constant 0 : index
    %c0_253 = arith.constant 0 : index
    %478 = vector.load %arg8[%c5_251, %c0_252, %c0_253] : memref<6x1x32xf32, #tpu.memory_space<vmem>>, vector<1x1x32xf32>
    %479 = vector.shape_cast %478 : vector<1x1x32xf32> to vector<1x32xf32>
    %c5_254 = arith.constant 5 : index
    %c0_255 = arith.constant 0 : index
    %c0_256 = arith.constant 0 : index
    %480 = vector.load %arg9[%c5_254, %c0_255, %c0_256] : memref<6x1x32xf32, #tpu.memory_space<vmem>>, vector<1x1x32xf32>
    %481 = vector.shape_cast %480 : vector<1x1x32xf32> to vector<1x32xf32>
    %cst_257 = arith.constant dense<0.000000e+00> : vector<8xf32>
    %482 = vector.multi_reduction <add>, %477, %cst_257 [1] : vector<8x32xf32> to vector<8xf32>
    %483 = vector.shape_cast %482 : vector<8xf32> to vector<8x1xf32>
    %cst_258 = arith.constant 3.200000e+01 : f32
    %484 = vector.broadcast %cst_258 : f32 to vector<8x1xf32>
    %485 = arith.divf %483, %484 : vector<8x1xf32>
    %486 = vector.broadcast %485 : vector<8x1xf32> to vector<8x32xf32>
    %487 = arith.subf %477, %486 : vector<8x32xf32>
    %488 = arith.mulf %487, %487 : vector<8x32xf32>
    %cst_259 = arith.constant dense<0.000000e+00> : vector<8xf32>
    %489 = vector.multi_reduction <add>, %488, %cst_259 [1] : vector<8x32xf32> to vector<8xf32>
    %490 = vector.shape_cast %489 : vector<8xf32> to vector<8x1xf32>
    %cst_260 = arith.constant 3.200000e+01 : f32
    %491 = vector.broadcast %cst_260 : f32 to vector<8x1xf32>
    %492 = arith.divf %490, %491 : vector<8x1xf32>
    %493 = vector.broadcast %485 : vector<8x1xf32> to vector<8x32xf32>
    %494 = arith.subf %477, %493 : vector<8x32xf32>
    %cst_261 = arith.constant 9.99999974E-6 : f32
    %495 = vector.broadcast %cst_261 : f32 to vector<8x1xf32>
    %496 = arith.addf %492, %495 : vector<8x1xf32>
    %497 = math.rsqrt %496 : vector<8x1xf32>
    %498 = vector.broadcast %497 : vector<8x1xf32> to vector<8x32xf32>
    %499 = arith.mulf %494, %498 : vector<8x32xf32>
    %500 = vector.broadcast %479 : vector<1x32xf32> to vector<8x32xf32>
    %501 = arith.mulf %499, %500 : vector<8x32xf32>
    %502 = vector.broadcast %481 : vector<1x32xf32> to vector<8x32xf32>
    %503 = arith.addf %501, %502 : vector<8x32xf32>
    %c5_262 = arith.constant 5 : index
    %c0_263 = arith.constant 0 : index
    %c0_264 = arith.constant 0 : index
    %504 = vector.load %arg10[%c5_262, %c0_263, %c0_264] : memref<6x32x128xf32, #tpu.memory_space<vmem>>, vector<1x32x128xf32>
    %505 = vector.shape_cast %504 : vector<1x32x128xf32> to vector<32x128xf32>
    %cst_265 = arith.constant dense<0.000000e+00> : vector<8x128xf32>
    %506 = tpu.matmul %503, %505, %cst_265 {dimension_numbers = #tpu.dot_dimension_numbers<[1], [0], [0], [1], [0, 0, 1, 1], [], []>} : vector<8x32xf32>, vector<32x128xf32>, vector<8x128xf32> -> vector<8x128xf32>
    %c5_266 = arith.constant 5 : index
    %c0_267 = arith.constant 0 : index
    %c0_268 = arith.constant 0 : index
    %507 = vector.load %arg11[%c5_266, %c0_267, %c0_268] : memref<6x1x128xf32, #tpu.memory_space<vmem>>, vector<1x1x128xf32>
    %508 = vector.shape_cast %507 : vector<1x1x128xf32> to vector<1x128xf32>
    %509 = vector.broadcast %508 : vector<1x128xf32> to vector<8x128xf32>
    %510 = arith.addf %506, %509 : vector<8x128xf32>
    %cst_269 = arith.constant 5.000000e-01 : f32
    %511 = vector.broadcast %cst_269 : f32 to vector<8x128xf32>
    %512 = arith.mulf %511, %510 : vector<8x128xf32>
    %513 = arith.mulf %510, %510 : vector<8x128xf32>
    %514 = arith.mulf %513, %510 : vector<8x128xf32>
    %cst_270 = arith.constant 4.471500e-02 : f32
    %515 = vector.broadcast %cst_270 : f32 to vector<8x128xf32>
    %516 = arith.mulf %515, %514 : vector<8x128xf32>
    %517 = arith.addf %510, %516 : vector<8x128xf32>
    %cst_271 = arith.constant 0.797884583 : f32
    %518 = vector.broadcast %cst_271 : f32 to vector<8x128xf32>
    %519 = arith.mulf %518, %517 : vector<8x128xf32>
    %520 = math.tanh %519 : vector<8x128xf32>
    %cst_272 = arith.constant 1.000000e+00 : f32
    %521 = vector.broadcast %cst_272 : f32 to vector<8x128xf32>
    %522 = arith.addf %521, %520 : vector<8x128xf32>
    %523 = arith.mulf %512, %522 : vector<8x128xf32>
    %c5_273 = arith.constant 5 : index
    %c0_274 = arith.constant 0 : index
    %c0_275 = arith.constant 0 : index
    %524 = vector.load %arg12[%c5_273, %c0_274, %c0_275] : memref<6x128x32xf32, #tpu.memory_space<vmem>>, vector<1x128x32xf32>
    %525 = vector.shape_cast %524 : vector<1x128x32xf32> to vector<128x32xf32>
    %cst_276 = arith.constant dense<0.000000e+00> : vector<8x32xf32>
    %526 = tpu.matmul %523, %525, %cst_276 {dimension_numbers = #tpu.dot_dimension_numbers<[1], [0], [0], [1], [0, 0, 1, 1], [], []>} : vector<8x128xf32>, vector<128x32xf32>, vector<8x32xf32> -> vector<8x32xf32>
    %c5_277 = arith.constant 5 : index
    %c0_278 = arith.constant 0 : index
    %c0_279 = arith.constant 0 : index
    %527 = vector.load %arg13[%c5_277, %c0_278, %c0_279] : memref<6x1x32xf32, #tpu.memory_space<vmem>>, vector<1x1x32xf32>
    %528 = vector.shape_cast %527 : vector<1x1x32xf32> to vector<1x32xf32>
    %529 = vector.broadcast %528 : vector<1x32xf32> to vector<8x32xf32>
    %530 = arith.addf %526, %529 : vector<8x32xf32>
    %531 = arith.addf %530, %503 : vector<8x32xf32>
    %c5_280 = arith.constant 5 : index
    %c0_281 = arith.constant 0 : index
    %c0_282 = arith.constant 0 : index
    %532 = vector.load %arg14[%c5_280, %c0_281, %c0_282] : memref<6x1x32xf32, #tpu.memory_space<vmem>>, vector<1x1x32xf32>
    %533 = vector.shape_cast %532 : vector<1x1x32xf32> to vector<1x32xf32>
    %c5_283 = arith.constant 5 : index
    %c0_284 = arith.constant 0 : index
    %c0_285 = arith.constant 0 : index
    %534 = vector.load %arg15[%c5_283, %c0_284, %c0_285] : memref<6x1x32xf32, #tpu.memory_space<vmem>>, vector<1x1x32xf32>
    %535 = vector.shape_cast %534 : vector<1x1x32xf32> to vector<1x32xf32>
    %cst_286 = arith.constant dense<0.000000e+00> : vector<8xf32>
    %536 = vector.multi_reduction <add>, %531, %cst_286 [1] : vector<8x32xf32> to vector<8xf32>
    %537 = vector.shape_cast %536 : vector<8xf32> to vector<8x1xf32>
    %cst_287 = arith.constant 3.200000e+01 : f32
    %538 = vector.broadcast %cst_287 : f32 to vector<8x1xf32>
    %539 = arith.divf %537, %538 : vector<8x1xf32>
    %540 = vector.broadcast %539 : vector<8x1xf32> to vector<8x32xf32>
    %541 = arith.subf %531, %540 : vector<8x32xf32>
    %542 = arith.mulf %541, %541 : vector<8x32xf32>
    %cst_288 = arith.constant dense<0.000000e+00> : vector<8xf32>
    %543 = vector.multi_reduction <add>, %542, %cst_288 [1] : vector<8x32xf32> to vector<8xf32>
    %544 = vector.shape_cast %543 : vector<8xf32> to vector<8x1xf32>
    %cst_289 = arith.constant 3.200000e+01 : f32
    %545 = vector.broadcast %cst_289 : f32 to vector<8x1xf32>
    %546 = arith.divf %544, %545 : vector<8x1xf32>
    %547 = vector.broadcast %539 : vector<8x1xf32> to vector<8x32xf32>
    %548 = arith.subf %531, %547 : vector<8x32xf32>
    %cst_290 = arith.constant 9.99999974E-6 : f32
    %549 = vector.broadcast %cst_290 : f32 to vector<8x1xf32>
    %550 = arith.addf %546, %549 : vector<8x1xf32>
    %551 = math.rsqrt %550 : vector<8x1xf32>
    %552 = vector.broadcast %551 : vector<8x1xf32> to vector<8x32xf32>
    %553 = arith.mulf %548, %552 : vector<8x32xf32>
    %554 = vector.broadcast %533 : vector<1x32xf32> to vector<8x32xf32>
    %555 = arith.mulf %553, %554 : vector<8x32xf32>
    %556 = vector.broadcast %535 : vector<1x32xf32> to vector<8x32xf32>
    %557 = arith.addf %555, %556 : vector<8x32xf32>
    %c0_291 = arith.constant 0 : index
    %c0_292 = arith.constant 0 : index
    %558 = vector.load %arg16[%c0_291, %c0_292] : memref<32x128xf32, #tpu.memory_space<vmem>>, vector<32x128xf32>
    %cst_293 = arith.constant dense<0.000000e+00> : vector<8x128xf32>
    %559 = tpu.matmul %557, %558, %cst_293 {dimension_numbers = #tpu.dot_dimension_numbers<[1], [0], [0], [1], [0, 0, 1, 1], [], []>} : vector<8x32xf32>, vector<32x128xf32>, vector<8x128xf32> -> vector<8x128xf32>
    %c0_294 = arith.constant 0 : index
    %c0_295 = arith.constant 0 : index
    %560 = vector.load %arg17[%c0_294, %c0_295] : memref<1x128xf32, #tpu.memory_space<vmem>>, vector<1x128xf32>
    %561 = vector.broadcast %560 : vector<1x128xf32> to vector<8x128xf32>
    %562 = arith.addf %559, %561 : vector<8x128xf32>
    %c0_296 = arith.constant 0 : index
    %c0_297 = arith.constant 0 : index
    %563 = vector.load %arg18[%c0_296, %c0_297] : memref<8x128xf32, #tpu.memory_space<vmem>>, vector<8x128xf32>
    tpu.vector_store %arg18[%c0_296, %c0_297], %562 {strides = array<i32>} : memref<8x128xf32, #tpu.memory_space<vmem>>, vector<8x128xf32>,
    return
  }
  func.func @transform_0(%arg0: i32) -> (i32, i32) {
    %c0_i32 = arith.constant 0 : i32
    %c0_i32_0 = arith.constant 0 : i32
    return %arg0, %c0_i32 : i32, i32
  }
  func.func @transform_1(%arg0: i32) -> (i32, i32) {
    %c0_i32 = arith.constant 0 : i32
    %c0_i32_0 = arith.constant 0 : i32
    %c0_i32_1 = arith.constant 0 : i32
    return %c0_i32, %c0_i32_0 : i32, i32
  }
  func.func @transform_2(%arg0: i32) -> (i32, i32) {
    %c0_i32 = arith.constant 0 : i32
    %c0_i32_0 = arith.constant 0 : i32
    %c0_i32_1 = arith.constant 0 : i32
    return %c0_i32, %c0_i32_0 : i32, i32
  }
  func.func @transform_3(%arg0: i32) -> (i32, i32) {
    %c0_i32 = arith.constant 0 : i32
    %c0_i32_0 = arith.constant 0 : i32
    %c0_i32_1 = arith.constant 0 : i32
    return %c0_i32, %c0_i32_0 : i32, i32
  }
  func.func @transform_4(%arg0: i32) -> (i32, i32) {
    %c0_i32 = arith.constant 0 : i32
    %c0_i32_0 = arith.constant 0 : i32
    %c0_i32_1 = arith.constant 0 : i32
    return %c0_i32, %c0_i32_0 : i32, i32
  }
  func.func @transform_5(%arg0: i32) -> (i32, i32, i32) {
    %c0_i32 = arith.constant 0 : i32
    %c0_i32_0 = arith.constant 0 : i32
    %c0_i32_1 = arith.constant 0 : i32
    %c0_i32_2 = arith.constant 0 : i32
    return %c0_i32, %c0_i32_0, %c0_i32_1 : i32, i32, i32
  }
  func.func @transform_6(%arg0: i32) -> (i32, i32, i32) {
    %c0_i32 = arith.constant 0 : i32
    %c0_i32_0 = arith.constant 0 : i32
    %c0_i32_1 = arith.constant 0 : i32
    %c0_i32_2 = arith.constant 0 : i32
    return %c0_i32, %c0_i32_0, %c0_i32_1 : i32, i32, i32
  }
  func.func @transform_7(%arg0: i32) -> (i32, i32, i32) {
    %c0_i32 = arith.constant 0 : i32
    %c0_i32_0 = arith.constant 0 : i32
    %c0_i32_1 = arith.constant 0 : i32
    %c0_i32_2 = arith.constant 0 : i32
    return %c0_i32, %c0_i32_0, %c0_i32_1 : i32, i32, i32
  }
  func.func @transform_8(%arg0: i32) -> (i32, i32, i32) {
    %c0_i32 = arith.constant 0 : i32
    %c0_i32_0 = arith.constant 0 : i32
    %c0_i32_1 = arith.constant 0 : i32
    %c0_i32_2 = arith.constant 0 : i32
    return %c0_i32, %c0_i32_0, %c0_i32_1 : i32, i32, i32
  }
  func.func @transform_9(%arg0: i32) -> (i32, i32, i32) {
    %c0_i32 = arith.constant 0 : i32
    %c0_i32_0 = arith.constant 0 : i32
    %c0_i32_1 = arith.constant 0 : i32
    %c0_i32_2 = arith.constant 0 : i32
    return %c0_i32, %c0_i32_0, %c0_i32_1 : i32, i32, i32
  }
  func.func @transform_10(%arg0: i32) -> (i32, i32, i32) {
    %c0_i32 = arith.constant 0 : i32
    %c0_i32_0 = arith.constant 0 : i32
    %c0_i32_1 = arith.constant 0 : i32
    %c0_i32_2 = arith.constant 0 : i32
    return %c0_i32, %c0_i32_0, %c0_i32_1 : i32, i32, i32
  }
  func.func @transform_11(%arg0: i32) -> (i32, i32, i32) {
    %c0_i32 = arith.constant 0 : i32
    %c0_i32_0 = arith.constant 0 : i32
    %c0_i32_1 = arith.constant 0 : i32
    %c0_i32_2 = arith.constant 0 : i32
    return %c0_i32, %c0_i32_0, %c0_i32_1 : i32, i32, i32
  }
  func.func @transform_12(%arg0: i32) -> (i32, i32, i32) {
    %c0_i32 = arith.constant 0 : i32
    %c0_i32_0 = arith.constant 0 : i32
    %c0_i32_1 = arith.constant 0 : i32
    %c0_i32_2 = arith.constant 0 : i32
    return %c0_i32, %c0_i32_0, %c0_i32_1 : i32, i32, i32
  }
  func.func @transform_13(%arg0: i32) -> (i32, i32, i32) {
    %c0_i32 = arith.constant 0 : i32
    %c0_i32_0 = arith.constant 0 : i32
    %c0_i32_1 = arith.constant 0 : i32
    %c0_i32_2 = arith.constant 0 : i32
    return %c0_i32, %c0_i32_0, %c0_i32_1 : i32, i32, i32
  }
  func.func @transform_14(%arg0: i32) -> (i32, i32, i32) {
    %c0_i32 = arith.constant 0 : i32
    %c0_i32_0 = arith.constant 0 : i32
    %c0_i32_1 = arith.constant 0 : i32
    %c0_i32_2 = arith.constant 0 : i32
    return %c0_i32, %c0_i32_0, %c0_i32_1 : i32, i32, i32
  }
  func.func @transform_15(%arg0: i32) -> (i32, i32) {
    %c0_i32 = arith.constant 0 : i32
    %c0_i32_0 = arith.constant 0 : i32
    %c0_i32_1 = arith.constant 0 : i32
    return %c0_i32, %c0_i32_0 : i32, i32
  }
  func.func @transform_16(%arg0: i32) -> (i32, i32) {
    %c0_i32 = arith.constant 0 : i32
    %c0_i32_0 = arith.constant 0 : i32
    %c0_i32_1 = arith.constant 0 : i32
    return %c0_i32, %c0_i32_0 : i32, i32
  }
  func.func @transform_17(%arg0: i32) -> (i32, i32) {
    %c0_i32 = arith.constant 0 : i32
    %c0_i32_0 = arith.constant 0 : i32
    return %arg0, %c0_i32 : i32, i32
  }
}

module attributes {stable_mosaic.version = 11 : i64} {
  func.func @roberta_nslkdd_kernel(%arg0: i32, %arg1: memref<8x16xf32, #tpu.memory_space<vmem>>, %arg2: memref<16x32xf32, #tpu.memory_space<vmem>>, %arg3: memref<1x32xf32, #tpu.memory_space<vmem>>, %arg4: memref<1x32xf32, #tpu.memory_space<vmem>>, %arg5: memref<1x32xf32, #tpu.memory_space<vmem>>, %arg6: memref<6x32x32xf32, #tpu.memory_space<vmem>>, %arg7: memref<6x1x32xf32, #tpu.memory_space<vmem>>, %arg8: memref<6x1x32xf32, #tpu.memory_space<vmem>>, %arg9: memref<6x1x32xf32, #tpu.memory_space<vmem>>, %arg10: memref<6x32x128xf32, #tpu.memory_space<vmem>>, %arg11: memref<6x1x128xf32, #tpu.memory_space<vmem>>, %arg12: memref<6x128x32xf32, #tpu.memory_space<vmem>>, %arg13: memref<6x1x32xf32, #tpu.memory_space<vmem>>, %arg14: memref<6x1x32xf32, #tpu.memory_space<vmem>>, %arg15: memref<6x1x32xf32, #tpu.memory_space<vmem>>, %arg16: memref<32x128xf32, #tpu.memory_space<vmem>>, %arg17: memref<1x128xf32, #tpu.memory_space<vmem>>, %arg18: memref<8x128xf32, #tpu.memory_space<vmem>>) attributes {dimension_semantics = [#tpu.dimension_semantics<parallel>], iteration_bounds = array<i64: 2>, scalar_prefetch = 0 : i64, scratch_operands = 0 : i64, tpu.core_type = #tpu.core_type<tc>, window_params = [{transform_indices = @transform_0, window_bounds = array<i64: 8, 16>}, {pipeline_mode = #tpu.pipeline_mode<synchronous>, transform_indices = @transform_1, window_bounds = array<i64: 16, 32>}, {pipeline_mode = #tpu.pipeline_mode<synchronous>, transform_indices = @transform_2, window_bounds = array<i64: 1, 32>}, {pipeline_mode = #tpu.pipeline_mode<synchronous>, transform_indices = @transform_3, window_bounds = array<i64: 1, 32>}, {pipeline_mode = #tpu.pipeline_mode<synchronous>, transform_indices = @transform_4, window_bounds = array<i64: 1, 32>}, {pipeline_mode = #tpu.pipeline_mode<synchronous>, transform_indices = @transform_5, window_bounds = array<i64: 6, 32, 32>}, {pipeline_mode = #tpu.pipeline_mode<synchronous>, transform_indices = @transform_6, window_bounds = array<i64: 6, 1, 32>}, {pipeline_mode = #tpu.pipeline_mode<synchronous>, transform_indices = @transform_7, window_bounds = array<i64: 6, 1, 32>}, {pipeline_mode = #tpu.pipeline_mode<synchronous>, transform_indices = @transform_8, window_bounds = array<i64: 6, 1, 32>}, {pipeline_mode = #tpu.pipeline_mode<synchronous>, transform_indices = @transform_9, window_bounds = array<i64: 6, 32, 128>}, {pipeline_mode = #tpu.pipeline_mode<synchronous>, transform_indices = @transform_10, window_bounds = array<i64: 6, 1, 128>}, {pipeline_mode = #tpu.pipeline_mode<synchronous>, transform_indices = @transform_11, window_bounds = array<i64: 6, 128, 32>}, {pipeline_mode = #tpu.pipeline_mode<synchronous>, transform_indices = @transform_12, window_bounds = array<i64: 6, 1, 32>}, {pipeline_mode = #tpu.pipeline_mode<synchronous>, transform_indices = @transform_13, window_bounds = array<i64: 6, 1, 32>}, {pipeline_mode = #tpu.pipeline_mode<synchronous>, transform_indices = @transform_14, window_bounds = array<i64: 6, 1, 32>}, {pipeline_mode = #tpu.pipeline_mode<synchronous>, transform_indices = @transform_15, window_bounds = array<i64: 32, 128>}, {pipeline_mode = #tpu.pipeline_mode<synchronous>, transform_indices = @transform_16, window_bounds = array<i64: 1, 128>}, {transform_indices = @transform_17, window_bounds = array<i64: 8, 128>}]} {
    %c0 = arith.constant 0 : index
    %c0_0 = arith.constant 0 : index
    %0 = vector.load %arg1[%c0, %c0_0] : memref<8x16xf32, #tpu.memory_space<vmem>>, vector<8x16xf32>
    %c0_1 = arith.constant 0 : index
    %c0_2 = arith.constant 0 : index
    %1 = vector.load %arg2[%c0_1, %c0_2] : memref<16x32xf32, #tpu.memory_space<vmem>>, vector<16x32xf32>
    %cst = arith.constant dense<0.000000e+00> : vector<8x32xf32>
    %2 = tpu.matmul %0, %1, %cst {dimension_numbers = #tpu.dot_dimension_numbers<[1], [0], [0], [1], [0, 0, 1, 1], [], []>} : vector<8x16xf32>, vector<16x32xf32>, vector<8x32xf32> -> vector<8x32xf32>
    %c0_3 = arith.constant 0 : index
    %c0_4 = arith.constant 0 : index
    %3 = vector.load %arg3[%c0_3, %c0_4] : memref<1x32xf32, #tpu.memory_space<vmem>>, vector<1x32xf32>
    %4 = vector.broadcast %3 : vector<1x32xf32> to vector<8x32xf32>
    %5 = arith.addf %2, %4 : vector<8x32xf32>
    %c0_5 = arith.constant 0 : index
    %c0_6 = arith.constant 0 : index
    %6 = vector.load %arg4[%c0_5, %c0_6] : memref<1x32xf32, #tpu.memory_space<vmem>>, vector<1x32xf32>
    %c0_7 = arith.constant 0 : index
    %c0_8 = arith.constant 0 : index
    %7 = vector.load %arg5[%c0_7, %c0_8] : memref<1x32xf32, #tpu.memory_space<vmem>>, vector<1x32xf32>
    %cst_9 = arith.constant dense<0.000000e+00> : vector<8xf32>
    %8 = vector.multi_reduction <add>, %5, %cst_9 [1] : vector<8x32xf32> to vector<8xf32>
    %9 = vector.shape_cast %8 : vector<8xf32> to vector<8x1xf32>
    %cst_10 = arith.constant 3.200000e+01 : f32
    %10 = vector.broadcast %cst_10 : f32 to vector<8x1xf32>
    %11 = arith.divf %9, %10 : vector<8x1xf32>
    %12 = vector.broadcast %11 : vector<8x1xf32> to vector<8x32xf32>
    %13 = arith.subf %5, %12 : vector<8x32xf32>
    %14 = arith.mulf %13, %13 : vector<8x32xf32>
    %cst_11 = arith.constant dense<0.000000e+00> : vector<8xf32>
    %15 = vector.multi_reduction <add>, %14, %cst_11 [1] : vector<8x32xf32> to vector<8xf32>
    %16 = vector.shape_cast %15 : vector<8xf32> to vector<8x1xf32>
    %cst_12 = arith.constant 3.200000e+01 : f32
    %17 = vector.broadcast %cst_12 : f32 to vector<8x1xf32>
    %18 = arith.divf %16, %17 : vector<8x1xf32>
    %19 = vector.broadcast %11 : vector<8x1xf32> to vector<8x32xf32>
    %20 = arith.subf %5, %19 : vector<8x32xf32>
    %cst_13 = arith.constant 9.99999974E-6 : f32
    %21 = vector.broadcast %cst_13 : f32 to vector<8x1xf32>
    %22 = arith.addf %18, %21 : vector<8x1xf32>
    %23 = math.rsqrt %22 : vector<8x1xf32>
    %24 = vector.broadcast %23 : vector<8x1xf32> to vector<8x32xf32>
    %25 = arith.mulf %20, %24 : vector<8x32xf32>
    %26 = vector.broadcast %6 : vector<1x32xf32> to vector<8x32xf32>
    %27 = arith.mulf %25, %26 : vector<8x32xf32>
    %28 = vector.broadcast %7 : vector<1x32xf32> to vector<8x32xf32>
    %29 = arith.addf %27, %28 : vector<8x32xf32>
    %c0_14 = arith.constant 0 : index
    %c0_15 = arith.constant 0 : index
    %c0_16 = arith.constant 0 : index
    %30 = vector.load %arg6[%c0_14, %c0_15, %c0_16] : memref<6x32x32xf32, #tpu.memory_space<vmem>>, vector<1x32x32xf32>
    %31 = vector.shape_cast %30 : vector<1x32x32xf32> to vector<32x32xf32>
    %cst_17 = arith.constant dense<0.000000e+00> : vector<8x32xf32>
    %32 = tpu.matmul %29, %31, %cst_17 {dimension_numbers = #tpu.dot_dimension_numbers<[1], [0], [0], [1], [0, 0, 1, 1], [], []>} : vector<8x32xf32>, vector<32x32xf32>, vector<8x32xf32> -> vector<8x32xf32>
    %c0_18 = arith.constant 0 : index
    %c0_19 = arith.constant 0 : index
    %c0_20 = arith.constant 0 : index
    %33 = vector.load %arg7[%c0_18, %c0_19, %c0_20] : memref<6x1x32xf32, #tpu.memory_space<vmem>>, vector<1x1x32xf32>
    %34 = vector.shape_cast %33 : vector<1x1x32xf32> to vector<1x32xf32>
    %35 = vector.broadcast %34 : vector<1x32xf32> to vector<8x32xf32>
    %36 = arith.addf %32, %35 : vector<8x32xf32>
    %37 = arith.addf %36, %29 : vector<8x32xf32>
    %c0_21 = arith.constant 0 : index
    %c0_22 = arith.constant 0 : index
    %c0_23 = arith.constant 0 : index
    %38 = vector.load %arg8[%c0_21, %c0_22, %c0_23] : memref<6x1x32xf32, #tpu.memory_space<vmem>>, vector<1x1x32xf32>
    %39 = vector.shape_cast %38 : vector<1x1x32xf32> to vector<1x32xf32>
    %c0_24 = arith.constant 0 : index
    %c0_25 = arith.constant 0 : index
    %c0_26 = arith.constant 0 : index
    %40 = vector.load %arg9[%c0_24, %c0_25, %c0_26] : memref<6x1x32xf32, #tpu.memory_space<vmem>>, vector<1x1x32xf32>
    %41 = vector.shape_cast %40 : vector<1x1x32xf32> to vector<1x32xf32>
    %cst_27 = arith.constant dense<0.000000e+00> : vector<8xf32>
    %42 = vector.multi_reduction <add>, %37, %cst_27 [1] : vector<8x32xf32> to vector<8xf32>
    %43 = vector.shape_cast %42 : vector<8xf32> to vector<8x1xf32>
    %cst_28 = arith.constant 3.200000e+01 : f32
    %44 = vector.broadcast %cst_28 : f32 to vector<8x1xf32>
    %45 = arith.divf %43, %44 : vector<8x1xf32>
    %46 = vector.broadcast %45 : vector<8x1xf32> to vector<8x32xf32>
    %47 = arith.subf %37, %46 : vector<8x32xf32>
    %48 = arith.mulf %47, %47 : vector<8x32xf32>
    %cst_29 = arith.constant dense<0.000000e+00> : vector<8xf32>
    %49 = vector.multi_reduction <add>, %48, %cst_29 [1] : vector<8x32xf32> to vector<8xf32>
    %50 = vector.shape_cast %49 : vector<8xf32> to vector<8x1xf32>
    %cst_30 = arith.constant 3.200000e+01 : f32
    %51 = vector.broadcast %cst_30 : f32 to vector<8x1xf32>
    %52 = arith.divf %50, %51 : vector<8x1xf32>
    %53 = vector.broadcast %45 : vector<8x1xf32> to vector<8x32xf32>
    %54 = arith.subf %37, %53 : vector<8x32xf32>
    %cst_31 = arith.constant 9.99999974E-6 : f32
    %55 = vector.broadcast %cst_31 : f32 to vector<8x1xf32>
    %56 = arith.addf %52, %55 : vector<8x1xf32>
    %57 = math.rsqrt %56 : vector<8x1xf32>
    %58 = vector.broadcast %57 : vector<8x1xf32> to vector<8x32xf32>
    %59 = arith.mulf %54, %58 : vector<8x32xf32>
    %60 = vector.broadcast %39 : vector<1x32xf32> to vector<8x32xf32>
    %61 = arith.mulf %59, %60 : vector<8x32xf32>
    %62 = vector.broadcast %41 : vector<1x32xf32> to vector<8x32xf32>
    %63 = arith.addf %61, %62 : vector<8x32xf32>
    %c0_32 = arith.constant 0 : index
    %c0_33 = arith.constant 0 : index
    %c0_34 = arith.constant 0 : index
    %64 = vector.load %arg10[%c0_32, %c0_33, %c0_34] : memref<6x32x128xf32, #tpu.memory_space<vmem>>, vector<1x32x128xf32>
    %65 = vector.shape_cast %64 : vector<1x32x128xf32> to vector<32x128xf32>
    %cst_35 = arith.constant dense<0.000000e+00> : vector<8x128xf32>
    %66 = tpu.matmul %63, %65, %cst_35 {dimension_numbers = #tpu.dot_dimension_numbers<[1], [0], [0], [1], [0, 0, 1, 1], [], []>} : vector<8x32xf32>, vector<32x128xf32>, vector<8x128xf32> -> vector<8x128xf32>
    %c0_36 = arith.constant 0 : index
    %c0_37 = arith.constant 0 : index
    %c0_38 = arith.constant 0 : index
    %67 = vector.load %arg11[%c0_36, %c0_37, %c0_38] : memref<6x1x128xf32, #tpu.memory_space<vmem>>, vector<1x1x128xf32>
    %68 = vector.shape_cast %67 : vector<1x1x128xf32> to vector<1x128xf32>
    %69 = vector.broadcast %68 : vector<1x128xf32> to vector<8x128xf32>
    %70 = arith.addf %66, %69 : vector<8x128xf32>
    %cst_39 = arith.constant 5.000000e-01 : f32
    %71 = vector.broadcast %cst_39 : f32 to vector<8x128xf32>
    %72 = arith.mulf %71, %70 : vector<8x128xf32>
    %73 = arith.mulf %70, %70 : vector<8x128xf32>
    %74 = arith.mulf %73, %70 : vector<8x128xf32>
    %cst_40 = arith.constant 4.471500e-02 : f32
    %75 = vector.broadcast %cst_40 : f32 to vector<8x128xf32>
    %76 = arith.mulf %75, %74 : vector<8x128xf32>
    %77 = arith.addf %70, %76 : vector<8x128xf32>
    %cst_41 = arith.constant 0.797884583 : f32
    %78 = vector.broadcast %cst_41 : f32 to vector<8x128xf32>
    %79 = arith.mulf %78, %77 : vector<8x128xf32>
    %80 = math.tanh %79 : vector<8x128xf32>
    %cst_42 = arith.constant 1.000000e+00 : f32
    %81 = vector.broadcast %cst_42 : f32 to vector<8x128xf32>
    %82 = arith.addf %81, %80 : vector<8x128xf32>
    %83 = arith.mulf %72, %82 : vector<8x128xf32>
    %c0_43 = arith.constant 0 : index
    %c0_44 = arith.constant 0 : index
    %c0_45 = arith.constant 0 : index
    %84 = vector.load %arg12[%c0_43, %c0_44, %c0_45] : memref<6x128x32xf32, #tpu.memory_space<vmem>>, vector<1x128x32xf32>
    %85 = vector.shape_cast %84 : vector<1x128x32xf32> to vector<128x32xf32>
    %cst_46 = arith.constant dense<0.000000e+00> : vector<8x32xf32>
    %86 = tpu.matmul %83, %85, %cst_46 {dimension_numbers = #tpu.dot_dimension_numbers<[1], [0], [0], [1], [0, 0, 1, 1], [], []>} : vector<8x128xf32>, vector<128x32xf32>, vector<8x32xf32> -> vector<8x32xf32>
    %c0_47 = arith.constant 0 : index
    %c0_48 = arith.constant 0 : index
    %c0_49 = arith.constant 0 : index
    %87 = vector.load %arg13[%c0_47, %c0_48, %c0_49] : memref<6x1x32xf32, #tpu.memory_space<vmem>>, vector<1x1x32xf32>
    %88 = vector.shape_cast %87 : vector<1x1x32xf32> to vector<1x32xf32>
    %89 = vector.broadcast %88 : vector<1x32xf32> to vector<8x32xf32>
    %90 = arith.addf %86, %89 : vector<8x32xf32>
    %91 = arith.addf %90, %63 : vector<8x32xf32>
    %c0_50 = arith.constant 0 : index
    %c0_51 = arith.constant 0 : index
    %c0_52 = arith.constant 0 : index
    %92 = vector.load %arg14[%c0_50, %c0_51, %c0_52] : memref<6x1x32xf32, #tpu.memory_space<vmem>>, vector<1x1x32xf32>
    %93 = vector.shape_cast %92 : vector<1x1x32xf32> to vector<1x32xf32>
    %c0_53 = arith.constant 0 : index
    %c0_54 = arith.constant 0 : index
    %c0_55 = arith.constant 0 : index
    %94 = vector.load %arg15[%c0_53, %c0_54, %c0_55] : memref<6x1x32xf32, #tpu.memory_space<vmem>>, vector<1x1x32xf32>
    %95 = vector.shape_cast %94 : vector<1x1x32xf32> to vector<1x32xf32>
    %cst_56 = arith.constant dense<0.000000e+00> : vector<8xf32>
    %96 = vector.multi_reduction <add>, %91, %cst_56 [1] : vector<8x32xf32> to vector<8xf32>
    %97 = vector.shape_cast %96 : vector<8xf32> to vector<8x1xf32>
    %cst_57 = arith.constant 3.200000e+01 : f32
    %98 = vector.broadcast %cst_57 : f32 to vector<8x1xf32>
    %99 = arith.divf %97, %98 : vector<8x1xf32>
    %100 = vector.broadcast %99 : vector<8x1xf32> to vector<8x32xf32>
    %101 = arith.subf %91, %100 : vector<8x32xf32>
    %102 = arith.mulf %101, %101 : vector<8x32xf32>
    %cst_58 = arith.constant dense<0.000000e+00> : vector<8xf32>
    %103 = vector.multi_reduction <add>, %102, %cst_58 [1] : vector<8x32xf32> to vector<8xf32>
    %104 = vector.shape_cast %103 : vector<8xf32> to vector<8x1xf32>
    %cst_59 = arith.constant 3.200000e+01 : f32
    %105 = vector.broadcast %cst_59 : f32 to vector<8x1xf32>
    %106 = arith.divf %104, %105 : vector<8x1xf32>
    %107 = vector.broadcast %99 : vector<8x1xf32> to vector<8x32xf32>
    %108 = arith.subf %91, %107 : vector<8x32xf32>
    %cst_60 = arith.constant 9.99999974E-6 : f32
    %109 = vector.broadcast %cst_60 : f32 to vector<8x1xf32>
    %110 = arith.addf %106, %109 : vector<8x1xf32>
    %111 = math.rsqrt %110 : vector<8x1xf32>
    %112 = vector.broadcast %111 : vector<8x1xf32> to vector<8x32xf32>
    %113 = arith.mulf %108, %112 : vector<8x32xf32>
    %114 = vector.broadcast %93 : vector<1x32xf32> to vector<8x32xf32>
    %115 = arith.mulf %113, %114 : vector<8x32xf32>
    %116 = vector.broadcast %95 : vector<1x32xf32> to vector<8x32xf32>
    %117 = arith.addf %115, %116 : vector<8x32xf32>
    %c1 = arith.constant 1 : index
    %c0_61 = arith.constant 0 : index
    %c0_62 = arith.constant 0 : index
    %118 = vector.load %arg6[%c1, %c0_61, %c0_62] : memref<6x32x32xf32, #tpu.memory_space<vmem>>, vector<1x32x32xf32>
    %119 = vector.shape_cast %118 : vector<1x32x32xf32> to vector<32x32xf32>
    %cst_63 = arith.constant dense<0.000000e+00> : vector<8x32xf32>
    %120 = tpu.matmul %117, %119, %cst_63 {dimension_numbers = #tpu.dot_dimension_numbers<[1], [0], [0], [1], [0, 0, 1, 1], [], []>} : vector<8x32xf32>, vector<32x32xf32>, vector<8x32xf32> -> vector<8x32xf32>
    %c1_64 = arith.constant 1 : index
    %c0_65 = arith.constant 0 : index
    %c0_66 = arith.constant 0 : index
    %121 = vector.load %arg7[%c1_64, %c0_65, %c0_66] : memref<6x1x32xf32, #tpu.memory_space<vmem>>, vector<1x1x32xf32>
    %122 = vector.shape_cast %121 : vector<1x1x32xf32> to vector<1x32xf32>
    %123 = vector.broadcast %122 : vector<1x32xf32> to vector<8x32xf32>
    %124 = arith.addf %120, %123 : vector<8x32xf32>
    %125 = arith.addf %124, %117 : vector<8x32xf32>
    %c1_67 = arith.constant 1 : index
    %c0_68 = arith.constant 0 : index
    %c0_69 = arith.constant 0 : index
    %126 = vector.load %arg8[%c1_67, %c0_68, %c0_69] : memref<6x1x32xf32, #tpu.memory_space<vmem>>, vector<1x1x32xf32>
    %127 = vector.shape_cast %126 : vector<1x1x32xf32> to vector<1x32xf32>
    %c1_70 = arith.constant 1 : index
    %c0_71 = arith.constant 0 : index
    %c0_72 = arith.constant 0 : index
    %128 = vector.load %arg9[%c1_70, %c0_71, %c0_72] : memref<6x1x32xf32, #tpu.memory_space<vmem>>, vector<1x1x32xf32>
    %129 = vector.shape_cast %128 : vector<1x1x32xf32> to vector<1x32xf32>
    %cst_73 = arith.constant dense<0.000000e+00> : vector<8xf32>
    %130 = vector.multi_reduction <add>, %125, %cst_73 [1] : vector<8x32xf32> to vector<8xf32>
    %131 = vector.shape_cast %130 : vector<8xf32> to vector<8x1xf32>
    %cst_74 = arith.constant 3.200000e+01 : f32
    %132 = vector.broadcast %cst_74 : f32 to vector<8x1xf32>
    %133 = arith.divf %131, %132 : vector<8x1xf32>
    %134 = vector.broadcast %133 : vector<8x1xf32> to vector<8x32xf32>
    %135 = arith.subf %125, %134 : vector<8x32xf32>
    %136 = arith.mulf %135, %135 : vector<8x32xf32>
    %cst_75 = arith.constant dense<0.000000e+00> : vector<8xf32>
    %137 = vector.multi_reduction <add>, %136, %cst_75 [1] : vector<8x32xf32> to vector<8xf32>
    %138 = vector.shape_cast %137 : vector<8xf32> to vector<8x1xf32>
    %cst_76 = arith.constant 3.200000e+01 : f32
    %139 = vector.broadcast %cst_76 : f32 to vector<8x1xf32>
    %140 = arith.divf %138, %139 : vector<8x1xf32>
    %141 = vector.broadcast %133 : vector<8x1xf32> to vector<8x32xf32>
    %142 = arith.subf %125, %141 : vector<8x32xf32>
    %cst_77 = arith.constant 9.99999974E-6 : f32
    %143 = vector.broadcast %cst_77 : f32 to vector<8x1xf32>
    %144 = arith.addf %140, %143 : vector<8x1xf32>
    %145 = math.rsqrt %144 : vector<8x1xf32>
    %146 = vector.broadcast %145 : vector<8x1xf32> to vector<8x32xf32>
    %147 = arith.mulf %142, %146 : vector<8x32xf32>
    %148 = vector.broadcast %127 : vector<1x32xf32> to vector<8x32xf32>
    %149 = arith.mulf %147, %148 : vector<8x32xf32>
    %150 = vector.broadcast %129 : vector<1x32xf32> to vector<8x32xf32>
    %151 = arith.addf %149, %150 : vector<8x32xf32>
    %c1_78 = arith.constant 1 : index
    %c0_79 = arith.constant 0 : index
    %c0_80 = arith.constant 0 : index
    %152 = vector.load %arg10[%c1_78, %c0_79, %c0_80] : memref<6x32x128xf32, #tpu.memory_space<vmem>>, vector<1x32x128xf32>
    %153 = vector.shape_cast %152 : vector<1x32x128xf32> to vector<32x128xf32>
    %cst_81 = arith.constant dense<0.000000e+00> : vector<8x128xf32>
    %154 = tpu.matmul %151, %153, %cst_81 {dimension_numbers = #tpu.dot_dimension_numbers<[1], [0], [0], [1], [0, 0, 1, 1], [], []>} : vector<8x32xf32>, vector<32x128xf32>, vector<8x128xf32> -> vector<8x128xf32>
    %c1_82 = arith.constant 1 : index
    %c0_83 = arith.constant 0 : index
    %c0_84 = arith.constant 0 : index
    %155 = vector.load %arg11[%c1_82, %c0_83, %c0_84] : memref<6x1x128xf32, #tpu.memory_space<vmem>>, vector<1x1x128xf32>
    %156 = vector.shape_cast %155 : vector<1x1x128xf32> to vector<1x128xf32>
    %157 = vector.broadcast %156 : vector<1x128xf32> to vector<8x128xf32>
    %158 = arith.addf %154, %157 : vector<8x128xf32>
    %cst_85 = arith.constant 5.000000e-01 : f32
    %159 = vector.broadcast %cst_85 : f32 to vector<8x128xf32>
    %160 = arith.mulf %159, %158 : vector<8x128xf32>
    %161 = arith.mulf %158, %158 : vector<8x128xf32>
    %162 = arith.mulf %161, %158 : vector<8x128xf32>
    %cst_86 = arith.constant 4.471500e-02 : f32
    %163 = vector.broadcast %cst_86 : f32 to vector<8x128xf32>
    %164 = arith.mulf %163, %162 : vector<8x128xf32>
    %165 = arith.addf %158, %164 : vector<8x128xf32>
    %cst_87 = arith.constant 0.797884583 : f32
    %166 = vector.broadcast %cst_87 : f32 to vector<8x128xf32>
    %167 = arith.mulf %166, %165 : vector<8x128xf32>
    %168 = math.tanh %167 : vector<8x128xf32>
    %cst_88 = arith.constant 1.000000e+00 : f32
    %169 = vector.broadcast %cst_88 : f32 to vector<8x128xf32>
    %170 = arith.addf %169, %168 : vector<8x128xf32>
    %171 = arith.mulf %160, %170 : vector<8x128xf32>
    %c1_89 = arith.constant 1 : index
    %c0_90 = arith.constant 0 : index
    %c0_91 = arith.constant 0 : index
    %172 = vector.load %arg12[%c1_89, %c0_90, %c0_91] : memref<6x128x32xf32, #tpu.memory_space<vmem>>, vector<1x128x32xf32>
    %173 = vector.shape_cast %172 : vector<1x128x32xf32> to vector<128x32xf32>
    %cst_92 = arith.constant dense<0.000000e+00> : vector<8x32xf32>
    %174 = tpu.matmul %171, %173, %cst_92 {dimension_numbers = #tpu.dot_dimension_numbers<[1], [0], [0], [1], [0, 0, 1, 1], [], []>} : vector<8x128xf32>, vector<128x32xf32>, vector<8x32xf32> -> vector<8x32xf32>
    %c1_93 = arith.constant 1 : index
    %c0_94 = arith.constant 0 : index
    %c0_95 = arith.constant 0 : index
    %175 = vector.load %arg13[%c1_93, %c0_94, %c0_95] : memref<6x1x32xf32, #tpu.memory_space<vmem>>, vector<1x1x32xf32>
    %176 = vector.shape_cast %175 : vector<1x1x32xf32> to vector<1x32xf32>
    %177 = vector.broadcast %176 : vector<1x32xf32> to vector<8x32xf32>
    %178 = arith.addf %174, %177 : vector<8x32xf32>
    %179 = arith.addf %178, %151 : vector<8x32xf32>
    %c1_96 = arith.constant 1 : index
    %c0_97 = arith.constant 0 : index
    %c0_98 = arith.constant 0 : index
    %180 = vector.load %arg14[%c1_96, %c0_97, %c0_98] : memref<6x1x32xf32, #tpu.memory_space<vmem>>, vector<1x1x32xf32>
    %181 = vector.shape_cast %180 : vector<1x1x32xf32> to vector<1x32xf32>
    %c1_99 = arith.constant 1 : index
    %c0_100 = arith.constant 0 : index
    %c0_101 = arith.constant 0 : index
    %182 = vector.load %arg15[%c1_99, %c0_100, %c0_101] : memref<6x1x32xf32, #tpu.memory_space<vmem>>, vector<1x1x32xf32>
    %183 = vector.shape_cast %182 : vector<1x1x32xf32> to vector<1x32xf32>
    %cst_102 = arith.constant dense<0.000000e+00> : vector<8xf32>
    %184 = vector.multi_reduction <add>, %179, %cst_102 [1] : vector<8x32xf32> to vector<8xf32>
    %185 = vector.shape_cast %184 : vector<8xf32> to vector<8x1xf32>
    %cst_103 = arith.constant 3.200000e+01 : f32
    %186 = vector.broadcast %cst_103 : f32 to vector<8x1xf32>
    %187 = arith.divf %185, %186 : vector<8x1xf32>
    %188 = vector.broadcast %187 : vector<8x1xf32> to vector<8x32xf32>
    %189 = arith.subf %179, %188 : vector<8x32xf32>
    %190 = arith.mulf %189, %189 : vector<8x32xf32>
    %cst_104 = arith.constant dense<0.000000e+00> : vector<8xf32>
    %191 = vector.multi_reduction <add>, %190, %cst_104 [1] : vector<8x32xf32> to vector<8xf32>
    %192 = vector.shape_cast %191 : vector<8xf32> to vector<8x1xf32>
    %cst_105 = arith.constant 3.200000e+01 : f32
    %193 = vector.broadcast %cst_105 : f32 to vector<8x1xf32>
    %194 = arith.divf %192, %193 : vector<8x1xf32>
    %195 = vector.broadcast %187 : vector<8x1xf32> to vector<8x32xf32>
    %196 = arith.subf %179, %195 : vector<8x32xf32>
    %cst_106 = arith.constant 9.99999974E-6 : f32
    %197 = vector.broadcast %cst_106 : f32 to vector<8x1xf32>
    %198 = arith.addf %194, %197 : vector<8x1xf32>
    %199 = math.rsqrt %198 : vector<8x1xf32>
    %200 = vector.broadcast %199 : vector<8x1xf32> to vector<8x32xf32>
    %201 = arith.mulf %196, %200 : vector<8x32xf32>
    %202 = vector.broadcast %181 : vector<1x32xf32> to vector<8x32xf32>
    %203 = arith.mulf %201, %202 : vector<8x32xf32>
    %204 = vector.broadcast %183 : vector<1x32xf32> to vector<8x32xf32>
    %205 = arith.addf %203, %204 : vector<8x32xf32>
    %c2 = arith.constant 2 : index
    %c0_107 = arith.constant 0 : index
    %c0_108 = arith.constant 0 : index
    %206 = vector.load %arg6[%c2, %c0_107, %c0_108] : memref<6x32x32xf32, #tpu.memory_space<vmem>>, vector<1x32x32xf32>
    %207 = vector.shape_cast %206 : vector<1x32x32xf32> to vector<32x32xf32>
    %cst_109 = arith.constant dense<0.000000e+00> : vector<8x32xf32>
    %208 = tpu.matmul %205, %207, %cst_109 {dimension_numbers = #tpu.dot_dimension_numbers<[1], [0], [0], [1], [0, 0, 1, 1], [], []>} : vector<8x32xf32>, vector<32x32xf32>, vector<8x32xf32> -> vector<8x32xf32>
    %c2_110 = arith.constant 2 : index
    %c0_111 = arith.constant 0 : index
    %c0_112 = arith.constant 0 : index
    %209 = vector.load %arg7[%c2_110, %c0_111, %c0_112] : memref<6x1x32xf32, #tpu.memory_space<vmem>>, vector<1x1x32xf32>
    %210 = vector.shape_cast %209 : vector<1x1x32xf32> to vector<1x32xf32>
    %211 = vector.broadcast %210 : vector<1x32xf32> to vector<8x32xf32>
    %212 = arith.addf %208, %211 : vector<8x32xf32>
    %213 = arith.addf %212, %205 : vector<8x32xf32>
    %c2_113 = arith.constant 2 : index
    %c0_114 = arith.constant 0 : index
    %c0_115 = arith.constant 0 : index
    %214 = vector.load %arg8[%c2_113, %c0_114, %c0_115] : memref<6x1x32xf32, #tpu.memory_space<vmem>>, vector<1x1x32xf32>
    %215 = vector.shape_cast %214 : vector<1x1x32xf32> to vector<1x32xf32>
    %c2_116 = arith.constant 2 : index
    %c0_117 = arith.constant 0 : index
    %c0_118 = arith.constant 0 : index
    %216 = vector.load %arg9[%c2_116, %c0_117, %c0_118] : memref<6x1x32xf32, #tpu.memory_space<vmem>>, vector<1x1x32xf32>
    %217 = vector.shape_cast %216 : vector<1x1x32xf32> to vector<1x32xf32>
    %cst_119 = arith.constant dense<0.000000e+00> : vector<8xf32>
    %218 = vector.multi_reduction <add>, %213, %cst_119 [1] : vector<8x32xf32> to vector<8xf32>
    %219 = vector.shape_cast %218 : vector<8xf32> to vector<8x1xf32>
    %cst_120 = arith.constant 3.200000e+01 : f32
    %220 = vector.broadcast %cst_120 : f32 to vector<8x1xf32>
    %221 = arith.divf %219, %220 : vector<8x1xf32>
    %222 = vector.broadcast %221 : vector<8x1xf32> to vector<8x32xf32>
    %223 = arith.subf %213, %222 : vector<8x32xf32>
    %224 = arith.mulf %223, %223 : vector<8x32xf32>
    %cst_121 = arith.constant dense<0.000000e+00> : vector<8xf32>
    %225 = vector.multi_reduction <add>, %224, %cst_121 [1] : vector<8x32xf32> to vector<8xf32>
    %226 = vector.shape_cast %225 : vector<8xf32> to vector<8x1xf32>
    %cst_122 = arith.constant 3.200000e+01 : f32
    %227 = vector.broadcast %cst_122 : f32 to vector<8x1xf32>
    %228 = arith.divf %226, %227 : vector<8x1xf32>
    %229 = vector.broadcast %221 : vector<8x1xf32> to vector<8x32xf32>
    %230 = arith.subf %213, %229 : vector<8x32xf32>
    %cst_123 = arith.constant 9.99999974E-6 : f32
    %231 = vector.broadcast %cst_123 : f32 to vector<8x1xf32>
    %232 = arith.addf %228, %231 : vector<8x1xf32>
    %233 = math.rsqrt %232 : vector<8x1xf32>
    %234 = vector.broadcast %233 : vector<8x1xf32> to vector<8x32xf32>
    %235 = arith.mulf %230, %234 : vector<8x32xf32>
    %236 = vector.broadcast %215 : vector<1x32xf32> to vector<8x32xf32>
    %237 = arith.mulf %235, %236 : vector<8x32xf32>
    %238 = vector.broadcast %217 : vector<1x32xf32> to vector<8x32xf32>
    %239 = arith.addf %237, %238 : vector<8x32xf32>
    %c2_124 = arith.constant 2 : index
    %c0_125 = arith.constant 0 : index
    %c0_126 = arith.constant 0 : index
    %240 = vector.load %arg10[%c2_124, %c0_125, %c0_126] : memref<6x32x128xf32, #tpu.memory_space<vmem>>, vector<1x32x128xf32>
    %241 = vector.shape_cast %240 : vector<1x32x128xf32> to vector<32x128xf32>
    %cst_127 = arith.constant dense<0.000000e+00> : vector<8x128xf32>
    %242 = tpu.matmul %239, %241, %cst_127 {dimension_numbers = #tpu.dot_dimension_numbers<[1], [0], [0], [1], [0, 0, 1, 1], [], []>} : vector<8x32xf32>, vector<32x128xf32>, vector<8x128xf32> -> vector<8x128xf32>
    %c2_128 = arith.constant 2 : index
    %c0_129 = arith.constant 0 : index
    %c0_130 = arith.constant 0 : index
    %243 = vector.load %arg11[%c2_128, %c0_129, %c0_130] : memref<6x1x128xf32, #tpu.memory_space<vmem>>, vector<1x1x128xf32>
    %244 = vector.shape_cast %243 : vector<1x1x128xf32> to vector<1x128xf32>
    %245 = vector.broadcast %244 : vector<1x128xf32> to vector<8x128xf32>
    %246 = arith.addf %242, %245 : vector<8x128xf32>
    %cst_131 = arith.constant 5.000000e-01 : f32
    %247 = vector.broadcast %cst_131 : f32 to vector<8x128xf32>
    %248 = arith.mulf %247, %246 : vector<8x128xf32>
    %249 = arith.mulf %246, %246 : vector<8x128xf32>
    %250 = arith.mulf %249, %246 : vector<8x128xf32>
    %cst_132 = arith.constant 4.471500e-02 : f32
    %251 = vector.broadcast %cst_132 : f32 to vector<8x128xf32>
    %252 = arith.mulf %251, %250 : vector<8x128xf32>
    %253 = arith.addf %246, %252 : vector<8x128xf32>
    %cst_133 = arith.constant 0.797884583 : f32
    %254 = vector.broadcast %cst_133 : f32 to vector<8x128xf32>
    %255 = arith.mulf %254, %253 : vector<8x128xf32>
    %256 = math.tanh %255 : vector<8x128xf32>
    %cst_134 = arith.constant 1.000000e+00 : f32
    %257 = vector.broadcast %cst_134 : f32 to vector<8x128xf32>
    %258 = arith.addf %257, %256 : vector<8x128xf32>
    %259 = arith.mulf %248, %258 : vector<8x128xf32>
    %c2_135 = arith.constant 2 : index
    %c0_136 = arith.constant 0 : index
    %c0_137 = arith.constant 0 : index
    %260 = vector.load %arg12[%c2_135, %c0_136, %c0_137] : memref<6x128x32xf32, #tpu.memory_space<vmem>>, vector<1x128x32xf32>
    %261 = vector.shape_cast %260 : vector<1x128x32xf32> to vector<128x32xf32>
    %cst_138 = arith.constant dense<0.000000e+00> : vector<8x32xf32>
    %262 = tpu.matmul %259, %261, %cst_138 {dimension_numbers = #tpu.dot_dimension_numbers<[1], [0], [0], [1], [0, 0, 1, 1], [], []>} : vector<8x128xf32>, vector<128x32xf32>, vector<8x32xf32> -> vector<8x32xf32>
    %c2_139 = arith.constant 2 : index
    %c0_140 = arith.constant 0 : index
    %c0_141 = arith.constant 0 : index
    %263 = vector.load %arg13[%c2_139, %c0_140, %c0_141] : memref<6x1x32xf32, #tpu.memory_space<vmem>>, vector<1x1x32xf32>
    %264 = vector.shape_cast %263 : vector<1x1x32xf32> to vector<1x32xf32>
    %265 = vector.broadcast %264 : vector<1x32xf32> to vector<8x32xf32>
    %266 = arith.addf %262, %265 : vector<8x32xf32>
    %267 = arith.addf %266, %239 : vector<8x32xf32>
    %c2_142 = arith.constant 2 : index
    %c0_143 = arith.constant 0 : index
    %c0_144 = arith.constant 0 : index
    %268 = vector.load %arg14[%c2_142, %c0_143, %c0_144] : memref<6x1x32xf32, #tpu.memory_space<vmem>>, vector<1x1x32xf32>
    %269 = vector.shape_cast %268 : vector<1x1x32xf32> to vector<1x32xf32>
    %c2_145 = arith.constant 2 : index
    %c0_146 = arith.constant 0 : index
    %c0_147 = arith.constant 0 : index
    %270 = vector.load %arg15[%c2_145, %c0_146, %c0_147] : memref<6x1x32xf32, #tpu.memory_space<vmem>>, vector<1x1x32xf32>
    %271 = vector.shape_cast %270 : vector<1x1x32xf32> to vector<1x32xf32>
    %cst_148 = arith.constant dense<0.000000e+00> : vector<8xf32>
    %272 = vector.multi_reduction <add>, %267, %cst_148 [1] : vector<8x32xf32> to vector<8xf32>
    %273 = vector.shape_cast %272 : vector<8xf32> to vector<8x1xf32>
    %cst_149 = arith.constant 3.200000e+01 : f32
    %274 = vector.broadcast %cst_149 : f32 to vector<8x1xf32>
    %275 = arith.divf %273, %274 : vector<8x1xf32>
    %276 = vector.broadcast %275 : vector<8x1xf32> to vector<8x32xf32>
    %277 = arith.subf %267, %276 : vector<8x32xf32>
    %278 = arith.mulf %277, %277 : vector<8x32xf32>
    %cst_150 = arith.constant dense<0.000000e+00> : vector<8xf32>
    %279 = vector.multi_reduction <add>, %278, %cst_150 [1] : vector<8x32xf32> to vector<8xf32>
    %280 = vector.shape_cast %279 : vector<8xf32> to vector<8x1xf32>
    %cst_151 = arith.constant 3.200000e+01 : f32
    %281 = vector.broadcast %cst_151 : f32 to vector<8x1xf32>
    %282 = arith.divf %280, %281 : vector<8x1xf32>
    %283 = vector.broadcast %275 : vector<8x1xf32> to vector<8x32xf32>
    %284 = arith.subf %267, %283 : vector<8x32xf32>
    %cst_152 = arith.constant 9.99999974E-6 : f32
    %285 = vector.broadcast %cst_152 : f32 to vector<8x1xf32>
    %286 = arith.addf %282, %285 : vector<8x1xf32>
    %287 = math.rsqrt %286 : vector<8x1xf32>
    %288 = vector.broadcast %287 : vector<8x1xf32> to vector<8x32xf32>
    %289 = arith.mulf %284, %288 : vector<8x32xf32>
    %290 = vector.broadcast %269 : vector<1x32xf32> to vector<8x32xf32>
    %291 = arith.mulf %289, %290 : vector<8x32xf32>
    %292 = vector.broadcast %271 : vector<1x32xf32> to vector<8x32xf32>
    %293 = arith.addf %291, %292 : vector<8x32xf32>
    %c3 = arith.constant 3 : index
    %c0_153 = arith.constant 0 : index
    %c0_154 = arith.constant 0 : index
    %294 = vector.load %arg6[%c3, %c0_153, %c0_154] : memref<6x32x32xf32, #tpu.memory_space<vmem>>, vector<1x32x32xf32>
    %295 = vector.shape_cast %294 : vector<1x32x32xf32> to vector<32x32xf32>
    %cst_155 = arith.constant dense<0.000000e+00> : vector<8x32xf32>
    %296 = tpu.matmul %293, %295, %cst_155 {dimension_numbers = #tpu.dot_dimension_numbers<[1], [0], [0], [1], [0, 0, 1, 1], [], []>} : vector<8x32xf32>, vector<32x32xf32>, vector<8x32xf32> -> vector<8x32xf32>
    %c3_156 = arith.constant 3 : index
    %c0_157 = arith.constant 0 : index
    %c0_158 = arith.constant 0 : index
    %297 = vector.load %arg7[%c3_156, %c0_157, %c0_158] : memref<6x1x32xf32, #tpu.memory_space<vmem>>, vector<1x1x32xf32>
    %298 = vector.shape_cast %297 : vector<1x1x32xf32> to vector<1x32xf32>
    %299 = vector.broadcast %298 : vector<1x32xf32> to vector<8x32xf32>
    %300 = arith.addf %296, %299 : vector<8x32xf32>
    %301 = arith.addf %300, %293 : vector<8x32xf32>
    %c3_159 = arith.constant 3 : index
    %c0_160 = arith.constant 0 : index
    %c0_161 = arith.constant 0 : index
    %302 = vector.load %arg8[%c3_159, %c0_160, %c0_161] : memref<6x1x32xf32, #tpu.memory_space<vmem>>, vector<1x1x32xf32>
    %303 = vector.shape_cast %302 : vector<1x1x32xf32> to vector<1x32xf32>
    %c3_162 = arith.constant 3 : index
    %c0_163 = arith.constant 0 : index
    %c0_164 = arith.constant 0 : index
    %304 = vector.load %arg9[%c3_162, %c0_163, %c0_164] : memref<6x1x32xf32, #tpu.memory_space<vmem>>, vector<1x1x32xf32>
    %305 = vector.shape_cast %304 : vector<1x1x32xf32> to vector<1x32xf32>
    %cst_165 = arith.constant dense<0.000000e+00> : vector<8xf32>
    %306 = vector.multi_reduction <add>, %301, %cst_165 [1] : vector<8x32xf32> to vector<8xf32>
    %307 = vector.shape_cast %306 : vector<8xf32> to vector<8x1xf32>
    %cst_166 = arith.constant 3.200000e+01 : f32
    %308 = vector.broadcast %cst_166 : f32 to vector<8x1xf32>
    %309 = arith.divf %307, %308 : vector<8x1xf32>
    %310 = vector.broadcast %309 : vector<8x1xf32> to vector<8x32xf32>
    %311 = arith.subf %301, %310 : vector<8x32xf32>
    %312 = arith.mulf %311, %311 : vector<8x32xf32>
    %cst_167 = arith.constant dense<0.000000e+00> : vector<8xf32>
    %313 = vector.multi_reduction <add>, %312, %cst_167 [1] : vector<8x32xf32> to vector<8xf32>
    %314 = vector.shape_cast %313 : vector<8xf32> to vector<8x1xf32>
    %cst_168 = arith.constant 3.200000e+01 : f32
    %315 = vector.broadcast %cst_168 : f32 to vector<8x1xf32>
    %316 = arith.divf %314, %315 : vector<8x1xf32>
    %317 = vector.broadcast %309 : vector<8x1xf32> to vector<8x32xf32>
    %318 = arith.subf %301, %317 : vector<8x32xf32>
    %cst_169 = arith.constant 9.99999974E-6 : f32
    %319 = vector.broadcast %cst_169 : f32 to vector<8x1xf32>
    %320 = arith.addf %316, %319 : vector<8x1xf32>
    %321 = math.rsqrt %320 : vector<8x1xf32>
    %322 = vector.broadcast %321 : vector<8x1xf32> to vector<8x32xf32>
    %323 = arith.mulf %318, %322 : vector<8x32xf32>
    %324 = vector.broadcast %303 : vector<1x32xf32> to vector<8x32xf32>
    %325 = arith.mulf %323, %324 : vector<8x32xf32>
    %326 = vector.broadcast %305 : vector<1x32xf32> to vector<8x32xf32>
    %327 = arith.addf %325, %326 : vector<8x32xf32>
    %c3_170 = arith.constant 3 : index
    %c0_171 = arith.constant 0 : index
    %c0_172 = arith.constant 0 : index
    %328 = vector.load %arg10[%c3_170, %c0_171, %c0_172] : memref<6x32x128xf32, #tpu.memory_space<vmem>>, vector<1x32x128xf32>
    %329 = vector.shape_cast %328 : vector<1x32x128xf32> to vector<32x128xf32>
    %cst_173 = arith.constant dense<0.000000e+00> : vector<8x128xf32>
    %330 = tpu.matmul %327, %329, %cst_173 {dimension_numbers = #tpu.dot_dimension_numbers<[1], [0], [0], [1], [0, 0, 1, 1], [], []>} : vector<8x32xf32>, vector<32x128xf32>, vector<8x128xf32> -> vector<8x128xf32>
    %c3_174 = arith.constant 3 : index
    %c0_175 = arith.constant 0 : index
    %c0_176 = arith.constant 0 : index
    %331 = vector.load %arg11[%c3_174, %c0_175, %c0_176] : memref<6x1x128xf32, #tpu.memory_space<vmem>>, vector<1x1x128xf32>
    %332 = vector.shape_cast %331 : vector<1x1x128xf32> to vector<1x128xf32>
    %333 = vector.broadcast %332 : vector<1x128xf32> to vector<8x128xf32>
    %334 = arith.addf %330, %333 : vector<8x128xf32>
    %cst_177 = arith.constant 5.000000e-01 : f32
    %335 = vector.broadcast %cst_177 : f32 to vector<8x128xf32>
    %336 = arith.mulf %335, %334 : vector<8x128xf32>
    %337 = arith.mulf %334, %334 : vector<8x128xf32>
    %338 = arith.mulf %337, %334 : vector<8x128xf32>
    %cst_178 = arith.constant 4.471500e-02 : f32
    %339 = vector.broadcast %cst_178 : f32 to vector<8x128xf32>
    %340 = arith.mulf %339, %338 : vector<8x128xf32>
    %341 = arith.addf %334, %340 : vector<8x128xf32>
    %cst_179 = arith.constant 0.797884583 : f32
    %342 = vector.broadcast %cst_179 : f32 to vector<8x128xf32>
    %343 = arith.mulf %342, %341 : vector<8x128xf32>
    %344 = math.tanh %343 : vector<8x128xf32>
    %cst_180 = arith.constant 1.000000e+00 : f32
    %345 = vector.broadcast %cst_180 : f32 to vector<8x128xf32>
    %346 = arith.addf %345, %344 : vector<8x128xf32>
    %347 = arith.mulf %336, %346 : vector<8x128xf32>
    %c3_181 = arith.constant 3 : index
    %c0_182 = arith.constant 0 : index
    %c0_183 = arith.constant 0 : index
    %348 = vector.load %arg12[%c3_181, %c0_182, %c0_183] : memref<6x128x32xf32, #tpu.memory_space<vmem>>, vector<1x128x32xf32>
    %349 = vector.shape_cast %348 : vector<1x128x32xf32> to vector<128x32xf32>
    %cst_184 = arith.constant dense<0.000000e+00> : vector<8x32xf32>
    %350 = tpu.matmul %347, %349, %cst_184 {dimension_numbers = #tpu.dot_dimension_numbers<[1], [0], [0], [1], [0, 0, 1, 1], [], []>} : vector<8x128xf32>, vector<128x32xf32>, vector<8x32xf32> -> vector<8x32xf32>
    %c3_185 = arith.constant 3 : index
    %c0_186 = arith.constant 0 : index
    %c0_187 = arith.constant 0 : index
    %351 = vector.load %arg13[%c3_185, %c0_186, %c0_187] : memref<6x1x32xf32, #tpu.memory_space<vmem>>, vector<1x1x32xf32>
    %352 = vector.shape_cast %351 : vector<1x1x32xf32> to vector<1x32xf32>
    %353 = vector.broadcast %352 : vector<1x32xf32> to vector<8x32xf32>
    %354 = arith.addf %350, %353 : vector<8x32xf32>
    %355 = arith.addf %354, %327 : vector<8x32xf32>
    %c3_188 = arith.constant 3 : index
    %c0_189 = arith.constant 0 : index
    %c0_190 = arith.constant 0 : index
    %356 = vector.load %arg14[%c3_188, %c0_189, %c0_190] : memref<6x1x32xf32, #tpu.memory_space<vmem>>, vector<1x1x32xf32>
    %357 = vector.shape_cast %356 : vector<1x1x32xf32> to vector<1x32xf32>
    %c3_191 = arith.constant 3 : index
    %c0_192 = arith.constant 0 : index
    %c0_193 = arith.constant 0 : index
    %358 = vector.load %arg15[%c3_191, %c0_192, %c0_193] : memref<6x1x32xf32, #tpu.memory_space<vmem>>, vector<1x1x32xf32>
    %359 = vector.shape_cast %358 : vector<1x1x32xf32> to vector<1x32xf32>
    %cst_194 = arith.constant dense<0.000000e+00> : vector<8xf32>
    %360 = vector.multi_reduction <add>, %355, %cst_194 [1] : vector<8x32xf32> to vector<8xf32>
    %361 = vector.shape_cast %360 : vector<8xf32> to vector<8x1xf32>
    %cst_195 = arith.constant 3.200000e+01 : f32
    %362 = vector.broadcast %cst_195 : f32 to vector<8x1xf32>
    %363 = arith.divf %361, %362 : vector<8x1xf32>
    %364 = vector.broadcast %363 : vector<8x1xf32> to vector<8x32xf32>
    %365 = arith.subf %355, %364 : vector<8x32xf32>
    %366 = arith.mulf %365, %365 : vector<8x32xf32>
    %cst_196 = arith.constant dense<0.000000e+00> : vector<8xf32>
    %367 = vector.multi_reduction <add>, %366, %cst_196 [1] : vector<8x32xf32> to vector<8xf32>
    %368 = vector.shape_cast %367 : vector<8xf32> to vector<8x1xf32>
    %cst_197 = arith.constant 3.200000e+01 : f32
    %369 = vector.broadcast %cst_197 : f32 to vector<8x1xf32>
    %370 = arith.divf %368, %369 : vector<8x1xf32>
    %371 = vector.broadcast %363 : vector<8x1xf32> to vector<8x32xf32>
    %372 = arith.subf %355, %371 : vector<8x32xf32>
    %cst_198 = arith.constant 9.99999974E-6 : f32
    %373 = vector.broadcast %cst_198 : f32 to vector<8x1xf32>
    %374 = arith.addf %370, %373 : vector<8x1xf32>
    %375 = math.rsqrt %374 : vector<8x1xf32>
    %376 = vector.broadcast %375 : vector<8x1xf32> to vector<8x32xf32>
    %377 = arith.mulf %372, %376 : vector<8x32xf32>
    %378 = vector.broadcast %357 : vector<1x32xf32> to vector<8x32xf32>
    %379 = arith.mulf %377, %378 : vector<8x32xf32>
    %380 = vector.broadcast %359 : vector<1x32xf32> to vector<8x32xf32>
    %381 = arith.addf %379, %380 : vector<8x32xf32>
    %c4 = arith.constant 4 : index
    %c0_199 = arith.constant 0 : index
    %c0_200 = arith.constant 0 : index
    %382 = vector.load %arg6[%c4, %c0_199, %c0_200] : memref<6x32x32xf32, #tpu.memory_space<vmem>>, vector<1x32x32xf32>
    %383 = vector.shape_cast %382 : vector<1x32x32xf32> to vector<32x32xf32>
    %cst_201 = arith.constant dense<0.000000e+00> : vector<8x32xf32>
    %384 = tpu.matmul %381, %383, %cst_201 {dimension_numbers = #tpu.dot_dimension_numbers<[1], [0], [0], [1], [0, 0, 1, 1], [], []>} : vector<8x32xf32>, vector<32x32xf32>, vector<8x32xf32> -> vector<8x32xf32>
    %c4_202 = arith.constant 4 : index
    %c0_203 = arith.constant 0 : index
    %c0_204 = arith.constant 0 : index
    %385 = vector.load %arg7[%c4_202, %c0_203, %c0_204] : memref<6x1x32xf32, #tpu.memory_space<vmem>>, vector<1x1x32xf32>
    %386 = vector.shape_cast %385 : vector<1x1x32xf32> to vector<1x32xf32>
    %387 = vector.broadcast %386 : vector<1x32xf32> to vector<8x32xf32>
    %388 = arith.addf %384, %387 : vector<8x32xf32>
    %389 = arith.addf %388, %381 : vector<8x32xf32>
    %c4_205 = arith.constant 4 : index
    %c0_206 = arith.constant 0 : index
    %c0_207 = arith.constant 0 : index
    %390 = vector.load %arg8[%c4_205, %c0_206, %c0_207] : memref<6x1x32xf32, #tpu.memory_space<vmem>>, vector<1x1x32xf32>
    %391 = vector.shape_cast %390 : vector<1x1x32xf32> to vector<1x32xf32>
    %c4_208 = arith.constant 4 : index
    %c0_209 = arith.constant 0 : index
    %c0_210 = arith.constant 0 : index
    %392 = vector.load %arg9[%c4_208, %c0_209, %c0_210] : memref<6x1x32xf32, #tpu.memory_space<vmem>>, vector<1x1x32xf32>
    %393 = vector.shape_cast %392 : vector<1x1x32xf32> to vector<1x32xf32>
    %cst_211 = arith.constant dense<0.000000e+00> : vector<8xf32>
    %394 = vector.multi_reduction <add>, %389, %cst_211 [1] : vector<8x32xf32> to vector<8xf32>
    %395 = vector.shape_cast %394 : vector<8xf32> to vector<8x1xf32>
    %cst_212 = arith.constant 3.200000e+01 : f32
    %396 = vector.broadcast %cst_212 : f32 to vector<8x1xf32>
    %397 = arith.divf %395, %396 : vector<8x1xf32>
    %398 = vector.broadcast %397 : vector<8x1xf32> to vector<8x32xf32>
    %399 = arith.subf %389, %398 : vector<8x32xf32>
    %400 = arith.mulf %399, %399 : vector<8x32xf32>
    %cst_213 = arith.constant dense<0.000000e+00> : vector<8xf32>
    %401 = vector.multi_reduction <add>, %400, %cst_213 [1] : vector<8x32xf32> to vector<8xf32>
    %402 = vector.shape_cast %401 : vector<8xf32> to vector<8x1xf32>
    %cst_214 = arith.constant 3.200000e+01 : f32
    %403 = vector.broadcast %cst_214 : f32 to vector<8x1xf32>
    %404 = arith.divf %402, %403 : vector<8x1xf32>
    %405 = vector.broadcast %397 : vector<8x1xf32> to vector<8x32xf32>
    %406 = arith.subf %389, %405 : vector<8x32xf32>
    %cst_215 = arith.constant 9.99999974E-6 : f32
    %407 = vector.broadcast %cst_215 : f32 to vector<8x1xf32>
    %408 = arith.addf %404, %407 : vector<8x1xf32>
    %409 = math.rsqrt %408 : vector<8x1xf32>
    %410 = vector.broadcast %409 : vector<8x1xf32> to vector<8x32xf32>
    %411 = arith.mulf %406, %410 : vector<8x32xf32>
    %412 = vector.broadcast %391 : vector<1x32xf32> to vector<8x32xf32>
    %413 = arith.mulf %411, %412 : vector<8x32xf32>
    %414 = vector.broadcast %393 : vector<1x32xf32> to vector<8x32xf32>
    %415 = arith.addf %413, %414 : vector<8x32xf32>
    %c4_216 = arith.constant 4 : index
    %c0_217 = arith.constant 0 : index
    %c0_218 = arith.constant 0 : index
    %416 = vector.load %arg10[%c4_216, %c0_217, %c0_218] : memref<6x32x128xf32, #tpu.memory_space<vmem>>, vector<1x32x128xf32>
    %417 = vector.shape_cast %416 : vector<1x32x128xf32> to vector<32x128xf32>
    %cst_219 = arith.constant dense<0.000000e+00> : vector<8x128xf32>
    %418 = tpu.matmul %415, %417, %cst_219 {dimension_numbers = #tpu.dot_dimension_numbers<[1], [0], [0], [1], [0, 0, 1, 1], [], []>} : vector<8x32xf32>, vector<32x128xf32>, vector<8x128xf32> -> vector<8x128xf32>
    %c4_220 = arith.constant 4 : index
    %c0_221 = arith.constant 0 : index
    %c0_222 = arith.constant 0 : index
    %419 = vector.load %arg11[%c4_220, %c0_221, %c0_222] : memref<6x1x128xf32, #tpu.memory_space<vmem>>, vector<1x1x128xf32>
    %420 = vector.shape_cast %419 : vector<1x1x128xf32> to vector<1x128xf32>
    %421 = vector.broadcast %420 : vector<1x128xf32> to vector<8x128xf32>
    %422 = arith.addf %418, %421 : vector<8x128xf32>
    %cst_223 = arith.constant 5.000000e-01 : f32
    %423 = vector.broadcast %cst_223 : f32 to vector<8x128xf32>
    %424 = arith.mulf %423, %422 : vector<8x128xf32>
    %425 = arith.mulf %422, %422 : vector<8x128xf32>
    %426 = arith.mulf %425, %422 : vector<8x128xf32>
    %cst_224 = arith.constant 4.471500e-02 : f32
    %427 = vector.broadcast %cst_224 : f32 to vector<8x128xf32>
    %428 = arith.mulf %427, %426 : vector<8x128xf32>
    %429 = arith.addf %422, %428 : vector<8x128xf32>
    %cst_225 = arith.constant 0.797884583 : f32
    %430 = vector.broadcast %cst_225 : f32 to vector<8x128xf32>
    %431 = arith.mulf %430, %429 : vector<8x128xf32>
    %432 = math.tanh %431 : vector<8x128xf32>
    %cst_226 = arith.constant 1.000000e+00 : f32
    %433 = vector.broadcast %cst_226 : f32 to vector<8x128xf32>
    %434 = arith.addf %433, %432 : vector<8x128xf32>
    %435 = arith.mulf %424, %434 : vector<8x128xf32>
    %c4_227 = arith.constant 4 : index
    %c0_228 = arith.constant 0 : index
    %c0_229 = arith.constant 0 : index
    %436 = vector.load %arg12[%c4_227, %c0_228, %c0_229] : memref<6x128x32xf32, #tpu.memory_space<vmem>>, vector<1x128x32xf32>
    %437 = vector.shape_cast %436 : vector<1x128x32xf32> to vector<128x32xf32>
    %cst_230 = arith.constant dense<0.000000e+00> : vector<8x32xf32>
    %438 = tpu.matmul %435, %437, %cst_230 {dimension_numbers = #tpu.dot_dimension_numbers<[1], [0], [0], [1], [0, 0, 1, 1], [], []>} : vector<8x128xf32>, vector<128x32xf32>, vector<8x32xf32> -> vector<8x32xf32>
    %c4_231 = arith.constant 4 : index
    %c0_232 = arith.constant 0 : index
    %c0_233 = arith.constant 0 : index
    %439 = vector.load %arg13[%c4_231, %c0_232, %c0_233] : memref<6x1x32xf32, #tpu.memory_space<vmem>>, vector<1x1x32xf32>
    %440 = vector.shape_cast %439 : vector<1x1x32xf32> to vector<1x32xf32>
    %441 = vector.broadcast %440 : vector<1x32xf32> to vector<8x32xf32>
    %442 = arith.addf %438, %441 : vector<8x32xf32>
    %443 = arith.addf %442, %415 : vector<8x32xf32>
    %c4_234 = arith.constant 4 : index
    %c0_235 = arith.constant 0 : index
    %c0_236 = arith.constant 0 : index
    %444 = vector.load %arg14[%c4_234, %c0_235, %c0_236] : memref<6x1x32xf32, #tpu.memory_space<vmem>>, vector<1x1x32xf32>
    %445 = vector.shape_cast %444 : vector<1x1x32xf32> to vector<1x32xf32>
    %c4_237 = arith.constant 4 : index
    %c0_238 = arith.constant 0 : index
    %c0_239 = arith.constant 0 : index
    %446 = vector.load %arg15[%c4_237, %c0_238, %c0_239] : memref<6x1x32xf32, #tpu.memory_space<vmem>>, vector<1x1x32xf32>
    %447 = vector.shape_cast %446 : vector<1x1x32xf32> to vector<1x32xf32>
    %cst_240 = arith.constant dense<0.000000e+00> : vector<8xf32>
    %448 = vector.multi_reduction <add>, %443, %cst_240 [1] : vector<8x32xf32> to vector<8xf32>
    %449 = vector.shape_cast %448 : vector<8xf32> to vector<8x1xf32>
    %cst_241 = arith.constant 3.200000e+01 : f32
    %450 = vector.broadcast %cst_241 : f32 to vector<8x1xf32>
    %451 = arith.divf %449, %450 : vector<8x1xf32>
    %452 = vector.broadcast %451 : vector<8x1xf32> to vector<8x32xf32>
    %453 = arith.subf %443, %452 : vector<8x32xf32>
    %454 = arith.mulf %453, %453 : vector<8x32xf32>
    %cst_242 = arith.constant dense<0.000000e+00> : vector<8xf32>
    %455 = vector.multi_reduction <add>, %454, %cst_242 [1] : vector<8x32xf32> to vector<8xf32>
    %456 = vector.shape_cast %455 : vector<8xf32> to vector<8x1xf32>
    %cst_243 = arith.constant 3.200000e+01 : f32
    %457 = vector.broadcast %cst_243 : f32 to vector<8x1xf32>
    %458 = arith.divf %456, %457 : vector<8x1xf32>
    %459 = vector.broadcast %451 : vector<8x1xf32> to vector<8x32xf32>
    %460 = arith.subf %443, %459 : vector<8x32xf32>
    %cst_244 = arith.constant 9.99999974E-6 : f32
    %461 = vector.broadcast %cst_244 : f32 to vector<8x1xf32>
    %462 = arith.addf %458, %461 : vector<8x1xf32>
    %463 = math.rsqrt %462 : vector<8x1xf32>
    %464 = vector.broadcast %463 : vector<8x1xf32> to vector<8x32xf32>
    %465 = arith.mulf %460, %464 : vector<8x32xf32>
    %466 = vector.broadcast %445 : vector<1x32xf32> to vector<8x32xf32>
    %467 = arith.mulf %465, %466 : vector<8x32xf32>
    %468 = vector.broadcast %447 : vector<1x32xf32> to vector<8x32xf32>
    %469 = arith.addf %467, %468 : vector<8x32xf32>
    %c5 = arith.constant 5 : index
    %c0_245 = arith.constant 0 : index
    %c0_246 = arith.constant 0 : index
    %470 = vector.load %arg6[%c5, %c0_245, %c0_246] : memref<6x32x32xf32, #tpu.memory_space<vmem>>, vector<1x32x32xf32>
    %471 = vector.shape_cast %470 : vector<1x32x32xf32> to vector<32x32xf32>
    %cst_247 = arith.constant dense<0.000000e+00> : vector<8x32xf32>
    %472 = tpu.matmul %469, %471, %cst_247 {dimension_numbers = #tpu.dot_dimension_numbers<[1], [0], [0], [1], [0, 0, 1, 1], [], []>} : vector<8x32xf32>, vector<32x32xf32>, vector<8x32xf32> -> vector<8x32xf32>
    %c5_248 = arith.constant 5 : index
    %c0_249 = arith.constant 0 : index
    %c0_250 = arith.constant 0 : index
    %473 = vector.load %arg7[%c5_248, %c0_249, %c0_250] : memref<6x1x32xf32, #tpu.memory_space<vmem>>, vector<1x1x32xf32>
    %474 = vector.shape_cast %473 : vector<1x1x32xf32> to vector<1x32xf32>
    %475 = vector.broadcast %474 : vector<1x32xf32> to vector<8x32xf32>
    %476 = arith.addf %472, %475 : vector<8x32xf32>
    %477 = arith.addf %476, %469 : vector<8x32xf32>
    %c5_251 = arith.constant 5 : index
    %c0_252 = arith.constant 0 : index
    %c0_253 = arith.constant 0 : index
    %478 = vector.load %arg8[%c5_251, %c0_252, %c0_253] : memref<6x1x32xf32, #tpu.memory_space<vmem>>, vector<1x1x32xf32>
    %479 = vector.shape_cast %478 : vector<1x1x32xf32> to vector<1x32xf32>
    %c5_254 = arith.constant 5 : index
    %c0_255 = arith.constant 0 : index
    %c0_256 = arith.constant 0 : index
    %480 = vector.load %arg9[%c5_254, %c0_255, %c0_256] : memref<6x1x32xf32, #tpu.memory_space<vmem>>, vector<1x1x32xf32>
    %481 = vector.shape_cast %480 : vector<1x1x32xf32> to vector<1x32xf32>
    %cst_257 = arith.constant dense<0.000000e+00> : vector<8xf32>
    %482 = vector.multi_reduction <add>, %477, %cst_257 [1] : vector<8x32xf32> to vector<8xf32>
    %483 = vector.shape_cast %482 : vector<8xf32> to vector<8x1xf32>
    %cst_258 = arith.constant 3.200000e+01 : f32
    %484 = vector.broadcast %cst_258 : f32 to vector<8x1xf32>
    %485 = arith.divf %483, %484 : vector<8x1xf32>
    %486 = vector.broadcast %485 : vector<8x1xf32> to vector<8x32xf32>
    %487 = arith.subf %477, %486 : vector<8x32xf32>
    %488 = arith.mulf %487, %487 : vector<8x32xf32>
    %cst_259 = arith.constant dense<0.000000e+00> : vector<8xf32>
    %489 = vector.multi_reduction <add>, %488, %cst_259 [1] : vector<8x32xf32> to vector<8xf32>
    %490 = vector.shape_cast %489 : vector<8xf32> to vector<8x1xf32>
    %cst_260 = arith.constant 3.200000e+01 : f32
    %491 = vector.broadcast %cst_260 : f32 to vector<8x1xf32>
    %492 = arith.divf %490, %491 : vector<8x1xf32>
    %493 = vector.broadcast %485 : vector<8x1xf32> to vector<8x32xf32>
    %494 = arith.subf %477, %493 : vector<8x32xf32>
    %cst_261 = arith.constant 9.99999974E-6 : f32
    %495 = vector.broadcast %cst_261 : f32 to vector<8x1xf32>
    %496 = arith.addf %492, %495 : vector<8x1xf32>
    %497 = math.rsqrt %496 : vector<8x1xf32>
    %498 = vector.broadcast %497 : vector<8x1xf32> to vector<8x32xf32>
    %499 = arith.mulf %494, %498 : vector<8x32xf32>
    %500 = vector.broadcast %479 : vector<1x32xf32> to vector<8x32xf32>
    %501 = arith.mulf %499, %500 : vector<8x32xf32>
    %502 = vector.broadcast %481 : vector<1x32xf32> to vector<8x32xf32>
    %503 = arith.addf %501, %502 : vector<8x32xf32>
    %c5_262 = arith.constant 5 : index
    %c0_263 = arith.constant 0 : index
    %c0_264 = arith.constant 0 : index
    %504 = vector.load %arg10[%c5_262, %c0_263, %c0_264] : memref<6x32x128xf32, #tpu.memory_space<vmem>>, vector<1x32x128xf32>
    %505 = vector.shape_cast %504 : vector<1x32x128xf32> to vector<32x128xf32>
    %cst_265 = arith.constant dense<0.000000e+00> : vector<8x128xf32>
    %506 = tpu.matmul %503, %505, %cst_265 {dimension_numbers = #tpu.dot_dimension_numbers<[1], [0], [0], [1], [0, 0, 1, 1], [], []>} : vector<8x32xf32>, vector<32x128xf32>, vector<8x128xf32> -> vector<8x128xf32>
    %c5_266 = arith.constant 5 : index
    %c0_267 = arith.constant 0 : index
    %c0_268 = arith.constant 0 : index
    %507 = vector.load %arg11[%c5_266, %c0_267, %c0_268] : memref<6x1x128xf32, #tpu.memory_space<vmem>>, vector<1x1x128xf32>
    %508 = vector.shape_cast %507 : vector<1x1x128xf32> to vector<1x128xf32>
    %509 = vector.broadcast %508 : vector<1x128xf32> to vector<8x128xf32>
    %510 = arith.addf %506, %509 : vector<8x128xf32>
    %cst_269 = arith.constant 5.000000e-01 : f32
    %511 = vector.broadcast %cst_269 : f32 to vector<8x128xf32>
    %512 = arith.mulf %511, %510 : vector<8x128xf32>
    %513 = arith.mulf %510, %510 : vector<8x128xf32>
    %514 = arith.mulf %513, %510 : vector<8x128xf32>
    %cst_270 = arith.constant 4.471500e-02 : f32
    %515 = vector.broadcast %cst_270 : f32 to vector<8x128xf32>
    %516 = arith.mulf %515, %514 : vector<8x128xf32>
    %517 = arith.addf %510, %516 : vector<8x128xf32>
    %cst_271 = arith.constant 0.797884583 : f32
    %518 = vector.broadcast %cst_271 : f32 to vector<8x128xf32>
    %519 = arith.mulf %518, %517 : vector<8x128xf32>
    %520 = math.tanh %519 : vector<8x128xf32>
    %cst_272 = arith.constant 1.000000e+00 : f32
    %521 = vector.broadcast %cst_272 : f32 to vector<8x128xf32>
    %522 = arith.addf %521, %520 : vector<8x128xf32>
    %523 = arith.mulf %512, %522 : vector<8x128xf32>
    %c5_273 = arith.constant 5 : index
    %c0_274 = arith.constant 0 : index
    %c0_275 = arith.constant 0 : index
    %524 = vector.load %arg12[%c5_273, %c0_274, %c0_275] : memref<6x128x32xf32, #tpu.memory_space<vmem>>, vector<1x128x32xf32>
    %525 = vector.shape_cast %524 : vector<1x128x32xf32> to vector<128x32xf32>
    %cst_276 = arith.constant dense<0.000000e+00> : vector<8x32xf32>
    %526 = tpu.matmul %523, %525, %cst_276 {dimension_numbers = #tpu.dot_dimension_numbers<[1], [0], [0], [1], [0, 0, 1, 1], [], []>} : vector<8x128xf32>, vector<128x32xf32>, vector<8x32xf32> -> vector<8x32xf32>
    %c5_277 = arith.constant 5 : index
    %c0_278 = arith.constant 0 : index
    %c0_279 = arith.constant 0 : index
    %527 = vector.load %arg13[%c5_277, %c0_278, %c0_279] : memref<6x1x32xf32, #tpu.memory_space<vmem>>, vector<1x1x32xf32>
    %528 = vector.shape_cast %527 : vector<1x1x32xf32> to vector<1x32xf32>
    %529 = vector.broadcast %528 : vector<1x32xf32> to vector<8x32xf32>
    %530 = arith.addf %526, %529 : vector<8x32xf32>
    %531 = arith.addf %530, %503 : vector<8x32xf32>
    %c5_280 = arith.constant 5 : index
    %c0_281 = arith.constant 0 : index
    %c0_282 = arith.constant 0 : index
    %532 = vector.load %arg14[%c5_280, %c0_281, %c0_282] : memref<6x1x32xf32, #tpu.memory_space<vmem>>, vector<1x1x32xf32>
    %533 = vector.shape_cast %532 : vector<1x1x32xf32> to vector<1x32xf32>
    %c5_283 = arith.constant 5 : index
    %c0_284 = arith.constant 0 : index
    %c0_285 = arith.constant 0 : index
    %534 = vector.load %arg15[%c5_283, %c0_284, %c0_285] : memref<6x1x32xf32, #tpu.memory_space<vmem>>, vector<1x1x32xf32>
    %535 = vector.shape_cast %534 : vector<1x1x32xf32> to vector<1x32xf32>
    %cst_286 = arith.constant dense<0.000000e+00> : vector<8xf32>
    %536 = vector.multi_reduction <add>, %531, %cst_286 [1] : vector<8x32xf32> to vector<8xf32>
    %537 = vector.shape_cast %536 : vector<8xf32> to vector<8x1xf32>
    %cst_287 = arith.constant 3.200000e+01 : f32
    %538 = vector.broadcast %cst_287 : f32 to vector<8x1xf32>
    %539 = arith.divf %537, %538 : vector<8x1xf32>
    %540 = vector.broadcast %539 : vector<8x1xf32> to vector<8x32xf32>
    %541 = arith.subf %531, %540 : vector<8x32xf32>
    %542 = arith.mulf %541, %541 : vector<8x32xf32>
    %cst_288 = arith.constant dense<0.000000e+00> : vector<8xf32>
    %543 = vector.multi_reduction <add>, %542, %cst_288 [1] : vector<8x32xf32> to vector<8xf32>
    %544 = vector.shape_cast %543 : vector<8xf32> to vector<8x1xf32>
    %cst_289 = arith.constant 3.200000e+01 : f32
    %545 = vector.broadcast %cst_289 : f32 to vector<8x1xf32>
    %546 = arith.divf %544, %545 : vector<8x1xf32>
    %547 = vector.broadcast %539 : vector<8x1xf32> to vector<8x32xf32>
    %548 = arith.subf %531, %547 : vector<8x32xf32>
    %cst_290 = arith.constant 9.99999974E-6 : f32
    %549 = vector.broadcast %cst_290 : f32 to vector<8x1xf32>
    %550 = arith.addf %546, %549 : vector<8x1xf32>
    %551 = math.rsqrt %550 : vector<8x1xf32>
    %552 = vector.broadcast %551 : vector<8x1xf32> to vector<8x32xf32>
    %553 = arith.mulf %548, %552 : vector<8x32xf32>
    %554 = vector.broadcast %533 : vector<1x32xf32> to vector<8x32xf32>
    %555 = arith.mulf %553, %554 : vector<8x32xf32>
    %556 = vector.broadcast %535 : vector<1x32xf32> to vector<8x32xf32>
    %557 = arith.addf %555, %556 : vector<8x32xf32>
    %c0_291 = arith.constant 0 : index
    %c0_292 = arith.constant 0 : index
    %558 = vector.load %arg16[%c0_291, %c0_292] : memref<32x128xf32, #tpu.memory_space<vmem>>, vector<32x128xf32>
    %cst_293 = arith.constant dense<0.000000e+00> : vector<8x128xf32>
    %559 = tpu.matmul %557, %558, %cst_293 {dimension_numbers = #tpu.dot_dimension_numbers<[1], [0], [0], [1], [0, 0, 1, 1], [], []>} : vector<8x32xf32>, vector<32x128xf32>, vector<8x128xf32> -> vector<8x128xf32>
    %c0_294 = arith.constant 0 : index
    %c0_295 = arith.constant 0 : index
    %560 = vector.load %arg17[%c0_294, %c0_295] : memref<1x128xf32, #tpu.memory_space<vmem>>, vector<1x128xf32>
    %561 = vector.broadcast %560 : vector<1x128xf32> to vector<8x128xf32>
    %562 = arith.addf %559, %561 : vector<8x128xf32>
    %c0_296 = arith.constant 0 : index
    %c0_297 = arith.constant 0 : index
    %563 = vector.load %arg18[%c0_296, %c0_297] : memref<8x128xf32, #tpu.memory_space<vmem>>, vector<8x128xf32>
    tpu.vector_store %arg18[%c0_296, %c0_297], %562 {strides = array<i32>} : memref<8x128xf32, #tpu.memory_space<vmem>>, vector<8x128xf32>,
    return
  }
  func.func @transform_0(%arg0: i32) -> (i32, i32) {
    %c0_i32 = arith.constant 0 : i32
    %c0_i32_0 = arith.constant 0 : i32
    return %arg0, %c0_i32 : i32, i32
  }
  func.func @transform_1(%arg0: i32) -> (i32, i32) {
    %c0_i32 = arith.constant 0 : i32
    %c0_i32_0 = arith.constant 0 : i32
    %c0_i32_1 = arith.constant 0 : i32
    return %c0_i32, %c0_i32_0 : i32, i32
  }
  func.func @transform_2(%arg0: i32) -> (i32, i32) {
    %c0_i32 = arith.constant 0 : i32
    %c0_i32_0 = arith.constant 0 : i32
    %c0_i32_1 = arith.constant 0 : i32
    return %c0_i32, %c0_i32_0 : i32, i32
  }
  func.func @transform_3(%arg0: i32) -> (i32, i32) {
    %c0_i32 = arith.constant 0 : i32
    %c0_i32_0 = arith.constant 0 : i32
    %c0_i32_1 = arith.constant 0 : i32
    return %c0_i32, %c0_i32_0 : i32, i32
  }
  func.func @transform_4(%arg0: i32) -> (i32, i32) {
    %c0_i32 = arith.constant 0 : i32
    %c0_i32_0 = arith.constant 0 : i32
    %c0_i32_1 = arith.constant 0 : i32
    return %c0_i32, %c0_i32_0 : i32, i32
  }
  func.func @transform_5(%arg0: i32) -> (i32, i32, i32) {
    %c0_i32 = arith.constant 0 : i32
    %c0_i32_0 = arith.constant 0 : i32
    %c0_i32_1 = arith.constant 0 : i32
    %c0_i32_2 = arith.constant 0 : i32
    return %c0_i32, %c0_i32_0, %c0_i32_1 : i32, i32, i32
  }
  func.func @transform_6(%arg0: i32) -> (i32, i32, i32) {
    %c0_i32 = arith.constant 0 : i32
    %c0_i32_0 = arith.constant 0 : i32
    %c0_i32_1 = arith.constant 0 : i32
    %c0_i32_2 = arith.constant 0 : i32
    return %c0_i32, %c0_i32_0, %c0_i32_1 : i32, i32, i32
  }
  func.func @transform_7(%arg0: i32) -> (i32, i32, i32) {
    %c0_i32 = arith.constant 0 : i32
    %c0_i32_0 = arith.constant 0 : i32
    %c0_i32_1 = arith.constant 0 : i32
    %c0_i32_2 = arith.constant 0 : i32
    return %c0_i32, %c0_i32_0, %c0_i32_1 : i32, i32, i32
  }
  func.func @transform_8(%arg0: i32) -> (i32, i32, i32) {
    %c0_i32 = arith.constant 0 : i32
    %c0_i32_0 = arith.constant 0 : i32
    %c0_i32_1 = arith.constant 0 : i32
    %c0_i32_2 = arith.constant 0 : i32
    return %c0_i32, %c0_i32_0, %c0_i32_1 : i32, i32, i32
  }
  func.func @transform_9(%arg0: i32) -> (i32, i32, i32) {
    %c0_i32 = arith.constant 0 : i32
    %c0_i32_0 = arith.constant 0 : i32
    %c0_i32_1 = arith.constant 0 : i32
    %c0_i32_2 = arith.constant 0 : i32
    return %c0_i32, %c0_i32_0, %c0_i32_1 : i32, i32, i32
  }
  func.func @transform_10(%arg0: i32) -> (i32, i32, i32) {
    %c0_i32 = arith.constant 0 : i32
    %c0_i32_0 = arith.constant 0 : i32
    %c0_i32_1 = arith.constant 0 : i32
    %c0_i32_2 = arith.constant 0 : i32
    return %c0_i32, %c0_i32_0, %c0_i32_1 : i32, i32, i32
  }
  func.func @transform_11(%arg0: i32) -> (i32, i32, i32) {
    %c0_i32 = arith.constant 0 : i32
    %c0_i32_0 = arith.constant 0 : i32
    %c0_i32_1 = arith.constant 0 : i32
    %c0_i32_2 = arith.constant 0 : i32
    return %c0_i32, %c0_i32_0, %c0_i32_1 : i32, i32, i32
  }
  func.func @transform_12(%arg0: i32) -> (i32, i32, i32) {
    %c0_i32 = arith.constant 0 : i32
    %c0_i32_0 = arith.constant 0 : i32
    %c0_i32_1 = arith.constant 0 : i32
    %c0_i32_2 = arith.constant 0 : i32
    return %c0_i32, %c0_i32_0, %c0_i32_1 : i32, i32, i32
  }
  func.func @transform_13(%arg0: i32) -> (i32, i32, i32) {
    %c0_i32 = arith.constant 0 : i32
    %c0_i32_0 = arith.constant 0 : i32
    %c0_i32_1 = arith.constant 0 : i32
    %c0_i32_2 = arith.constant 0 : i32
    return %c0_i32, %c0_i32_0, %c0_i32_1 : i32, i32, i32
  }
  func.func @transform_14(%arg0: i32) -> (i32, i32, i32) {
    %c0_i32 = arith.constant 0 : i32
    %c0_i32_0 = arith.constant 0 : i32
    %c0_i32_1 = arith.constant 0 : i32
    %c0_i32_2 = arith.constant 0 : i32
    return %c0_i32, %c0_i32_0, %c0_i32_1 : i32, i32, i32
  }
  func.func @transform_15(%arg0: i32) -> (i32, i32) {
    %c0_i32 = arith.constant 0 : i32
    %c0_i32_0 = arith.constant 0 : i32
    %c0_i32_1 = arith.constant 0 : i32
    return %c0_i32, %c0_i32_0 : i32, i32
  }
  func.func @transform_16(%arg0: i32) -> (i32, i32) {
    %c0_i32 = arith.constant 0 : i32
    %c0_i32_0 = arith.constant 0 : i32
    %c0_i32_1 = arith.constant 0 : i32
    return %c0_i32, %c0_i32_0 : i32, i32
  }
  func.func @transform_17(%arg0: i32) -> (i32, i32) {
    %c0_i32 = arith.constant 0 : i32
    %c0_i32_0 = arith.constant 0 : i32
    return %arg0, %c0_i32 : i32, i32
  }
}

</mosaic_0001>

<bundles_post_ra>
// kernel: tpu_custom_call.1
= control target key start
LH: loop header
LB: loop body
LE: loop exit
PB: predicated region body
PF: predicated region fallthrough
CT: control target
= control target key end

     0   :  { %s4907_s0 = inlined_call_operand.vmem [shape: f32[16,16], index: 0, kind: input, shape index: {}]   ;;  %s4908_s1 = inlined_call_operand.vmem [shape: f32[16,32], index: 1, kind: input, shape index: {}]   ;;  %s4909_s2 = inlined_call_operand.vmem [shape: f32[1,32], index: 2, kind: input, shape index: {}]   ;;  %s4910_s3 = inlined_call_operand.vmem [shape: f32[1,32], index: 3, kind: input, shape index: {}]   ;;  %s4911_s4 = inlined_call_operand.vmem [shape: f32[1,32], index: 4, kind: input, shape index: {}]   ;;  %s4912_s5 = inlined_call_operand.vmem [shape: f32[6,32,32], index: 5, kind: input, shape index: {}]   ;;  %s4913_s6 = inlined_call_operand.vmem [shape: f32[6,1,32], index: 6, kind: input, shape index: {}]   ;;  %s4914_s7 = inlined_call_operand.vmem [shape: f32[6,1,32], index: 7, kind: input, shape index: {}]   ;;  %s4915_s8 = inlined_call_operand.vmem [shape: f32[6,1,32], index: 8, kind: input, shape index: {}]   ;;  %s4916_s9 = inlined_call_operand.vmem [shape: f32[6,32,128], index: 9, kind: input, shape index: {}]   ;;  %s4917_s10 = inlined_call_operand.vmem [shape: f32[6,1,128], index: 10, kind: input, shape index: {}]   ;;  %s4918_s11 = inlined_call_operand.vmem [shape: f32[6,128,32], index: 11, kind: input, shape index: {}]   ;;  %s4919_s12 = inlined_call_operand.vmem [shape: f32[6,1,32], index: 12, kind: input, shape index: {}]   ;;  %s4920_s13 = inlined_call_operand.vmem [shape: f32[6,1,32], index: 13, kind: input, shape index: {}]   ;;  %s4921_s14 = inlined_call_operand.vmem [shape: f32[6,1,32], index: 14, kind: input, shape index: {}]   ;;  %s4922_s15 = inlined_call_operand.vmem [shape: f32[32,128], index: 15, kind: input, shape index: {}]   ;;  %s4923_s16 = inlined_call_operand.vmem [shape: f32[1,128], index: 16, kind: input, shape index: {}]   ;;  %s4924_s17 = inlined_call_operand.hbm [shape: f32[16,128], index: 17, kind: output, shape index: {}]  }
   0x1   :  { %4928 = sst [smem:[#allocation7_spill]] %s4907_s0 }
   0x2   :  { %4929 = sst [smem:[#allocation8_spill]] %s4908_s1 }
   0x3   :  { %4930 = sst [smem:[#allocation9_spill]] %s4909_s2 }
   0x4   :  { %4931 = sst [smem:[#allocation10_spill]] %s4910_s3 }
   0x5   :  { %4932 = sst [smem:[#allocation11_spill]] %s4911_s4 }
   0x6   :  { %22 = vsyncpa [#allocation3], 0 }
   0x7   :  { %24 = vsyncpa [#allocation3 + $0x1], 0  ;;  %s4065_s24 = smov 0   ;;  %s4067_s25 = smov 0  }
   0x8   :  { %s4069_s26 = smov 0   ;;  %s4071_s27 = smov 0  }
   0x9 LB: > { %4933 = sst [smem:[#allocation5_spill]] %s3965_s26  ;;  %s4086_s28 = sadd.s32 4294967295, %s3969_s27   ;;  %s3969_s27 = sphi %s4071_s27, %s4946_s27   ;;  %s3965_s26 = sphi %s4069_s26, %s4943_s26   ;;  %s3961_s25 = sphi %s4067_s25, %s4945_s25   ;;  %s3957_s24 = sphi %s4065_s24, %s4944_s24  }
   0xa   : > { %s2847_s29 = sadd.s32 4294967294, %s3969_s27   ;;  %s4090_s0 = sadd.s32 1, %s3969_s27  }
   0xb   : > { %s399_s30 = sadd.s32 1, %s3965_s26  ;;  %s396_s18 = ssub.s32 %s3969_s27, %s4090_s0 }
   0xc   : > { %p409_p0 = scmp.ne.s32.totalorder %s3965_s26, %s3961_s25  ;;  %p397_p1 = scmp.eq.s32.totalorder %s396_s18, 0 }
   0xd   : > { %p410_p2 = scmp.eq.s32.totalorder %s4086_s28, 1  ;;  %p415_p3 = scmp.ne.s32.totalorder %s3961_s25, %s3957_s24 }
   0xe   : > { %p416_p4 = scmp.eq.s32.totalorder %s2847_s29, 1  ;;  %p2850_p7 = scmp.ge.s32.totalorder %s3969_s27, 1 }
   0xf   : > { %s4101_s19 = scalar_select %p397_p1, %s3965_s26, %s399_s30  }
  0x10   : > { %p4103_p5 = por %p410_p2, %p409_p0  ;;  %p4107_p6 = por %p416_p4, %p415_p3 }
  0x11   : > { %4934 = sst [smem:[#allocation6_spill]] %s4101_s19  ;;  %p489_p8 = scmp.lt.s32.totalorder %s3969_s27, 3 }
  0x13   : > { %p490_p9 = pnand %p2850_p7, %p489_p8 }
  0x14   : > { %s4937_s23 = sld [smem:[#allocation8_spill]] (!%p490_p9)  ;;  %p540_p10 = scmp.lt.s32.totalorder (!%p490_p9), %s4086_s28, 1  ;;  %v3971_v2 = vmov (!%p490_p9), 0.0|0.0   ;;  %vm3972_vm0 = vmmov (!%p490_p9), 0   ;;  %v3973_v4 = vmov (!%p490_p9), 0.0   ;;  %vm554_vm1 = vcmask (!%p490_p9), 130048  }
  0x15   : > { %493 = sbr.rel (%p490_p9) target bundleno = 8570 (0x217a), region = 88  ;;  %3602 = vmatprep.subr.bf16.mxu1 (!%p490_p9), %v3971_v2  ;;  %3246 = vmatprep.mubr.msk.f32.mxu1 (!%p490_p9), %vm3972_vm0, %v3973_v4  ;;  %s4938_s30 = sld [smem:[#allocation7_spill]] (!%p490_p9)  ;;  %vm630_vm2 = vcmask (!%p490_p9), 261120   ;;  %v659_v16 = vld [vmem:[%s4912_s5] sm:$0xff] (!%p490_p9)  ;;  %v660_v17 = vld [vmem:[%s4912_s5 + $0x8] sm:$0xff] (!%p490_p9)  ;;  %v661_v19 = vld [vmem:[%s4912_s5 + $0x10] sm:$0xff] (!%p490_p9) }
  0x16   : > { %3611 = vmatprep.subr.bf16.mxu0 (!%p490_p9), %v3971_v2  ;;  %3268 = vmatprep.mubr.msk.f32.mxu0 (!%p490_p9), %vm3972_vm0, %v3973_v4  ;;  %s4939_s2 = sld [smem:[#allocation9_spill]] (!%p490_p9)  ;;  %v3606_v18 = vpack.c.bf16 (!%p490_p9), %v660_v17, %v659_v16  ;;  %v662_v20 = vld [vmem:[%s4912_s5 + $0x18] sm:$0xff] (!%p490_p9)  ;;  %s4940_s3 = sld [smem:[#allocation10_spill]] (!%p490_p9)  ;;  %v2857_v31 = vld [vmem:[%s4913_s6] ss:$0 sm:$0xff] (!%p490_p9)  ;;  %v774_v43 = vld [vmem:[%s4916_s9 + $0x8] sm:$0xff] (!%p490_p9) }
  0x17   : > { %v3609_v21 = vpack.c.bf16 (!%p490_p9), %v662_v20, %v661_v19  ;;  %s4941_s4 = sld [smem:[#allocation11_spill]] (!%p490_p9)  ;;  %v773_v42 = vld [vmem:[%s4916_s9] sm:$0xff] (!%p490_p9)  ;;  %v775_v44 = vld [vmem:[%s4916_s9 + $0x10] sm:$0xff] (!%p490_p9)  ;;  %v776_v46 = vld [vmem:[%s4916_s9 + $0x18] sm:$0xff] (!%p490_p9)  ;;  %s537_s26 = sand.u32 (!%p490_p9), 1, %s3961_s25  }
  0x18   : > { %v3612_v45 = vpack.c.bf16 (!%p490_p9), %v774_v43, %v773_v42  ;;  %v3615_v47 = vpack.c.bf16 (!%p490_p9), %v776_v46, %v775_v44  ;;  %v866_v48 = vld [vmem:[%s4918_s11] sm:$0xff] (!%p490_p9)  ;;  %v867_v49 = vld [vmem:[%s4918_s11 + $0x8] sm:$0xff] (!%p490_p9)  ;;  %v868_v60 = vld [vmem:[%s4918_s11 + $0x10] sm:$0xff] (!%p490_p9)  ;;  %s2851_s19 = sshll.u32 (!%p490_p9), %s537_s26, 3  ;;  %s3069_s29 = sshll.u32 (!%p490_p9), %s4086_s28, 7 }
  0x19   : > { %v3618_v50 = vpack.c.bf16 (!%p490_p9), %v867_v49, %v866_v48  ;;  %v2859_v55 = vld [vmem:[%s4914_s7] ss:$0 sm:$0xff] (!%p490_p9)  ;;  %v869_v61 = vld [vmem:[%s4918_s11 + $0x18] sm:$0xff] (!%p490_p9)  ;;  %v880_v16 = vld [vmem:[%s4918_s11 + $0x70] sm:$0xff] (!%p490_p9) }
  0x1a   : > { %v545_v0 = vld [vmem:[%s4937_s23] sm:$0xff] (!%p490_p9)  ;;  %v546_v1 = vld [vmem:[%s4937_s23 + $0x8] sm:$0xff] (!%p490_p9)  ;;  %3613 = vmatpush3.bf16.msra.mxu0 (!%p490_p9), %v3612_v45  ;;  %v3621_v62 = vpack.c.bf16 (!%p490_p9), %v869_v61, %v868_v60  ;;  %v881_v17 = vld [vmem:[%s4918_s11 + $0x78] sm:$0xff] (!%p490_p9) }
  0x1b   : > { %v3603_v3 = vpack.c.bf16 (!%p490_p9), %v546_v1, %v545_v0  ;;  %3614 = vmatprep.subr.bf16.mxu0 (!%p490_p9), %v3971_v2  ;;  %v2860_v57 = vld [vmem:[%s4915_s8] ss:$0 sm:$0xff] (!%p490_p9)  ;;  %v871_v0 = vld [vmem:[%s4918_s11 + $0x28] sm:$0xff] (!%p490_p9)  ;;  %v2868_v46 = vld [vmem:[%s4912_s5 + $0x30] sm:$0xff] (!%p490_p9) }
  0x1c   : > { %s541_s18 = scalar_select %p540_p10, %s4086_s28, 1  ;;  %v2853_v6 = vld [vmem:[%s4939_s2] ss:$0 sm:$0xff]  ;;  %v2867_v44 = vld [vmem:[%s4912_s5 + $0x28] sm:$0xff] }
  0x1d   : > { %3604 = vmatpush3.bf16.msra.mxu1 %v3603_v3  ;;  %v2855_v26 = vld [vmem:[%s4940_s3] ss:$0 sm:$0xff]  ;;  %v872_v3 = vld [vmem:[%s4918_s11 + $0x30] sm:$0xff]  ;;  %s539_s3 = scalar_lea.vmem [#allocation2], %s2851_s19  ;;  %s3974_s28 = smov [#allocation2]  }
  0x1e   : > { %s2852_s21 = sshll.u32 %s541_s18, 3  ;;  %3605 = vmatprep.subr.bf16.mxu1 %v3971_v2  ;;  %v2856_v28 = vld [vmem:[%s4941_s4] ss:$0 sm:$0xff]  ;;  %3616 = vmatpush3.bf16.msra.mxu0 %v3615_v47  ;;  %v2869_v47 = vld [vmem:[%s4912_s5 + $0x38] sm:$0xff]  ;;  %s4865_s18 = scalar_lea.hbm %s4924_s17, %s3069_s29 }
  0x1f   : > { %s543_s23 = scalar_lea.vmem %s4938_s30, %s2852_s21  ;;  %3641 = vmatprep.subr.bf16.mxu0 %v3971_v2  ;;  %v870_v63 = vld [vmem:[%s4918_s11 + $0x20] sm:$0xff]  ;;  %v3645_v48 = vpack.c.bf16 %v2869_v47, %v2868_v46  ;;  %s2788_s30 = sshll.u32 %s539_s3, 4  ;;  %s4867_s30 = int_to_ptr.vmem [resolvable:$true] %s2788_s30 }
  0x20   : > { %v544_v5 = vld [vmem:[%s543_s23] sm:$0xff]  ;;  %v3624_v1 = vpack.c.bf16 %v871_v0, %v870_v63  ;;  %s2775_s4 = scalar_lea.sflag [#allocation3], %s537_s26  ;;  %s3907_s21 = scalar_lea.vmem %s4867_s30, 128 }
  0x21   : > { %3247 = vmatmul.mubr.msk.f32.vlgmr.msra.gmra.mrb[0].mxu1 %vm554_vm1, %v544_v5  ;;  %v873_v5 = vld [vmem:[%s4918_s11 + $0x38] sm:$0xff]  ;;  %v2861_v19 = vld [vmem:[%s4917_s10] ss:$0 sm:$0xff]  ;;  %v2882_v46 = vld [vmem:[%s4917_s10 + $0x1] ss:$0 sm:$0xff]  ;;  %p3908_p11 = scmp.ne.s32.totalorder %s4867_s30, %s3907_s21  ;;  %s3911_s19 = sshll.u32 %s3974_s28, 4  ;;  %s3912_s19 = int_to_ptr.vmem [resolvable:$false] %s3911_s19 }
  0x22   : > { %3257 = vmatprep.mubr.msk.f32.mxu1 %vm3972_vm0, %v3973_v4  ;;  %3607 = vmatpush3.bf16.msra.mxu1 %v3606_v18  ;;  %v3639_v18 = vpack.c.bf16 %v881_v17, %v880_v16  ;;  %v2866_v43 = vld [vmem:[%s4912_s5 + $0x20] sm:$0xff]  ;;  %s3913_s22 = scalar_lea.vmem %s3912_s19, 256  ;;  %p3914_p0 = scmp.lt.s32.totalorder %s4867_s30, %s3912_s19 }
  0x23   : > { %3608 = vmatprep.subr.bf16.mxu1 %v3971_v2  ;;  %v3642_v45 = vpack.c.bf16 %v2867_v44, %v2866_v43  ;;  %v2875_v17 = vld [vmem:[%s4914_s7 + $0x1] ss:$0 sm:$0xff]  ;;  %v2898_v43 = vld [vmem:[%s4918_s11 + $0xf0] sm:$0xff]  ;;  %v2899_v44 = vld [vmem:[%s4918_s11 + $0xf8] sm:$0xff]  ;;  %p3909_p12 = pnand %p3908_p11, %p4103_p5  ;;  %p3915_p1 = scmp.lt.s32.totalorder %s3913_s22, %s3907_s21 }
  0x25   : > { %p3910_p13 = pneg %p3909_p12  ;;  %p3916_p2 = por %p3915_p1, %p3914_p0 }
  0x26   : > { %3610 = vmatpush3.bf16.msra.mxu1 %v3609_v21 }
  0x27   : > { %3617 = vmatprep.subr.bf16.mxu1 %v3971_v2  ;;  %p3917_p3 = pnand %p3916_p2, %p3910_p13 }
  0xf4   : > { %v624_v7 = vpop.f32.mrb[0].mxu1 }
  0xf5   : > { %v625_v8 = vadd.f32 %v2853_v6, %v624_v7  ;;  %v3248_v9 = vpop.f32.mrb[1].mxu1  ;;  %v3627_v6 = vpack.c.bf16 %v873_v5, %v872_v3  ;;  %v874_v7 = vld [vmem:[%s4918_s11 + $0x40] sm:$0xff] }
  0xf7   : > { %v631_v10 = vsel %vm630_vm2, %v625_v8, 0.0 }
  0xf8   : > { %632 = vadd.xlane.f32.xlu0 %v631_v10  ;;  %v876_v10 = vld [vmem:[%s4918_s11 + $0x50] sm:$0xff] }
 0x185   : > { %v633_v11 = vpop.xlane.xlu0 %632 }
 0x186   : > { %v635_v12 = vmul.f32 0.03125, %v633_v11  ;;  %v877_v11 = vld [vmem:[%s4918_s11 + $0x58] sm:$0xff] }
 0x188   : > { %v636_v13 = vsub.f32 %v625_v8, %v635_v12  ;;  %v875_v8 = vld [vmem:[%s4918_s11 + $0x48] sm:$0xff]  ;;  %v3633_v12 = vpack.c.bf16 %v877_v11, %v876_v10  ;;  %v2879_v10 = vld [vmem:[%s4916_s9 + $0x30] sm:$0xff]  ;;  %v2880_v11 = vld [vmem:[%s4916_s9 + $0x38] sm:$0xff] }
 0x189   : > { %v3630_v9 = vpack.c.bf16 %v875_v8, %v874_v7  ;;  %v2877_v7 = vld [vmem:[%s4916_s9 + $0x20] sm:$0xff]  ;;  %v2878_v8 = vld [vmem:[%s4916_s9 + $0x28] sm:$0xff] }
 0x18a   : > { %v637_v14 = vmul.f32 %v636_v13, %v636_v13 }
 0x18c   : > { %v638_v15 = vsel %vm630_vm2, %v637_v14, 0.0  ;;  %v879_v14 = vld [vmem:[%s4918_s11 + $0x68] sm:$0xff] }
 0x18d   : > { %639 = vadd.xlane.f32.xlu0 %v638_v15 }
 0x21a   : > { %v640_v22 = vpop.xlane.xlu0 %639 }
 0x21b   : > { %v641_v23 = vmul.f32 0.03125, %v640_v22 }
 0x21d   : > { %v642_v24 = vadd.f32 1e-05, %v641_v23 }
 0x21f   : > { %3869 = vrsqrt.f32 %v642_v24 }
 0x229   : > { %v3870_v25 = vpop.eup %3869 }
 0x22a   : > { %v644_v27 = vmul.f32 %v3870_v25, %v636_v13  ;;  %v878_v13 = vld [vmem:[%s4918_s11 + $0x60] sm:$0xff] }
 0x22b   : > { %v3636_v15 = vpack.c.bf16 %v879_v14, %v878_v13 }
 0x22c   : > { %v651_v29 = vmul.f32 %v2855_v26, %v644_v27 }
 0x22e   : > { %v658_v30 = vadd.f32 %v2856_v28, %v651_v29 }
 0x230   : > { %3258 = vmatmul.mubr.msk.f32.vlgmr.msra.gmra.mrb[2].mxu1 %vm630_vm2, %v658_v30 }
 0x231   : > { %3303 = vmatprep.mubr.msk.f32.mxu1 %vm3972_vm0, %v3973_v4  ;;  %3619 = vmatpush3.bf16.msra.mxu1 %v3618_v50 }
 0x232   : > { %3620 = vmatprep.subr.bf16.mxu1 %v3971_v2 }
 0x235   : > { %3622 = vmatpush3.bf16.msra.mxu1 %v3621_v62 }
 0x236   : > { %3623 = vmatprep.subr.bf16.mxu1 %v3971_v2 }
 0x239   : > { %3625 = vmatpush3.bf16.msra.mxu1 %v3624_v1 }
 0x23a   : > { %3626 = vmatprep.subr.bf16.mxu1 %v3971_v2 }
 0x23d   : > { %3628 = vmatpush3.bf16.msra.mxu1 %v3627_v6 }
 0x23e   : > { %3629 = vmatprep.subr.bf16.mxu1 %v3971_v2 }
 0x241   : > { %3631 = vmatpush3.bf16.msra.mxu1 %v3630_v9  ;;  %v3648_v9 = vpack.c.bf16 %v2878_v8, %v2877_v7  ;;  %v2906_v8 = vld [vmem:[%s4912_s5 + $0x40] sm:$0xff] }
 0x242   : > { %3632 = vmatprep.subr.bf16.mxu1 %v3971_v2 }
 0x245   : > { %3634 = vmatpush3.bf16.msra.mxu1 %v3633_v12  ;;  %v3651_v12 = vpack.c.bf16 %v2880_v11, %v2879_v10  ;;  %v2908_v11 = vld [vmem:[%s4912_s5 + $0x50] sm:$0xff] }
 0x246   : > { %3635 = vmatprep.subr.bf16.mxu1 %v3971_v2 }
 0x249   : > { %3637 = vmatpush3.bf16.msra.mxu1 %v3636_v15 }
 0x24a   : > { %3638 = vmatprep.subr.bf16.mxu1 %v3971_v2 }
 0x24d   : > { %3640 = vmatpush3.bf16.msra.mxu1 %v3639_v18 }
 0x24e   : > { %3677 = vmatprep.subr.bf16.mxu1 %v3971_v2 }
 0x303   : > { %v739_v32 = vpop.f32.mrb[2].mxu1 }
 0x304   : > { %v740_v33 = vadd.f32 %v2857_v31, %v739_v32  ;;  %v3259_v34 = vpop.f32.mrb[3].mxu1  ;;  %v2863_v32 = vld [vmem:[%s4919_s12] ss:$0 sm:$0xff] }
 0x306   : > { %v743_v35 = vadd.f32 %v740_v33, %v658_v30 }
 0x308   : > { %v746_v36 = vsel %vm630_vm2, %v743_v35, 0.0 }
 0x309   : > { %747 = vadd.xlane.f32.xlu1 %v746_v36 }
 0x396   : > { %v748_v37 = vpop.xlane.xlu1 %747 }
 0x397   : > { %v749_v38 = vmul.f32 0.03125, %v748_v37 }
 0x399   : > { %v750_v39 = vsub.f32 %v743_v35, %v749_v38 }
 0x39b   : > { %v751_v40 = vmul.f32 %v750_v39, %v750_v39 }
 0x39d   : > { %v752_v41 = vsel %vm630_vm2, %v751_v40, 0.0 }
 0x39e   : > { %753 = vadd.xlane.f32.xlu1 %v752_v41 }
 0x42b   : > { %v754_v51 = vpop.xlane.xlu1 %753 }
 0x42c   : > { %v755_v52 = vmul.f32 0.03125, %v754_v51 }
 0x42e   : > { %v756_v53 = vadd.f32 1e-05, %v755_v52 }
 0x430   : > { %3871 = vrsqrt.f32 %v756_v53  ;;  %v2864_v53 = vld [vmem:[%s4920_s13] ss:$0 sm:$0xff] }
 0x43a   : > { %v3872_v54 = vpop.eup %3871 }
 0x43b   : > { %v758_v56 = vmul.f32 %v3872_v54, %v750_v39 }
 0x43d   : > { %v765_v58 = vmul.f32 %v2859_v55, %v758_v56  ;;  %v2865_v55 = vld [vmem:[%s4921_s14] ss:$0 sm:$0xff] }
 0x43f   : > { %v772_v59 = vadd.f32 %v2860_v57, %v765_v58  ;;  %v2871_v58 = vld [vmem:[%s4913_s6 + $0x1] ss:$0 sm:$0xff] }
 0x441   : > { %3269 = vmatmul.mubr.msk.f32.vlgmr.msra.gmra.mrb[0].mxu0 %vm630_vm2, %v772_v59 }
 0x442   : > { %3314 = vmatprep.mubr.msk.f32.mxu0 %vm3972_vm0, %v3973_v4  ;;  %3643 = vmatpush3.bf16.msra.mxu0 %v3642_v45  ;;  %v3675_v45 = vpack.c.bf16 %v2899_v44, %v2898_v43  ;;  %v2915_v44 = vld [vmem:[%s4914_s7 + $0x2] ss:$0 sm:$0xff] }
 0x443   : > { %3644 = vmatprep.subr.bf16.mxu0 %v3971_v2 }
 0x446   : > { %3646 = vmatpush3.bf16.msra.mxu0 %v3645_v48 }
 0x447   : > { %3647 = vmatprep.subr.bf16.mxu0 %v3971_v2 }
 0x514   : > { %v853_v20 = vpop.f32.mrb[0].mxu0 }
 0x515   : > { %v854_v21 = vadd.f32 %v2861_v19, %v853_v20  ;;  %v3270_v22 = vpop.f32.mrb[1].mxu0  ;;  %v2884_v19 = vld [vmem:[%s4918_s11 + $0x80] sm:$0xff]  ;;  %v2885_v20 = vld [vmem:[%s4918_s11 + $0x88] sm:$0xff] }
 0x517   : > { %v858_v23 = vmul.f32 %v854_v21, %v854_v21  ;;  %v857_v29 = vmul.f32 0.5, %v854_v21 }
 0x519   : > { %v859_v24 = vmul.f32 %v858_v23, %v854_v21  ;;  %v3654_v23 = vpack.c.bf16 %v2885_v20, %v2884_v19  ;;  %v2905_v20 = vld [vmem:[%s4921_s14 + $0x1] ss:$0 sm:$0xff] }
 0x51b   : > { %v860_v25 = vmul.f32 0.044715, %v859_v24 }
 0x51d   : > { %v861_v26 = vadd.f32 %v860_v25, %v854_v21  ;;  %v2876_v21 = vld [vmem:[%s4915_s8 + $0x1] ss:$0 sm:$0xff]  ;;  %v2886_v25 = vld [vmem:[%s4918_s11 + $0x90] sm:$0xff] }
 0x51f   : > { %v862_v27 = vmul.f32 0.7978846, %v861_v26  ;;  %v2887_v26 = vld [vmem:[%s4918_s11 + $0x98] sm:$0xff] }
 0x521   : > { %3873 = vtanh.f32 %v862_v27  ;;  %v3657_v27 = vpack.c.bf16 %v2887_v26, %v2886_v25 }
 0x52b   : > { %v3874_v28 = vpop.eup %3873 }
 0x52c   : > { %v864_v30 = vadd.f32 1.0, %v3874_v28  ;;  %v2888_v28 = vld [vmem:[%s4918_s11 + $0xa0] sm:$0xff] }
 0x52e   : > { %v865_v31 = vmul.f32 %v864_v30, %v857_v29  ;;  %v2889_v29 = vld [vmem:[%s4918_s11 + $0xa8] sm:$0xff] }
 0x52f   : > { %v3660_v30 = vpack.c.bf16 %v2889_v29, %v2888_v28 }
 0x530   : > { %3304 = vmatmul.mubr.f32.vlgmr.msra.gmra.mrb[4].mxu1 %v865_v31  ;;  %v2890_v31 = vld [vmem:[%s4918_s11 + $0xb0] sm:$0xff] }
 0x531   : > { %3371 = vmatprep.mubr.msk.f32.mxu1 %vm3972_vm0, %v3973_v4 }
 0x603   : > { %v955_v33 = vpop.f32.mrb[4].mxu1 }
 0x604   : > { %v956_v34 = vadd.f32 %v2863_v32, %v955_v33  ;;  %v3305_v35 = vpop.f32.mrb[5].mxu1  ;;  %v2891_v32 = vld [vmem:[%s4918_s11 + $0xb8] sm:$0xff] }
 0x605   : > { %v3663_v33 = vpack.c.bf16 %v2891_v32, %v2890_v31  ;;  %v2893_v35 = vld [vmem:[%s4918_s11 + $0xc8] sm:$0xff] }
 0x606   : > { %v959_v36 = vadd.f32 %v956_v34, %v772_v59  ;;  %v2892_v34 = vld [vmem:[%s4918_s11 + $0xc0] sm:$0xff] }
 0x608   : > { %v962_v37 = vsel %vm630_vm2, %v959_v36, 0.0 }
 0x609   : > { %963 = vadd.xlane.f32.xlu0 %v962_v37  ;;  %v2894_v37 = vld [vmem:[%s4918_s11 + $0xd0] sm:$0xff] }
 0x696   : > { %v964_v38 = vpop.xlane.xlu0 %963 }
 0x697   : > { %v965_v39 = vmul.f32 0.03125, %v964_v38  ;;  %v2895_v38 = vld [vmem:[%s4918_s11 + $0xd8] sm:$0xff] }
 0x699   : > { %v966_v40 = vsub.f32 %v959_v36, %v965_v39  ;;  %v3666_v36 = vpack.c.bf16 %v2893_v35, %v2892_v34  ;;  %v3669_v39 = vpack.c.bf16 %v2895_v38, %v2894_v37  ;;  %v2917_v34 = vld [vmem:[%s4916_s9 + $0x40] sm:$0xff]  ;;  %v2918_v35 = vld [vmem:[%s4916_s9 + $0x48] sm:$0xff]  ;;  %v2919_v37 = vld [vmem:[%s4916_s9 + $0x50] sm:$0xff] }
 0x69a   : > { %v2920_v38 = vld [vmem:[%s4916_s9 + $0x58] sm:$0xff] }
 0x69b   : > { %v967_v41 = vmul.f32 %v966_v40, %v966_v40 }
 0x69d   : > { %v968_v42 = vsel %vm630_vm2, %v967_v41, 0.0  ;;  %v2897_v41 = vld [vmem:[%s4918_s11 + $0xe8] sm:$0xff] }
 0x69e   : > { %969 = vadd.xlane.f32.xlu1 %v968_v42 }
 0x72b   : > { %v970_v49 = vpop.xlane.xlu1 %969 }
 0x72c   : > { %v971_v50 = vmul.f32 0.03125, %v970_v49 }
 0x72e   : > { %v972_v51 = vadd.f32 1e-05, %v971_v50 }
 0x730   : > { %3875 = vrsqrt.f32 %v972_v51 }
 0x73a   : > { %v3876_v52 = vpop.eup %3875 }
 0x73b   : > { %v974_v54 = vmul.f32 %v3876_v52, %v966_v40  ;;  %v2896_v40 = vld [vmem:[%s4918_s11 + $0xe0] sm:$0xff] }
 0x73c   : > { %v3672_v42 = vpack.c.bf16 %v2897_v41, %v2896_v40 }
 0x73d   : > { %v981_v56 = vmul.f32 %v2864_v53, %v974_v54 }
 0x73f   : > { %v988_v57 = vadd.f32 %v2865_v55, %v981_v56 }
 0x741   : > { %3315 = vmatmul.mubr.msk.f32.vlgmr.msra.gmra.mrb[2].mxu0 %vm630_vm2, %v988_v57 }
 0x742   : > { %3325 = vmatprep.mubr.msk.f32.mxu0 %vm3972_vm0, %v3973_v4  ;;  %3649 = vmatpush3.bf16.msra.mxu0 %v3648_v9  ;;  %v2907_v9 = vld [vmem:[%s4912_s5 + $0x48] sm:$0xff] }
 0x743   : > { %3650 = vmatprep.subr.bf16.mxu0 %v3971_v2  ;;  %v3678_v10 = vpack.c.bf16 %v2907_v9, %v2906_v8  ;;  %v2938_v8 = vld [vmem:[%s4918_s11 + $0x170] sm:$0xff]  ;;  %v2939_v9 = vld [vmem:[%s4918_s11 + $0x178] sm:$0xff] }
 0x745   : > { %3679 = vmatpush3.bf16.msra.mxu1 %v3678_v10  ;;  %v3711_v10 = vpack.c.bf16 %v2939_v9, %v2938_v8  ;;  %v2955_v9 = vld [vmem:[%s4914_s7 + $0x3] ss:$0 sm:$0xff] }
 0x746   : > { %3652 = vmatpush3.bf16.msra.mxu0 %v3651_v12  ;;  %3680 = vmatprep.subr.bf16.mxu1 %v3971_v2  ;;  %v2909_v12 = vld [vmem:[%s4912_s5 + $0x58] sm:$0xff] }
 0x747   : > { %3653 = vmatprep.subr.bf16.mxu0 %v3971_v2 }
 0x814   : > { %v1071_v59 = vpop.f32.mrb[2].mxu0 }
 0x815   : > { %v1072_v60 = vadd.f32 %v2871_v58, %v1071_v59  ;;  %v3316_v61 = vpop.f32.mrb[3].mxu0  ;;  %v2901_v59 = vld [vmem:[%s4919_s12 + $0x1] ss:$0 sm:$0xff] }
 0x817   : > { %v1075_v62 = vadd.f32 %v1072_v60, %v988_v57 }
 0x819   : > { %v1080_v63 = vsel %vm630_vm2, %v1075_v62, 0.0 }
 0x81a   : > { %1081 = vadd.xlane.f32.xlu0 %v1080_v63 }
 0x8a7   : > { %v1082_v0 = vpop.xlane.xlu0 %1081 }
 0x8a8   : > { %v1083_v1 = vmul.f32 0.03125, %v1082_v0 }
 0x8aa   : > { %v1084_v3 = vsub.f32 %v1075_v62, %v1083_v1 }
 0x8ac   : > { %v1085_v5 = vmul.f32 %v1084_v3, %v1084_v3 }
 0x8ae   : > { %v1086_v6 = vsel %vm630_vm2, %v1085_v5, 0.0 }
 0x8af   : > { %1087 = vadd.xlane.f32.xlu1 %v1086_v6 }
 0x93c   : > { %v1088_v13 = vpop.xlane.xlu1 %1087 }
 0x93d   : > { %v1089_v14 = vmul.f32 0.03125, %v1088_v13  ;;  %v3681_v13 = vpack.c.bf16 %v2909_v12, %v2908_v11  ;;  %v2922_v11 = vld [vmem:[%s4917_s10 + $0x2] ss:$0 sm:$0xff] }
 0x93f   : > { %v1090_v15 = vadd.f32 1e-05, %v1089_v14  ;;  %3682 = vmatpush3.bf16.msra.mxu1 %v3681_v13 }
 0x940   : > { %3683 = vmatprep.subr.bf16.mxu1 %v3971_v2 }
 0x941   : > { %3877 = vrsqrt.f32 %v1090_v15 }
 0x94b   : > { %v3878_v16 = vpop.eup %3877 }
 0x94c   : > { %v1092_v18 = vmul.f32 %v3878_v16, %v1084_v3 }
 0x94e   : > { %v1099_v22 = vmul.f32 %v2875_v17, %v1092_v18  ;;  %v2904_v18 = vld [vmem:[%s4920_s13 + $0x1] ss:$0 sm:$0xff] }
 0x950   : > { %v1106_v24 = vadd.f32 %v2876_v21, %v1099_v22 }
 0x952   : > { %3326 = vmatmul.mubr.msk.f32.vlgmr.msra.gmra.mrb[4].mxu0 %vm630_vm2, %v1106_v24 }
 0x953   : > { %3655 = vmatpush3.bf16.msra.mxu0 %v3654_v23  ;;  %3360 = vmatprep.mubr.msk.f32.mxu0 %vm3972_vm0, %v3973_v4  ;;  %v2911_v23 = vld [vmem:[%s4913_s6 + $0x2] ss:$0 sm:$0xff] }
 0x954   : > { %3656 = vmatprep.subr.bf16.mxu0 %v3971_v2 }
 0x957   : > { %3658 = vmatpush3.bf16.msra.mxu0 %v3657_v27 }
 0x958   : > { %3659 = vmatprep.subr.bf16.mxu0 %v3971_v2 }
 0x95b   : > { %3661 = vmatpush3.bf16.msra.mxu0 %v3660_v30 }
 0x95c   : > { %3662 = vmatprep.subr.bf16.mxu0 %v3971_v2 }
 0x95f   : > { %3664 = vmatpush3.bf16.msra.mxu0 %v3663_v33 }
 0x960   : > { %3665 = vmatprep.subr.bf16.mxu0 %v3971_v2 }
 0x963   : > { %3667 = vmatpush3.bf16.msra.mxu0 %v3666_v36  ;;  %v3684_v36 = vpack.c.bf16 %v2918_v35, %v2917_v34  ;;  %v2946_v35 = vld [vmem:[%s4912_s5 + $0x60] sm:$0xff] }
 0x964   : > { %3668 = vmatprep.subr.bf16.mxu0 %v3971_v2 }
 0x967   : > { %3670 = vmatpush3.bf16.msra.mxu0 %v3669_v39  ;;  %v3687_v39 = vpack.c.bf16 %v2920_v38, %v2919_v37  ;;  %v2948_v38 = vld [vmem:[%s4912_s5 + $0x70] sm:$0xff] }
 0x968   : > { %3671 = vmatprep.subr.bf16.mxu0 %v3971_v2 }
 0x96b   : > { %3673 = vmatpush3.bf16.msra.mxu0 %v3672_v42 }
 0x96c   : > { %3674 = vmatprep.subr.bf16.mxu0 %v3971_v2 }
 0x96f   : > { %3676 = vmatpush3.bf16.msra.mxu0 %v3675_v45 }
 0x970   : > { %3713 = vmatprep.subr.bf16.mxu0 %v3971_v2 }
 0xa25   : > { %v1189_v47 = vpop.f32.mrb[4].mxu0 }
 0xa26   : > { %v1190_v48 = vadd.f32 %v2882_v46, %v1189_v47  ;;  %v3327_v49 = vpop.f32.mrb[5].mxu0  ;;  %v2924_v46 = vld [vmem:[%s4918_s11 + $0x100] sm:$0xff]  ;;  %v2925_v47 = vld [vmem:[%s4918_s11 + $0x108] sm:$0xff] }
 0xa28   : > { %v1194_v50 = vmul.f32 %v1190_v48, %v1190_v48  ;;  %v1193_v56 = vmul.f32 0.5, %v1190_v48 }
 0xa2a   : > { %v1195_v51 = vmul.f32 %v1194_v50, %v1190_v48  ;;  %v3690_v50 = vpack.c.bf16 %v2925_v47, %v2924_v46  ;;  %v2945_v47 = vld [vmem:[%s4921_s14 + $0x2] ss:$0 sm:$0xff] }
 0xa2c   : > { %v1196_v52 = vmul.f32 0.044715, %v1195_v51 }
 0xa2e   : > { %v1197_v53 = vadd.f32 %v1196_v52, %v1190_v48  ;;  %v2916_v48 = vld [vmem:[%s4915_s8 + $0x2] ss:$0 sm:$0xff]  ;;  %v2926_v52 = vld [vmem:[%s4918_s11 + $0x110] sm:$0xff] }
 0xa30   : > { %v1198_v54 = vmul.f32 0.7978846, %v1197_v53  ;;  %v2927_v53 = vld [vmem:[%s4918_s11 + $0x118] sm:$0xff] }
 0xa32   : > { %3879 = vtanh.f32 %v1198_v54  ;;  %v3693_v54 = vpack.c.bf16 %v2927_v53, %v2926_v52 }
 0xa3c   : > { %v3880_v55 = vpop.eup %3879 }
 0xa3d   : > { %v1200_v57 = vadd.f32 1.0, %v3880_v55  ;;  %v2928_v55 = vld [vmem:[%s4918_s11 + $0x120] sm:$0xff] }
 0xa3f   : > { %v1201_v58 = vmul.f32 %v1200_v57, %v1193_v56  ;;  %v2929_v56 = vld [vmem:[%s4918_s11 + $0x128] sm:$0xff] }
 0xa40   : > { %v3696_v57 = vpack.c.bf16 %v2929_v56, %v2928_v55 }
 0xa41   : > { %3361 = vmatmul.mubr.f32.vlgmr.msra.gmra.mrb[6].mxu0 %v1201_v58  ;;  %v2930_v58 = vld [vmem:[%s4918_s11 + $0x130] sm:$0xff] }
 0xa42   : > { %3428 = vmatprep.mubr.msk.f32.mxu0 %vm3972_vm0, %v3973_v4 }
 0xb14   : > { %v1293_v60 = vpop.f32.mrb[6].mxu0 }
 0xb15   : > { %v1294_v61 = vadd.f32 %v2901_v59, %v1293_v60  ;;  %v3362_v62 = vpop.f32.mrb[7].mxu0  ;;  %v2931_v59 = vld [vmem:[%s4918_s11 + $0x138] sm:$0xff] }
 0xb16   : > { %v3699_v60 = vpack.c.bf16 %v2931_v59, %v2930_v58  ;;  %v2933_v62 = vld [vmem:[%s4918_s11 + $0x148] sm:$0xff] }
 0xb17   : > { %v1297_v63 = vadd.f32 %v1294_v61, %v1106_v24  ;;  %v2932_v61 = vld [vmem:[%s4918_s11 + $0x140] sm:$0xff] }
 0xb19   : > { %v1302_v0 = vsel %vm630_vm2, %v1297_v63, 0.0 }
 0xb1a   : > { %1303 = vadd.xlane.f32.xlu0 %v1302_v0  ;;  %v2934_v0 = vld [vmem:[%s4918_s11 + $0x150] sm:$0xff] }
 0xba7   : > { %v1304_v1 = vpop.xlane.xlu0 %1303 }
 0xba8   : > { %v1305_v3 = vmul.f32 0.03125, %v1304_v1  ;;  %v2935_v1 = vld [vmem:[%s4918_s11 + $0x158] sm:$0xff] }
 0xbaa   : > { %v1306_v5 = vsub.f32 %v1297_v63, %v1305_v3  ;;  %v3702_v63 = vpack.c.bf16 %v2933_v62, %v2932_v61  ;;  %v3705_v3 = vpack.c.bf16 %v2935_v1, %v2934_v0  ;;  %v2957_v61 = vld [vmem:[%s4916_s9 + $0x60] sm:$0xff]  ;;  %v2958_v62 = vld [vmem:[%s4916_s9 + $0x68] sm:$0xff]  ;;  %v2959_v0 = vld [vmem:[%s4916_s9 + $0x70] sm:$0xff] }
 0xbab   : > { %v2960_v1 = vld [vmem:[%s4916_s9 + $0x78] sm:$0xff] }
 0xbac   : > { %v1307_v6 = vmul.f32 %v1306_v5, %v1306_v5 }
 0xbae   : > { %v1308_v7 = vsel %vm630_vm2, %v1307_v6, 0.0  ;;  %v2937_v6 = vld [vmem:[%s4918_s11 + $0x168] sm:$0xff] }
 0xbaf   : > { %1309 = vadd.xlane.f32.xlu1 %v1308_v7 }
 0xc3c   : > { %v1310_v14 = vpop.xlane.xlu1 %1309 }
 0xc3d   : > { %v1311_v15 = vmul.f32 0.03125, %v1310_v14 }
 0xc3f   : > { %v1312_v16 = vadd.f32 1e-05, %v1311_v15 }
 0xc41   : > { %3881 = vrsqrt.f32 %v1312_v16 }
 0xc4b   : > { %v3882_v17 = vpop.eup %3881 }
 0xc4c   : > { %v1314_v19 = vmul.f32 %v3882_v17, %v1306_v5  ;;  %v2936_v5 = vld [vmem:[%s4918_s11 + $0x160] sm:$0xff] }
 0xc4d   : > { %v3708_v7 = vpack.c.bf16 %v2937_v6, %v2936_v5 }
 0xc4e   : > { %v1321_v21 = vmul.f32 %v2904_v18, %v1314_v19 }
 0xc50   : > { %v1328_v22 = vadd.f32 %v2905_v20, %v1321_v21 }
 0xc52   : > { %3372 = vmatmul.mubr.msk.f32.vlgmr.msra.gmra.mrb[6].mxu1 %vm630_vm2, %v1328_v22 }
 0xc53   : > { %3382 = vmatprep.mubr.msk.f32.mxu1 %vm3972_vm0, %v3973_v4  ;;  %3685 = vmatpush3.bf16.msra.mxu1 %v3684_v36  ;;  %v2947_v36 = vld [vmem:[%s4912_s5 + $0x68] sm:$0xff] }
 0xc54   : > { %3686 = vmatprep.subr.bf16.mxu1 %v3971_v2  ;;  %v3714_v37 = vpack.c.bf16 %v2947_v36, %v2946_v35  ;;  %v2978_v35 = vld [vmem:[%s4918_s11 + $0x1f0] sm:$0xff]  ;;  %v2979_v36 = vld [vmem:[%s4918_s11 + $0x1f8] sm:$0xff] }
 0xc56   : > { %3715 = vmatpush3.bf16.msra.mxu0 %v3714_v37  ;;  %v3747_v37 = vpack.c.bf16 %v2979_v36, %v2978_v35  ;;  %v2995_v36 = vld [vmem:[%s4914_s7 + $0x4] ss:$0 sm:$0xff] }
 0xc57   : > { %3688 = vmatpush3.bf16.msra.mxu1 %v3687_v39  ;;  %3716 = vmatprep.subr.bf16.mxu0 %v3971_v2  ;;  %v2949_v39 = vld [vmem:[%s4912_s5 + $0x78] sm:$0xff] }
 0xc58   : > { %3689 = vmatprep.subr.bf16.mxu1 %v3971_v2 }
 0xd25   : > { %v1411_v24 = vpop.f32.mrb[6].mxu1 }
 0xd26   : > { %v1412_v25 = vadd.f32 %v2911_v23, %v1411_v24  ;;  %v3373_v26 = vpop.f32.mrb[7].mxu1  ;;  %v2941_v24 = vld [vmem:[%s4919_s12 + $0x2] ss:$0 sm:$0xff] }
 0xd28   : > { %v1415_v27 = vadd.f32 %v1412_v25, %v1328_v22 }
 0xd2a   : > { %v1420_v28 = vsel %vm630_vm2, %v1415_v27, 0.0 }
 0xd2b   : > { %1421 = vadd.xlane.f32.xlu0 %v1420_v28 }
 0xdb8   : > { %v1422_v29 = vpop.xlane.xlu0 %1421 }
 0xdb9   : > { %v1423_v30 = vmul.f32 0.03125, %v1422_v29 }
 0xdbb   : > { %v1424_v31 = vsub.f32 %v1415_v27, %v1423_v30 }
 0xdbd   : > { %v1425_v32 = vmul.f32 %v1424_v31, %v1424_v31 }
 0xdbf   : > { %v1426_v33 = vsel %vm630_vm2, %v1425_v32, 0.0 }
 0xdc0   : > { %1427 = vadd.xlane.f32.xlu1 %v1426_v33 }
 0xe4d   : > { %v1428_v40 = vpop.xlane.xlu1 %1427 }
 0xe4e   : > { %v1429_v41 = vmul.f32 0.03125, %v1428_v40  ;;  %v3717_v40 = vpack.c.bf16 %v2949_v39, %v2948_v38  ;;  %v2962_v38 = vld [vmem:[%s4917_s10 + $0x3] ss:$0 sm:$0xff] }
 0xe50   : > { %v1430_v42 = vadd.f32 1e-05, %v1429_v41  ;;  %3718 = vmatpush3.bf16.msra.mxu0 %v3717_v40 }
 0xe51   : > { %3719 = vmatprep.subr.bf16.mxu0 %v3971_v2 }
 0xe52   : > { %3883 = vrsqrt.f32 %v1430_v42 }
 0xe5c   : > { %v3884_v43 = vpop.eup %3883 }
 0xe5d   : > { %v1432_v45 = vmul.f32 %v3884_v43, %v1424_v31 }
 0xe5f   : > { %v1439_v49 = vmul.f32 %v2915_v44, %v1432_v45  ;;  %v2944_v45 = vld [vmem:[%s4920_s13 + $0x2] ss:$0 sm:$0xff] }
 0xe61   : > { %v1446_v51 = vadd.f32 %v2916_v48, %v1439_v49 }
 0xe63   : > { %3383 = vmatmul.mubr.msk.f32.vlgmr.msra.gmra.mrb[8].mxu1 %vm630_vm2, %v1446_v51 }
 0xe64   : > { %3691 = vmatpush3.bf16.msra.mxu1 %v3690_v50  ;;  %3417 = vmatprep.mubr.msk.f32.mxu1 %vm3972_vm0, %v3973_v4  ;;  %v2951_v50 = vld [vmem:[%s4913_s6 + $0x3] ss:$0 sm:$0xff] }
 0xe65   : > { %3692 = vmatprep.subr.bf16.mxu1 %v3971_v2 }
 0xe68   : > { %3694 = vmatpush3.bf16.msra.mxu1 %v3693_v54 }
 0xe69   : > { %3695 = vmatprep.subr.bf16.mxu1 %v3971_v2 }
 0xe6c   : > { %3697 = vmatpush3.bf16.msra.mxu1 %v3696_v57 }
 0xe6d   : > { %3698 = vmatprep.subr.bf16.mxu1 %v3971_v2 }
 0xe70   : > { %3700 = vmatpush3.bf16.msra.mxu1 %v3699_v60 }
 0xe71   : > { %3701 = vmatprep.subr.bf16.mxu1 %v3971_v2 }
 0xe74   : > { %3703 = vmatpush3.bf16.msra.mxu1 %v3702_v63  ;;  %v3720_v63 = vpack.c.bf16 %v2958_v62, %v2957_v61  ;;  %v2986_v62 = vld [vmem:[%s4912_s5 + $0x80] sm:$0xff] }
 0xe75   : > { %3704 = vmatprep.subr.bf16.mxu1 %v3971_v2 }
 0xe78   : > { %3706 = vmatpush3.bf16.msra.mxu1 %v3705_v3  ;;  %v3723_v3 = vpack.c.bf16 %v2960_v1, %v2959_v0  ;;  %v2988_v1 = vld [vmem:[%s4912_s5 + $0x90] sm:$0xff] }
 0xe79   : > { %3707 = vmatprep.subr.bf16.mxu1 %v3971_v2 }
 0xe7c   : > { %3709 = vmatpush3.bf16.msra.mxu1 %v3708_v7 }
 0xe7d   : > { %3710 = vmatprep.subr.bf16.mxu1 %v3971_v2 }
 0xe80   : > { %3712 = vmatpush3.bf16.msra.mxu1 %v3711_v10 }
 0xe81   : > { %3749 = vmatprep.subr.bf16.mxu1 %v3971_v2 }
 0xf36   : > { %v1529_v12 = vpop.f32.mrb[8].mxu1 }
 0xf37   : > { %v1530_v13 = vadd.f32 %v2922_v11, %v1529_v12  ;;  %v3384_v14 = vpop.f32.mrb[9].mxu1  ;;  %v2964_v11 = vld [vmem:[%s4918_s11 + $0x180] sm:$0xff]  ;;  %v2965_v12 = vld [vmem:[%s4918_s11 + $0x188] sm:$0xff] }
 0xf39   : > { %v1534_v15 = vmul.f32 %v1530_v13, %v1530_v13  ;;  %v1533_v21 = vmul.f32 0.5, %v1530_v13 }
 0xf3b   : > { %v1535_v16 = vmul.f32 %v1534_v15, %v1530_v13  ;;  %v3726_v15 = vpack.c.bf16 %v2965_v12, %v2964_v11  ;;  %v2985_v12 = vld [vmem:[%s4921_s14 + $0x3] ss:$0 sm:$0xff] }
 0xf3d   : > { %v1536_v17 = vmul.f32 0.044715, %v1535_v16 }
 0xf3f   : > { %v1537_v18 = vadd.f32 %v1536_v17, %v1530_v13  ;;  %v2956_v13 = vld [vmem:[%s4915_s8 + $0x3] ss:$0 sm:$0xff]  ;;  %v2966_v17 = vld [vmem:[%s4918_s11 + $0x190] sm:$0xff] }
 0xf41   : > { %v1538_v19 = vmul.f32 0.7978846, %v1537_v18  ;;  %v2967_v18 = vld [vmem:[%s4918_s11 + $0x198] sm:$0xff] }
 0xf43   : > { %3885 = vtanh.f32 %v1538_v19  ;;  %v3729_v19 = vpack.c.bf16 %v2967_v18, %v2966_v17 }
 0xf4d   : > { %v3886_v20 = vpop.eup %3885 }
 0xf4e   : > { %v1540_v22 = vadd.f32 1.0, %v3886_v20  ;;  %v2968_v20 = vld [vmem:[%s4918_s11 + $0x1a0] sm:$0xff] }
 0xf50   : > { %v1541_v23 = vmul.f32 %v1540_v22, %v1533_v21  ;;  %v2969_v21 = vld [vmem:[%s4918_s11 + $0x1a8] sm:$0xff] }
 0xf51   : > { %v3732_v22 = vpack.c.bf16 %v2969_v21, %v2968_v20 }
 0xf52   : > { %3418 = vmatmul.mubr.f32.vlgmr.msra.gmra.mrb[10].mxu1 %v1541_v23  ;;  %v2970_v23 = vld [vmem:[%s4918_s11 + $0x1b0] sm:$0xff] }
 0xf53   : > { %3485 = vmatprep.mubr.msk.f32.mxu1 %vm3972_vm0, %v3973_v4 }
0x1025   : > { %v1633_v25 = vpop.f32.mrb[10].mxu1 }
0x1026   : > { %v1634_v26 = vadd.f32 %v2941_v24, %v1633_v25  ;;  %v3419_v27 = vpop.f32.mrb[11].mxu1  ;;  %v2971_v24 = vld [vmem:[%s4918_s11 + $0x1b8] sm:$0xff] }
0x1027   : > { %v3735_v25 = vpack.c.bf16 %v2971_v24, %v2970_v23  ;;  %v2973_v27 = vld [vmem:[%s4918_s11 + $0x1c8] sm:$0xff] }
0x1028   : > { %v1637_v28 = vadd.f32 %v1634_v26, %v1446_v51  ;;  %v2972_v26 = vld [vmem:[%s4918_s11 + $0x1c0] sm:$0xff] }
0x102a   : > { %v1642_v29 = vsel %vm630_vm2, %v1637_v28, 0.0 }
0x102b   : > { %1643 = vadd.xlane.f32.xlu0 %v1642_v29  ;;  %v2974_v29 = vld [vmem:[%s4918_s11 + $0x1d0] sm:$0xff] }
0x10b8   : > { %v1644_v30 = vpop.xlane.xlu0 %1643 }
0x10b9   : > { %v1645_v31 = vmul.f32 0.03125, %v1644_v30  ;;  %v2975_v30 = vld [vmem:[%s4918_s11 + $0x1d8] sm:$0xff] }
0x10bb   : > { %v1646_v32 = vsub.f32 %v1637_v28, %v1645_v31  ;;  %v3738_v28 = vpack.c.bf16 %v2973_v27, %v2972_v26  ;;  %v3741_v31 = vpack.c.bf16 %v2975_v30, %v2974_v29  ;;  %v2997_v26 = vld [vmem:[%s4916_s9 + $0x80] sm:$0xff]  ;;  %v2998_v27 = vld [vmem:[%s4916_s9 + $0x88] sm:$0xff]  ;;  %v2999_v29 = vld [vmem:[%s4916_s9 + $0x90] sm:$0xff] }
0x10bc   : > { %v3000_v30 = vld [vmem:[%s4916_s9 + $0x98] sm:$0xff] }
0x10bd   : > { %v1647_v33 = vmul.f32 %v1646_v32, %v1646_v32 }
0x10bf   : > { %v1648_v34 = vsel %vm630_vm2, %v1647_v33, 0.0  ;;  %v2977_v33 = vld [vmem:[%s4918_s11 + $0x1e8] sm:$0xff] }
0x10c0   : > { %1649 = vadd.xlane.f32.xlu1 %v1648_v34 }
0x114d   : > { %v1650_v41 = vpop.xlane.xlu1 %1649 }
0x114e   : > { %v1651_v42 = vmul.f32 0.03125, %v1650_v41 }
0x1150   : > { %v1652_v43 = vadd.f32 1e-05, %v1651_v42 }
0x1152   : > { %3887 = vrsqrt.f32 %v1652_v43 }
0x115c   : > { %v3888_v44 = vpop.eup %3887 }
0x115d   : > { %v1654_v46 = vmul.f32 %v3888_v44, %v1646_v32  ;;  %v2976_v32 = vld [vmem:[%s4918_s11 + $0x1e0] sm:$0xff] }
0x115e   : > { %v3744_v34 = vpack.c.bf16 %v2977_v33, %v2976_v32 }
0x115f   : > { %v1661_v48 = vmul.f32 %v2944_v45, %v1654_v46 }
0x1161   : > { %v1668_v49 = vadd.f32 %v2945_v47, %v1661_v48 }
0x1163   : > { %3429 = vmatmul.mubr.msk.f32.vlgmr.msra.gmra.mrb[8].mxu0 %vm630_vm2, %v1668_v49 }
0x1164   : > { %3439 = vmatprep.mubr.msk.f32.mxu0 %vm3972_vm0, %v3973_v4  ;;  %3721 = vmatpush3.bf16.msra.mxu0 %v3720_v63  ;;  %v2987_v63 = vld [vmem:[%s4912_s5 + $0x88] sm:$0xff] }
0x1165   : > { %3722 = vmatprep.subr.bf16.mxu0 %v3971_v2  ;;  %v3750_v0 = vpack.c.bf16 %v2987_v63, %v2986_v62  ;;  %v3018_v62 = vld [vmem:[%s4918_s11 + $0x270] sm:$0xff]  ;;  %v3019_v63 = vld [vmem:[%s4918_s11 + $0x278] sm:$0xff] }
0x1167   : > { %3751 = vmatpush3.bf16.msra.mxu1 %v3750_v0  ;;  %v3783_v0 = vpack.c.bf16 %v3019_v63, %v3018_v62  ;;  %v3035_v63 = vld [vmem:[%s4914_s7 + $0x5] ss:$0 sm:$0xff] }
0x1168   : > { %3724 = vmatpush3.bf16.msra.mxu0 %v3723_v3  ;;  %3752 = vmatprep.subr.bf16.mxu1 %v3971_v2  ;;  %v2989_v3 = vld [vmem:[%s4912_s5 + $0x98] sm:$0xff] }
0x1169   : > { %3725 = vmatprep.subr.bf16.mxu0 %v3971_v2 }
0x1236   : > { %v1751_v51 = vpop.f32.mrb[8].mxu0 }
0x1237   : > { %v1752_v52 = vadd.f32 %v2951_v50, %v1751_v51  ;;  %v3430_v53 = vpop.f32.mrb[9].mxu0  ;;  %v2981_v51 = vld [vmem:[%s4919_s12 + $0x3] ss:$0 sm:$0xff] }
0x1239   : > { %v1755_v54 = vadd.f32 %v1752_v52, %v1668_v49 }
0x123b   : > { %v1760_v55 = vsel %vm630_vm2, %v1755_v54, 0.0 }
0x123c   : > { %1761 = vadd.xlane.f32.xlu0 %v1760_v55 }
0x12c9   : > { %v1762_v56 = vpop.xlane.xlu0 %1761 }
0x12ca   : > { %v1763_v57 = vmul.f32 0.03125, %v1762_v56 }
0x12cc   : > { %v1764_v58 = vsub.f32 %v1755_v54, %v1763_v57 }
0x12ce   : > { %v1765_v59 = vmul.f32 %v1764_v58, %v1764_v58 }
0x12d0   : > { %v1766_v60 = vsel %vm630_vm2, %v1765_v59, 0.0 }
0x12d1   : > { %1767 = vadd.xlane.f32.xlu1 %v1766_v60 }
0x135e   : > { %v1768_v5 = vpop.xlane.xlu1 %1767 }
0x135f   : > { %v1769_v6 = vmul.f32 0.03125, %v1768_v5  ;;  %v3753_v5 = vpack.c.bf16 %v2989_v3, %v2988_v1  ;;  %v3002_v1 = vld [vmem:[%s4917_s10 + $0x4] ss:$0 sm:$0xff] }
0x1361   : > { %v1770_v7 = vadd.f32 1e-05, %v1769_v6  ;;  %3754 = vmatpush3.bf16.msra.mxu1 %v3753_v5 }
0x1362   : > { %3755 = vmatprep.subr.bf16.mxu1 %v3971_v2 }
0x1363   : > { %3889 = vrsqrt.f32 %v1770_v7 }
0x136d   : > { %v3890_v8 = vpop.eup %3889 }
0x136e   : > { %v1772_v10 = vmul.f32 %v3890_v8, %v1764_v58 }
0x1370   : > { %v1779_v14 = vmul.f32 %v2955_v9, %v1772_v10  ;;  %v2984_v10 = vld [vmem:[%s4920_s13 + $0x3] ss:$0 sm:$0xff] }
0x1372   : > { %v1786_v16 = vadd.f32 %v2956_v13, %v1779_v14 }
0x1374   : > { %3440 = vmatmul.mubr.msk.f32.vlgmr.msra.gmra.mrb[10].mxu0 %vm630_vm2, %v1786_v16 }
0x1375   : > { %3727 = vmatpush3.bf16.msra.mxu0 %v3726_v15  ;;  %3474 = vmatprep.mubr.msk.f32.mxu0 %vm3972_vm0, %v3973_v4  ;;  %v2991_v15 = vld [vmem:[%s4913_s6 + $0x4] ss:$0 sm:$0xff] }
0x1376   : > { %3728 = vmatprep.subr.bf16.mxu0 %v3971_v2 }
0x1379   : > { %3730 = vmatpush3.bf16.msra.mxu0 %v3729_v19 }
0x137a   : > { %3731 = vmatprep.subr.bf16.mxu0 %v3971_v2 }
0x137d   : > { %3733 = vmatpush3.bf16.msra.mxu0 %v3732_v22 }
0x137e   : > { %3734 = vmatprep.subr.bf16.mxu0 %v3971_v2 }
0x1381   : > { %3736 = vmatpush3.bf16.msra.mxu0 %v3735_v25 }
0x1382   : > { %3737 = vmatprep.subr.bf16.mxu0 %v3971_v2 }
0x1385   : > { %3739 = vmatpush3.bf16.msra.mxu0 %v3738_v28  ;;  %v3756_v28 = vpack.c.bf16 %v2998_v27, %v2997_v26  ;;  %v3026_v27 = vld [vmem:[%s4912_s5 + $0xa0] sm:$0xff] }
0x1386   : > { %3740 = vmatprep.subr.bf16.mxu0 %v3971_v2 }
0x1389   : > { %3742 = vmatpush3.bf16.msra.mxu0 %v3741_v31  ;;  %v3759_v31 = vpack.c.bf16 %v3000_v30, %v2999_v29  ;;  %v3028_v30 = vld [vmem:[%s4912_s5 + $0xb0] sm:$0xff] }
0x138a   : > { %3743 = vmatprep.subr.bf16.mxu0 %v3971_v2 }
0x138d   : > { %3745 = vmatpush3.bf16.msra.mxu0 %v3744_v34 }
0x138e   : > { %3746 = vmatprep.subr.bf16.mxu0 %v3971_v2 }
0x1391   : > { %3748 = vmatpush3.bf16.msra.mxu0 %v3747_v37 }
0x1392   : > { %3785 = vmatprep.subr.bf16.mxu0 %v3971_v2 }
0x1447   : > { %v1869_v39 = vpop.f32.mrb[10].mxu0 }
0x1448   : > { %v1870_v40 = vadd.f32 %v2962_v38, %v1869_v39  ;;  %v3441_v41 = vpop.f32.mrb[11].mxu0  ;;  %v3004_v38 = vld [vmem:[%s4918_s11 + $0x200] sm:$0xff]  ;;  %v3005_v39 = vld [vmem:[%s4918_s11 + $0x208] sm:$0xff] }
0x144a   : > { %v1874_v42 = vmul.f32 %v1870_v40, %v1870_v40  ;;  %v1873_v48 = vmul.f32 0.5, %v1870_v40 }
0x144c   : > { %v1875_v43 = vmul.f32 %v1874_v42, %v1870_v40  ;;  %v3762_v42 = vpack.c.bf16 %v3005_v39, %v3004_v38  ;;  %v3025_v39 = vld [vmem:[%s4921_s14 + $0x4] ss:$0 sm:$0xff] }
0x144e   : > { %v1876_v44 = vmul.f32 0.044715, %v1875_v43 }
0x1450   : > { %v1877_v45 = vadd.f32 %v1876_v44, %v1870_v40  ;;  %v2996_v40 = vld [vmem:[%s4915_s8 + $0x4] ss:$0 sm:$0xff]  ;;  %v3006_v44 = vld [vmem:[%s4918_s11 + $0x210] sm:$0xff] }
0x1452   : > { %v1878_v46 = vmul.f32 0.7978846, %v1877_v45  ;;  %v3007_v45 = vld [vmem:[%s4918_s11 + $0x218] sm:$0xff] }
0x1454   : > { %3891 = vtanh.f32 %v1878_v46  ;;  %v3765_v46 = vpack.c.bf16 %v3007_v45, %v3006_v44 }
0x145e   : > { %v3892_v47 = vpop.eup %3891 }
0x145f   : > { %v1880_v49 = vadd.f32 1.0, %v3892_v47  ;;  %v3008_v47 = vld [vmem:[%s4918_s11 + $0x220] sm:$0xff] }
0x1461   : > { %v1881_v50 = vmul.f32 %v1880_v49, %v1873_v48  ;;  %v3009_v48 = vld [vmem:[%s4918_s11 + $0x228] sm:$0xff] }
0x1462   : > { %v3768_v49 = vpack.c.bf16 %v3009_v48, %v3008_v47 }
0x1463   : > { %3475 = vmatmul.mubr.f32.vlgmr.msra.gmra.mrb[12].mxu0 %v1881_v50  ;;  %v3010_v50 = vld [vmem:[%s4918_s11 + $0x230] sm:$0xff] }
0x1464   : > { %3542 = vmatprep.mubr.msk.f32.mxu0 %vm3972_vm0, %v3973_v4 }
0x1536   : > { %v1973_v52 = vpop.f32.mrb[12].mxu0 }
0x1537   : > { %v1974_v53 = vadd.f32 %v2981_v51, %v1973_v52  ;;  %v3476_v54 = vpop.f32.mrb[13].mxu0  ;;  %v3011_v51 = vld [vmem:[%s4918_s11 + $0x238] sm:$0xff] }
0x1538   : > { %v3771_v52 = vpack.c.bf16 %v3011_v51, %v3010_v50  ;;  %v3013_v54 = vld [vmem:[%s4918_s11 + $0x248] sm:$0xff] }
0x1539   : > { %v1977_v55 = vadd.f32 %v1974_v53, %v1786_v16  ;;  %v3012_v53 = vld [vmem:[%s4918_s11 + $0x240] sm:$0xff] }
0x153b   : > { %v1982_v56 = vsel %vm630_vm2, %v1977_v55, 0.0 }
0x153c   : > { %1983 = vadd.xlane.f32.xlu0 %v1982_v56  ;;  %v3014_v56 = vld [vmem:[%s4918_s11 + $0x250] sm:$0xff] }
0x15c9   : > { %v1984_v57 = vpop.xlane.xlu0 %1983 }
0x15ca   : > { %v1985_v58 = vmul.f32 0.03125, %v1984_v57  ;;  %v3015_v57 = vld [vmem:[%s4918_s11 + $0x258] sm:$0xff] }
0x15cc   : > { %v1986_v59 = vsub.f32 %v1977_v55, %v1985_v58  ;;  %v3774_v55 = vpack.c.bf16 %v3013_v54, %v3012_v53  ;;  %v3777_v58 = vpack.c.bf16 %v3015_v57, %v3014_v56  ;;  %v3037_v53 = vld [vmem:[%s4916_s9 + $0xa0] sm:$0xff]  ;;  %v3038_v54 = vld [vmem:[%s4916_s9 + $0xa8] sm:$0xff]  ;;  %v3039_v56 = vld [vmem:[%s4916_s9 + $0xb0] sm:$0xff] }
0x15cd   : > { %v3040_v57 = vld [vmem:[%s4916_s9 + $0xb8] sm:$0xff] }
0x15ce   : > { %v1987_v60 = vmul.f32 %v1986_v59, %v1986_v59 }
0x15d0   : > { %v1988_v61 = vsel %vm630_vm2, %v1987_v60, 0.0  ;;  %v3017_v60 = vld [vmem:[%s4918_s11 + $0x268] sm:$0xff] }
0x15d1   : > { %1989 = vadd.xlane.f32.xlu1 %v1988_v61 }
0x165e   : > { %v1990_v6 = vpop.xlane.xlu1 %1989 }
0x165f   : > { %v1991_v7 = vmul.f32 0.03125, %v1990_v6 }
0x1661   : > { %v1992_v8 = vadd.f32 1e-05, %v1991_v7 }
0x1663   : > { %3893 = vrsqrt.f32 %v1992_v8 }
0x166d   : > { %v3894_v9 = vpop.eup %3893 }
0x166e   : > { %v1994_v11 = vmul.f32 %v3894_v9, %v1986_v59  ;;  %v3016_v59 = vld [vmem:[%s4918_s11 + $0x260] sm:$0xff] }
0x166f   : > { %v3780_v61 = vpack.c.bf16 %v3017_v60, %v3016_v59 }
0x1670   : > { %v2001_v13 = vmul.f32 %v2984_v10, %v1994_v11 }
0x1672   : > { %v2008_v14 = vadd.f32 %v2985_v12, %v2001_v13 }
0x1674   : > { %3486 = vmatmul.mubr.msk.f32.vlgmr.msra.gmra.mrb[12].mxu1 %vm630_vm2, %v2008_v14 }
0x1675   : > { %3496 = vmatprep.mubr.msk.f32.mxu1 %vm3972_vm0, %v3973_v4  ;;  %3757 = vmatpush3.bf16.msra.mxu1 %v3756_v28  ;;  %v3027_v28 = vld [vmem:[%s4912_s5 + $0xa8] sm:$0xff] }
0x1676   : > { %3758 = vmatprep.subr.bf16.mxu1 %v3971_v2  ;;  %v3786_v29 = vpack.c.bf16 %v3027_v28, %v3026_v27  ;;  %v3059_v27 = vld [vmem:[%s4918_s11 + $0x2f8] sm:$0xff] }
0x1678   : > { %3787 = vmatpush3.bf16.msra.mxu0 %v3786_v29  ;;  %v3042_v29 = vld [vmem:[%s4917_s10 + $0x5] ss:$0 sm:$0xff] }
0x1679   : > { %3760 = vmatpush3.bf16.msra.mxu1 %v3759_v31  ;;  %3788 = vmatprep.subr.bf16.mxu0 %v3971_v2  ;;  %v3029_v31 = vld [vmem:[%s4912_s5 + $0xb8] sm:$0xff] }
0x167a   : > { %3761 = vmatprep.subr.bf16.mxu1 %v3971_v2 }
0x1747   : > { %v2091_v16 = vpop.f32.mrb[12].mxu1 }
0x1748   : > { %v2092_v17 = vadd.f32 %v2991_v15, %v2091_v16  ;;  %v3487_v18 = vpop.f32.mrb[13].mxu1  ;;  %v3021_v16 = vld [vmem:[%s4919_s12 + $0x4] ss:$0 sm:$0xff] }
0x174a   : > { %v2095_v19 = vadd.f32 %v2092_v17, %v2008_v14 }
0x174c   : > { %v2100_v20 = vsel %vm630_vm2, %v2095_v19, 0.0 }
0x174d   : > { %2101 = vadd.xlane.f32.xlu0 %v2100_v20 }
0x17da   : > { %v2102_v21 = vpop.xlane.xlu0 %2101 }
0x17db   : > { %v2103_v22 = vmul.f32 0.03125, %v2102_v21 }
0x17dd   : > { %v2104_v23 = vsub.f32 %v2095_v19, %v2103_v22 }
0x17df   : > { %v2105_v24 = vmul.f32 %v2104_v23, %v2104_v23 }
0x17e1   : > { %v2106_v25 = vsel %vm630_vm2, %v2105_v24, 0.0 }
0x17e2   : > { %2107 = vadd.xlane.f32.xlu1 %v2106_v25 }
0x186f   : > { %v2108_v32 = vpop.xlane.xlu1 %2107 }
0x1870   : > { %v2109_v33 = vmul.f32 0.03125, %v2108_v32  ;;  %v3789_v32 = vpack.c.bf16 %v3029_v31, %v3028_v30 }
0x1872   : > { %v2110_v34 = vadd.f32 1e-05, %v2109_v33  ;;  %3790 = vmatpush3.bf16.msra.mxu0 %v3789_v32 }
0x1873   : > { %3791 = vmatprep.subr.bf16.mxu0 %v3971_v2 }
0x1874   : > { %3895 = vrsqrt.f32 %v2110_v34 }
0x187e   : > { %v3896_v35 = vpop.eup %3895 }
0x187f   : > { %v2112_v37 = vmul.f32 %v3896_v35, %v2104_v23 }
0x1881   : > { %v2119_v41 = vmul.f32 %v2995_v36, %v2112_v37  ;;  %v3024_v37 = vld [vmem:[%s4920_s13 + $0x4] ss:$0 sm:$0xff] }
0x1883   : > { %v2126_v43 = vadd.f32 %v2996_v40, %v2119_v41 }
0x1885   : > { %3497 = vmatmul.mubr.msk.f32.vlgmr.msra.gmra.mrb[14].mxu1 %vm630_vm2, %v2126_v43 }
0x1886   : > { %3763 = vmatpush3.bf16.msra.mxu1 %v3762_v42  ;;  %3531 = vmatprep.mubr.msk.f32.mxu1 %vm3972_vm0, %v3973_v4  ;;  %v3031_v42 = vld [vmem:[%s4913_s6 + $0x5] ss:$0 sm:$0xff] }
0x1887   : > { %3764 = vmatprep.subr.bf16.mxu1 %v3971_v2 }
0x188a   : > { %3766 = vmatpush3.bf16.msra.mxu1 %v3765_v46 }
0x188b   : > { %3767 = vmatprep.subr.bf16.mxu1 %v3971_v2 }
0x188e   : > { %3769 = vmatpush3.bf16.msra.mxu1 %v3768_v49 }
0x188f   : > { %3770 = vmatprep.subr.bf16.mxu1 %v3971_v2 }
0x1892   : > { %3772 = vmatpush3.bf16.msra.mxu1 %v3771_v52 }
0x1893   : > { %3773 = vmatprep.subr.bf16.mxu1 %v3971_v2 }
0x1896   : > { %3775 = vmatpush3.bf16.msra.mxu1 %v3774_v55  ;;  %v3792_v55 = vpack.c.bf16 %v3038_v54, %v3037_v53  ;;  %v2689_v53 = vld [vmem:[%s4922_s15] sm:$0xff]  ;;  %v2690_v54 = vld [vmem:[%s4922_s15 + $0x8] sm:$0xff] }
0x1897   : > { %3776 = vmatprep.subr.bf16.mxu1 %v3971_v2 }
0x189a   : > { %3778 = vmatpush3.bf16.msra.mxu1 %v3777_v58  ;;  %v3795_v58 = vpack.c.bf16 %v3040_v57, %v3039_v56  ;;  %v2691_v56 = vld [vmem:[%s4922_s15 + $0x10] sm:$0xff]  ;;  %v2692_v57 = vld [vmem:[%s4922_s15 + $0x18] sm:$0xff] }
0x189b   : > { %3779 = vmatprep.subr.bf16.mxu1 %v3971_v2 }
0x189e   : > { %3781 = vmatpush3.bf16.msra.mxu1 %v3780_v61 }
0x189f   : > { %3782 = vmatprep.subr.bf16.mxu1 %v3971_v2 }
0x18a2   : > { %3784 = vmatpush3.bf16.msra.mxu1 %v3783_v0 }
0x18a3   : > { %3821 = vmatprep.subr.bf16.mxu1 %v3971_v2 }
0x1958   : > { %v2209_v3 = vpop.f32.mrb[14].mxu1 }
0x1959   : > { %v2210_v5 = vadd.f32 %v3002_v1, %v2209_v3  ;;  %v3498_v6 = vpop.f32.mrb[15].mxu1  ;;  %v3044_v1 = vld [vmem:[%s4918_s11 + $0x280] sm:$0xff]  ;;  %v3045_v3 = vld [vmem:[%s4918_s11 + $0x288] sm:$0xff] }
0x195b   : > { %v2214_v7 = vmul.f32 %v2210_v5, %v2210_v5  ;;  %v2213_v13 = vmul.f32 0.5, %v2210_v5 }
0x195d   : > { %v2215_v8 = vmul.f32 %v2214_v7, %v2210_v5  ;;  %v3798_v7 = vpack.c.bf16 %v3045_v3, %v3044_v1 }
0x195f   : > { %v2216_v9 = vmul.f32 0.044715, %v2215_v8 }
0x1961   : > { %v2217_v10 = vadd.f32 %v2216_v9, %v2210_v5  ;;  %v3036_v5 = vld [vmem:[%s4915_s8 + $0x5] ss:$0 sm:$0xff]  ;;  %v3046_v9 = vld [vmem:[%s4918_s11 + $0x290] sm:$0xff] }
0x1963   : > { %v2218_v11 = vmul.f32 0.7978846, %v2217_v10  ;;  %v3047_v10 = vld [vmem:[%s4918_s11 + $0x298] sm:$0xff] }
0x1965   : > { %3897 = vtanh.f32 %v2218_v11  ;;  %v3801_v11 = vpack.c.bf16 %v3047_v10, %v3046_v9 }
0x196f   : > { %v3898_v12 = vpop.eup %3897 }
0x1970   : > { %v2220_v14 = vadd.f32 1.0, %v3898_v12  ;;  %v3048_v12 = vld [vmem:[%s4918_s11 + $0x2a0] sm:$0xff] }
0x1972   : > { %v2221_v15 = vmul.f32 %v2220_v14, %v2213_v13  ;;  %v3050_v14 = vld [vmem:[%s4918_s11 + $0x2b0] sm:$0xff] }
0x1974   : > { %3532 = vmatmul.mubr.f32.vlgmr.msra.gmra.mrb[16].mxu1 %v2221_v15  ;;  %v3051_v15 = vld [vmem:[%s4918_s11 + $0x2b8] sm:$0xff] }
0x1975   : > { %3599 = vmatprep.mubr.msk.f32.mxu1 %vm3972_vm0, %v3973_v4 }
0x1a47   : > { %v2313_v17 = vpop.f32.mrb[16].mxu1 }
0x1a48   : > { %v2314_v18 = vadd.f32 %v3021_v16, %v2313_v17  ;;  %v3533_v19 = vpop.f32.mrb[17].mxu1  ;;  %v3807_v16 = vpack.c.bf16 %v3051_v15, %v3050_v14  ;;  %v3052_v17 = vld [vmem:[%s4918_s11 + $0x2c0] sm:$0xff] }
0x1a4a   : > { %v2317_v20 = vadd.f32 %v2314_v18, %v2126_v43  ;;  %v3053_v18 = vld [vmem:[%s4918_s11 + $0x2c8] sm:$0xff] }
0x1a4b   : > { %v3810_v19 = vpack.c.bf16 %v3053_v18, %v3052_v17 }
0x1a4c   : > { %v2322_v21 = vsel %vm630_vm2, %v2317_v20, 0.0 }
0x1a4d   : > { %2323 = vadd.xlane.f32.xlu0 %v2322_v21  ;;  %v3055_v21 = vld [vmem:[%s4918_s11 + $0x2d8] sm:$0xff] }
0x1ada   : > { %v2324_v22 = vpop.xlane.xlu0 %2323 }
0x1adb   : > { %v2325_v23 = vmul.f32 0.03125, %v2324_v22 }
0x1add   : > { %v2326_v24 = vsub.f32 %v2317_v20, %v2325_v23  ;;  %v3054_v20 = vld [vmem:[%s4918_s11 + $0x2d0] sm:$0xff]  ;;  %v3056_v23 = vld [vmem:[%s4918_s11 + $0x2e0] sm:$0xff] }
0x1ade   : > { %v3813_v22 = vpack.c.bf16 %v3055_v21, %v3054_v20 }
0x1adf   : > { %v2327_v25 = vmul.f32 %v2326_v24, %v2326_v24 }
0x1ae1   : > { %v2328_v26 = vsel %vm630_vm2, %v2327_v25, 0.0 }
0x1ae2   : > { %2329 = vadd.xlane.f32.xlu1 %v2328_v26  ;;  %v3058_v26 = vld [vmem:[%s4918_s11 + $0x2f0] sm:$0xff] }
0x1ae3   : > { %v3819_v28 = vpack.c.bf16 %v3059_v27, %v3058_v26 }
0x1b6f   : > { %v2330_v33 = vpop.xlane.xlu1 %2329 }
0x1b70   : > { %v2331_v34 = vmul.f32 0.03125, %v2330_v33 }
0x1b72   : > { %v2332_v35 = vadd.f32 1e-05, %v2331_v34 }
0x1b74   : > { %3899 = vrsqrt.f32 %v2332_v35 }
0x1b7e   : > { %v3900_v36 = vpop.eup %3899 }
0x1b7f   : > { %v2334_v38 = vmul.f32 %v3900_v36, %v2326_v24  ;;  %v3057_v24 = vld [vmem:[%s4918_s11 + $0x2e8] sm:$0xff] }
0x1b80   : > { %v3816_v25 = vpack.c.bf16 %v3057_v24, %v3056_v23 }
0x1b81   : > { %v2341_v40 = vmul.f32 %v3024_v37, %v2334_v38 }
0x1b83   : > { %v2348_v41 = vadd.f32 %v3025_v39, %v2341_v40 }
0x1b85   : > { %3543 = vmatmul.mubr.msk.f32.vlgmr.msra.gmra.mrb[14].mxu0 %vm630_vm2, %v2348_v41 }
0x1b86   : > { %3553 = vmatprep.mubr.msk.f32.mxu0 %vm3972_vm0, %v3973_v4  ;;  %3793 = vmatpush3.bf16.msra.mxu0 %v3792_v55  ;;  %v3822_v55 = vpack.c.bf16 %v2690_v54, %v2689_v53 }
0x1b87   : > { %3794 = vmatprep.subr.bf16.mxu0 %v3971_v2 }
0x1b88   : > { %3823 = vmatpush3.bf16.msra.mxu1 %v3822_v55 }
0x1b89   : > { %3824 = vmatprep.subr.bf16.mxu1 %v3971_v2 }
0x1b8a   : > { %3796 = vmatpush3.bf16.msra.mxu0 %v3795_v58  ;;  %v3825_v58 = vpack.c.bf16 %v2692_v57, %v2691_v56 }
0x1b8b   : > { %3797 = vmatprep.subr.bf16.mxu0 %v3971_v2 }
0x1b8c   : > { %3826 = vmatpush3.bf16.msra.mxu1 %v3825_v58 }
0x1c58   : > { %v2431_v43 = vpop.f32.mrb[14].mxu0 }
0x1c59   : > { %v2432_v44 = vadd.f32 %v3031_v42, %v2431_v43  ;;  %v3544_v45 = vpop.f32.mrb[15].mxu0  ;;  %v3061_v42 = vld [vmem:[%s4919_s12 + $0x5] ss:$0 sm:$0xff] }
0x1c5b   : > { %v2435_v46 = vadd.f32 %v2432_v44, %v2348_v41 }
0x1c5d   : > { %v2440_v47 = vsel %vm630_vm2, %v2435_v46, 0.0 }
0x1c5e   : > { %2441 = vadd.xlane.f32.xlu0 %v2440_v47 }
0x1ceb   : > { %v2442_v48 = vpop.xlane.xlu0 %2441 }
0x1cec   : > { %v2443_v49 = vmul.f32 0.03125, %v2442_v48 }
0x1cee   : > { %v2444_v50 = vsub.f32 %v2435_v46, %v2443_v49 }
0x1cf0   : > { %v2445_v51 = vmul.f32 %v2444_v50, %v2444_v50 }
0x1cf2   : > { %v2446_v52 = vsel %vm630_vm2, %v2445_v51, 0.0 }
0x1cf3   : > { %2447 = vadd.xlane.f32.xlu1 %v2446_v52 }
0x1d80   : > { %v2448_v59 = vpop.xlane.xlu1 %2447 }
0x1d81   : > { %v2449_v60 = vmul.f32 0.03125, %v2448_v59 }
0x1d83   : > { %v2450_v61 = vadd.f32 1e-05, %v2449_v60 }
0x1d85   : > { %3901 = vrsqrt.f32 %v2450_v61 }
0x1d8f   : > { %v3902_v62 = vpop.eup %3901 }
0x1d90   : > { %v2452_v0 = vmul.f32 %v3902_v62, %v2444_v50 }
0x1d92   : > { %v2459_v6 = vmul.f32 %v3035_v63, %v2452_v0  ;;  %v3065_v0 = vld [vmem:[%s4921_s14 + $0x5] ss:$0 sm:$0xff] }
0x1d94   : > { %v2466_v8 = vadd.f32 %v3036_v5, %v2459_v6  ;;  %v3066_v5 = vld [vmem:[%s4923_s16] ss:$0 sm:$0xff] }
0x1d96   : > { %3554 = vmatmul.mubr.msk.f32.vlgmr.msra.gmra.mrb[16].mxu0 %vm630_vm2, %v2466_v8 }
0x1d97   : > { %3799 = vmatpush3.bf16.msra.mxu0 %v3798_v7  ;;  %3588 = vmatprep.mubr.msk.f32.mxu0 %vm3972_vm0, %v3973_v4  ;;  %v3049_v4 = vld [vmem:[%s4918_s11 + $0x2a8] sm:$0xff] }
0x1d98   : > { %3800 = vmatprep.subr.bf16.mxu0 %v3971_v2  ;;  %v3804_v13 = vpack.c.bf16 %v3049_v4, %v3048_v12 }
0x1d9b   : > { %3802 = vmatpush3.bf16.msra.mxu0 %v3801_v11 }
0x1d9c   : > { %3803 = vmatprep.subr.bf16.mxu0 %v3971_v2 }
0x1d9f   : > { %3805 = vmatpush3.bf16.msra.mxu0 %v3804_v13 }
0x1da0   : > { %3806 = vmatprep.subr.bf16.mxu0 %v3971_v2 }
0x1da3   : > { %3808 = vmatpush3.bf16.msra.mxu0 %v3807_v16 }
0x1da4   : > { %3809 = vmatprep.subr.bf16.mxu0 %v3971_v2 }
0x1da7   : > { %3811 = vmatpush3.bf16.msra.mxu0 %v3810_v19 }
0x1da8   : > { %3812 = vmatprep.subr.bf16.mxu0 %v3971_v2 }
0x1dab   : > { %3814 = vmatpush3.bf16.msra.mxu0 %v3813_v22 }
0x1dac   : > { %3815 = vmatprep.subr.bf16.mxu0 %v3971_v2 }
0x1daf   : > { %3817 = vmatpush3.bf16.msra.mxu0 %v3816_v25 }
0x1db0   : > { %3818 = vmatprep.subr.bf16.mxu0 %v3971_v2  ;;  %v3064_v2 = vld [vmem:[%s4920_s13 + $0x5] ss:$0 sm:$0xff] }
0x1db3   : > { %3820 = vmatpush3.bf16.msra.mxu0 %v3819_v28 }
0x1e69   : > { %v2549_v30 = vpop.f32.mrb[16].mxu0 }
0x1e6a   : > { %v2550_v31 = vadd.f32 %v3042_v29, %v2549_v30  ;;  %v3555_v32 = vpop.f32.mrb[17].mxu0 }
0x1e6c   : > { %v2554_v33 = vmul.f32 %v2550_v31, %v2550_v31  ;;  %v2553_v39 = vmul.f32 0.5, %v2550_v31 }
0x1e6e   : > { %v2555_v34 = vmul.f32 %v2554_v33, %v2550_v31 }
0x1e70   : > { %v2556_v35 = vmul.f32 0.044715, %v2555_v34 }
0x1e72   : > { %v2557_v36 = vadd.f32 %v2556_v35, %v2550_v31 }
0x1e74   : > { %v2558_v37 = vmul.f32 0.7978846, %v2557_v36 }
0x1e76   : > { %3903 = vtanh.f32 %v2558_v37 }
0x1e80   : > { %v3904_v38 = vpop.eup %3903 }
0x1e81   : > { %v2560_v40 = vadd.f32 1.0, %v3904_v38 }
0x1e83   : > { %v2561_v41 = vmul.f32 %v2560_v40, %v2553_v39 }
0x1e85   : > { %3589 = vmatmul.mubr.f32.vlgmr.msra.gmra.mrb[18].mxu0 %v2561_v41 }
0x1f58   : > { %v2653_v43 = vpop.f32.mrb[18].mxu0 }
0x1f59   : > { %v2654_v44 = vadd.f32 %v3061_v42, %v2653_v43  ;;  %v3590_v45 = vpop.f32.mrb[19].mxu0 }
0x1f5b   : > { %v2657_v46 = vadd.f32 %v2654_v44, %v2466_v8 }
0x1f5d   : > { %v2662_v47 = vsel %vm630_vm2, %v2657_v46, 0.0 }
0x1f5e   : > { %2663 = vadd.xlane.f32.xlu0 %v2662_v47 }
0x1feb   : > { %v2664_v48 = vpop.xlane.xlu0 %2663 }
0x1fec   : > { %v2665_v49 = vmul.f32 0.03125, %v2664_v48 }
0x1fee   : > { %v2666_v50 = vsub.f32 %v2657_v46, %v2665_v49 }
0x1ff0   : > { %v2667_v51 = vmul.f32 %v2666_v50, %v2666_v50 }
0x1ff2   : > { %v2668_v52 = vsel %vm630_vm2, %v2667_v51, 0.0 }
0x1ff3   : > { %2669 = vadd.xlane.f32.xlu1 %v2668_v52 }
0x2080   : > { %v2670_v59 = vpop.xlane.xlu1 %2669 }
0x2081   : > { %v2671_v60 = vmul.f32 0.03125, %v2670_v59 }
0x2083   : > { %v2672_v61 = vadd.f32 1e-05, %v2671_v60 }
0x2085   : > { %3905 = vrsqrt.f32 %v2672_v61 }
0x208f   : > { %v3906_v62 = vpop.eup %3905 }
0x2090   : > { %v2674_v63 = vmul.f32 %v3906_v62, %v2666_v50 }
0x2092   : > { %v2681_v1 = vmul.f32 %v3064_v2, %v2674_v63 }
0x2094   : > { %v2688_v3 = vadd.f32 %v3065_v0, %v2681_v1 }
0x2096   : > { %3600 = vmatmul.mubr.msk.f32.vlgmr.msra.gmra.mrb[18].mxu1 %vm630_vm2, %v2688_v3 }
0x2169   : > { %v2769_v6 = vpop.f32.mrb[18].mxu1 }
0x216a   : > { %v2770_v7 = vadd.f32 %v3066_v5, %v2769_v6  ;;  %v3601_v8 = vpop.f32.mrb[19].mxu1 }
0x216c   : > { %2773 = vst [vmem:[%s539_s3] sm:$0xff] %v2770_v7 }
0x216d   : > { %3920 = shalt.err (!%p3917_p3)
}
0x216e   : > { %s3921_s3 = scalar_lea.hbm %s4865_s18, 128  ;;  %s3925_s23 = scalar_lea.hbm %s4924_s17, 256 }
0x216f   : > { %p3922_p4 = scmp.ne.s32.totalorder %s4865_s18, %s3921_s3  ;;  %p3926_p9 = scmp.lt.u32.totalorder %s4865_s18, %s4924_s17 }
0x2170   : > { %p3927_p10 = scmp.lt.u32.totalorder %s3925_s23, %s3921_s3  ;;  %p3929_p12 = scmp.lt.u32.totalorder %s3921_s3, %s4865_s18 }
0x2171   : > { %p3923_p7 = pnand %p3922_p4, %p4103_p5 }
0x2172   : > { %p3928_p11 = por %p3927_p10, %p3926_p9 }
0x2173   : > { %p3924_p8 = pneg %p3923_p7 }
0x2174   : > { %p3930_p13 = por %p3929_p12, %p3928_p11 }
0x2176   : > { %p3931_p0 = pnand %p3930_p13, %p3924_p8 }
0x2178   : > { %3934 = shalt.err (!%p3931_p0)
}
0x2179   : > { %3827 = dma.vmem_to_hbm [thread:$0]  (%p4103_p5), %s4867_s30, 128, %s4865_s18, %s2775_s4  }
0x217a PF: > { %p3833_p1 = scmp.ge.s32.totalorder %s3969_s27, 2  ;;  %s2800_s21 = sand.u32 1, %s3957_s24  }
0x217b   : > { %s2801_s19 = scalar_lea.sflag [#allocation3], %s2800_s21 }
0x217c   : > { %p3830_p2 = pnand %p3833_p1, %p4107_p6 }
0x217e   : > { %3952 = dma.done.wait (!%p3830_p2), %s2801_s19, 128  }
0x217f   : > { %3954 = vsyncadd (!%p3830_p2), %s2801_s19, 4294967168  ;;  %s4942_s22 = sld [smem:[#allocation5_spill]]  ;;  %s4943_s26 = sld [smem:[#allocation6_spill]] }
0x2180   : > { %p27_p3 = scmp.ge.s32.totalorder %s4090_s0, 4   ;;  %s4944_s24 = smov %s3961_s25 }
0x2181   : > { %s4946_s27 = smov %s4090_s0 }
0x2182   :  { %29 = sbr.rel (!%p27_p3) target bundleno = 9 (0x9), region = 173 }
0x2185   : > { %s4945_s25 = smov %s4942_s22 }
0x2189   :  { %2806 = vsyncpa [#allocation3], 1 }
0x218a   :  { %2808 = vsyncpa [#allocation3 + $0x1], 1 }

// kernel: tpu_custom_call.1
= control target key start
LH: loop header
LB: loop body
LE: loop exit
PB: predicated region body
PF: predicated region fallthrough
CT: control target
= control target key end

     0   :  { %s4907_s0 = inlined_call_operand.vmem [shape: f32[16,16], index: 0, kind: input, shape index: {}]   ;;  %s4908_s1 = inlined_call_operand.vmem [shape: f32[16,32], index: 1, kind: input, shape index: {}]   ;;  %s4909_s2 = inlined_call_operand.vmem [shape: f32[1,32], index: 2, kind: input, shape index: {}]   ;;  %s4910_s3 = inlined_call_operand.vmem [shape: f32[1,32], index: 3, kind: input, shape index: {}]   ;;  %s4911_s4 = inlined_call_operand.vmem [shape: f32[1,32], index: 4, kind: input, shape index: {}]   ;;  %s4912_s5 = inlined_call_operand.vmem [shape: f32[6,32,32], index: 5, kind: input, shape index: {}]   ;;  %s4913_s6 = inlined_call_operand.vmem [shape: f32[6,1,32], index: 6, kind: input, shape index: {}]   ;;  %s4914_s7 = inlined_call_operand.vmem [shape: f32[6,1,32], index: 7, kind: input, shape index: {}]   ;;  %s4915_s8 = inlined_call_operand.vmem [shape: f32[6,1,32], index: 8, kind: input, shape index: {}]   ;;  %s4916_s9 = inlined_call_operand.vmem [shape: f32[6,32,128], index: 9, kind: input, shape index: {}]   ;;  %s4917_s10 = inlined_call_operand.vmem [shape: f32[6,1,128], index: 10, kind: input, shape index: {}]   ;;  %s4918_s11 = inlined_call_operand.vmem [shape: f32[6,128,32], index: 11, kind: input, shape index: {}]   ;;  %s4919_s12 = inlined_call_operand.vmem [shape: f32[6,1,32], index: 12, kind: input, shape index: {}]   ;;  %s4920_s13 = inlined_call_operand.vmem [shape: f32[6,1,32], index: 13, kind: input, shape index: {}]   ;;  %s4921_s14 = inlined_call_operand.vmem [shape: f32[6,1,32], index: 14, kind: input, shape index: {}]   ;;  %s4922_s15 = inlined_call_operand.vmem [shape: f32[32,128], index: 15, kind: input, shape index: {}]   ;;  %s4923_s16 = inlined_call_operand.vmem [shape: f32[1,128], index: 16, kind: input, shape index: {}]   ;;  %s4924_s17 = inlined_call_operand.hbm [shape: f32[16,128], index: 17, kind: output, shape index: {}]  }
   0x1   :  { %4928 = sst [smem:[#allocation7_spill]] %s4907_s0 }
   0x2   :  { %4929 = sst [smem:[#allocation8_spill]] %s4908_s1 }
   0x3   :  { %4930 = sst [smem:[#allocation9_spill]] %s4909_s2 }
   0x4   :  { %4931 = sst [smem:[#allocation10_spill]] %s4910_s3 }
   0x5   :  { %4932 = sst [smem:[#allocation11_spill]] %s4911_s4 }
   0x6   :  { %22 = vsyncpa [#allocation3], 0 }
   0x7   :  { %24 = vsyncpa [#allocation3 + $0x1], 0  ;;  %s4065_s24 = smov 0   ;;  %s4067_s25 = smov 0  }
   0x8   :  { %s4069_s26 = smov 0   ;;  %s4071_s27 = smov 0  }
   0x9 LB: > { %4933 = sst [smem:[#allocation5_spill]] %s3965_s26  ;;  %s4086_s28 = sadd.s32 4294967295, %s3969_s27   ;;  %s3969_s27 = sphi %s4071_s27, %s4946_s27   ;;  %s3965_s26 = sphi %s4069_s26, %s4943_s26   ;;  %s3961_s25 = sphi %s4067_s25, %s4945_s25   ;;  %s3957_s24 = sphi %s4065_s24, %s4944_s24  }
   0xa   : > { %s2847_s29 = sadd.s32 4294967294, %s3969_s27   ;;  %s4090_s0 = sadd.s32 1, %s3969_s27  }
   0xb   : > { %s399_s30 = sadd.s32 1, %s3965_s26  ;;  %s396_s18 = ssub.s32 %s3969_s27, %s4090_s0 }
   0xc   : > { %p409_p0 = scmp.ne.s32.totalorder %s3965_s26, %s3961_s25  ;;  %p397_p1 = scmp.eq.s32.totalorder %s396_s18, 0 }
   0xd   : > { %p410_p2 = scmp.eq.s32.totalorder %s4086_s28, 1  ;;  %p415_p3 = scmp.ne.s32.totalorder %s3961_s25, %s3957_s24 }
   0xe   : > { %p416_p4 = scmp.eq.s32.totalorder %s2847_s29, 1  ;;  %p2850_p7 = scmp.ge.s32.totalorder %s3969_s27, 1 }
   0xf   : > { %s4101_s19 = scalar_select %p397_p1, %s3965_s26, %s399_s30  }
  0x10   : > { %p4103_p5 = por %p410_p2, %p409_p0  ;;  %p4107_p6 = por %p416_p4, %p415_p3 }
  0x11   : > { %4934 = sst [smem:[#allocation6_spill]] %s4101_s19  ;;  %p489_p8 = scmp.lt.s32.totalorder %s3969_s27, 3 }
  0x13   : > { %p490_p9 = pnand %p2850_p7, %p489_p8 }
  0x14   : > { %s4937_s23 = sld [smem:[#allocation8_spill]] (!%p490_p9)  ;;  %p540_p10 = scmp.lt.s32.totalorder (!%p490_p9), %s4086_s28, 1  ;;  %v3971_v2 = vmov (!%p490_p9), 0.0|0.0   ;;  %vm3972_vm0 = vmmov (!%p490_p9), 0   ;;  %v3973_v4 = vmov (!%p490_p9), 0.0   ;;  %vm554_vm1 = vcmask (!%p490_p9), 130048  }
  0x15   : > { %493 = sbr.rel (%p490_p9) target bundleno = 8570 (0x217a), region = 88  ;;  %3602 = vmatprep.subr.bf16.mxu1 (!%p490_p9), %v3971_v2  ;;  %3246 = vmatprep.mubr.msk.f32.mxu1 (!%p490_p9), %vm3972_vm0, %v3973_v4  ;;  %s4938_s30 = sld [smem:[#allocation7_spill]] (!%p490_p9)  ;;  %vm630_vm2 = vcmask (!%p490_p9), 261120   ;;  %v659_v16 = vld [vmem:[%s4912_s5] sm:$0xff] (!%p490_p9)  ;;  %v660_v17 = vld [vmem:[%s4912_s5 + $0x8] sm:$0xff] (!%p490_p9)  ;;  %v661_v19 = vld [vmem:[%s4912_s5 + $0x10] sm:$0xff] (!%p490_p9) }
  0x16   : > { %3611 = vmatprep.subr.bf16.mxu0 (!%p490_p9), %v3971_v2  ;;  %3268 = vmatprep.mubr.msk.f32.mxu0 (!%p490_p9), %vm3972_vm0, %v3973_v4  ;;  %s4939_s2 = sld [smem:[#allocation9_spill]] (!%p490_p9)  ;;  %v3606_v18 = vpack.c.bf16 (!%p490_p9), %v660_v17, %v659_v16  ;;  %v662_v20 = vld [vmem:[%s4912_s5 + $0x18] sm:$0xff] (!%p490_p9)  ;;  %s4940_s3 = sld [smem:[#allocation10_spill]] (!%p490_p9)  ;;  %v2857_v31 = vld [vmem:[%s4913_s6] ss:$0 sm:$0xff] (!%p490_p9)  ;;  %v774_v43 = vld [vmem:[%s4916_s9 + $0x8] sm:$0xff] (!%p490_p9) }
  0x17   : > { %v3609_v21 = vpack.c.bf16 (!%p490_p9), %v662_v20, %v661_v19  ;;  %s4941_s4 = sld [smem:[#allocation11_spill]] (!%p490_p9)  ;;  %v773_v42 = vld [vmem:[%s4916_s9] sm:$0xff] (!%p490_p9)  ;;  %v775_v44 = vld [vmem:[%s4916_s9 + $0x10] sm:$0xff] (!%p490_p9)  ;;  %v776_v46 = vld [vmem:[%s4916_s9 + $0x18] sm:$0xff] (!%p490_p9)  ;;  %s537_s26 = sand.u32 (!%p490_p9), 1, %s3961_s25  }
  0x18   : > { %v3612_v45 = vpack.c.bf16 (!%p490_p9), %v774_v43, %v773_v42  ;;  %v3615_v47 = vpack.c.bf16 (!%p490_p9), %v776_v46, %v775_v44  ;;  %v866_v48 = vld [vmem:[%s4918_s11] sm:$0xff] (!%p490_p9)  ;;  %v867_v49 = vld [vmem:[%s4918_s11 + $0x8] sm:$0xff] (!%p490_p9)  ;;  %v868_v60 = vld [vmem:[%s4918_s11 + $0x10] sm:$0xff] (!%p490_p9)  ;;  %s2851_s19 = sshll.u32 (!%p490_p9), %s537_s26, 3  ;;  %s3069_s29 = sshll.u32 (!%p490_p9), %s4086_s28, 7 }
  0x19   : > { %v3618_v50 = vpack.c.bf16 (!%p490_p9), %v867_v49, %v866_v48  ;;  %v2859_v55 = vld [vmem:[%s4914_s7] ss:$0 sm:$0xff] (!%p490_p9)  ;;  %v869_v61 = vld [vmem:[%s4918_s11 + $0x18] sm:$0xff] (!%p490_p9)  ;;  %v880_v16 = vld [vmem:[%s4918_s11 + $0x70] sm:$0xff] (!%p490_p9) }
  0x1a   : > { %v545_v0 = vld [vmem:[%s4937_s23] sm:$0xff] (!%p490_p9)  ;;  %v546_v1 = vld [vmem:[%s4937_s23 + $0x8] sm:$0xff] (!%p490_p9)  ;;  %3613 = vmatpush3.bf16.msra.mxu0 (!%p490_p9), %v3612_v45  ;;  %v3621_v62 = vpack.c.bf16 (!%p490_p9), %v869_v61, %v868_v60  ;;  %v881_v17 = vld [vmem:[%s4918_s11 + $0x78] sm:$0xff] (!%p490_p9) }
  0x1b   : > { %v3603_v3 = vpack.c.bf16 (!%p490_p9), %v546_v1, %v545_v0  ;;  %3614 = vmatprep.subr.bf16.mxu0 (!%p490_p9), %v3971_v2  ;;  %v2860_v57 = vld [vmem:[%s4915_s8] ss:$0 sm:$0xff] (!%p490_p9)  ;;  %v871_v0 = vld [vmem:[%s4918_s11 + $0x28] sm:$0xff] (!%p490_p9)  ;;  %v2868_v46 = vld [vmem:[%s4912_s5 + $0x30] sm:$0xff] (!%p490_p9) }
  0x1c   : > { %s541_s18 = scalar_select %p540_p10, %s4086_s28, 1  ;;  %v2853_v6 = vld [vmem:[%s4939_s2] ss:$0 sm:$0xff]  ;;  %v2867_v44 = vld [vmem:[%s4912_s5 + $0x28] sm:$0xff] }
  0x1d   : > { %3604 = vmatpush3.bf16.msra.mxu1 %v3603_v3  ;;  %v2855_v26 = vld [vmem:[%s4940_s3] ss:$0 sm:$0xff]  ;;  %v872_v3 = vld [vmem:[%s4918_s11 + $0x30] sm:$0xff]  ;;  %s539_s3 = scalar_lea.vmem [#allocation2], %s2851_s19  ;;  %s3974_s28 = smov [#allocation2]  }
  0x1e   : > { %s2852_s21 = sshll.u32 %s541_s18, 3  ;;  %3605 = vmatprep.subr.bf16.mxu1 %v3971_v2  ;;  %v2856_v28 = vld [vmem:[%s4941_s4] ss:$0 sm:$0xff]  ;;  %3616 = vmatpush3.bf16.msra.mxu0 %v3615_v47  ;;  %v2869_v47 = vld [vmem:[%s4912_s5 + $0x38] sm:$0xff]  ;;  %s4865_s18 = scalar_lea.hbm %s4924_s17, %s3069_s29 }
  0x1f   : > { %s543_s23 = scalar_lea.vmem %s4938_s30, %s2852_s21  ;;  %3641 = vmatprep.subr.bf16.mxu0 %v3971_v2  ;;  %v870_v63 = vld [vmem:[%s4918_s11 + $0x20] sm:$0xff]  ;;  %v3645_v48 = vpack.c.bf16 %v2869_v47, %v2868_v46  ;;  %s2788_s30 = sshll.u32 %s539_s3, 4  ;;  %s4867_s30 = int_to_ptr.vmem [resolvable:$true] %s2788_s30 }
  0x20   : > { %v544_v5 = vld [vmem:[%s543_s23] sm:$0xff]  ;;  %v3624_v1 = vpack.c.bf16 %v871_v0, %v870_v63  ;;  %s2775_s4 = scalar_lea.sflag [#allocation3], %s537_s26  ;;  %s3907_s21 = scalar_lea.vmem %s4867_s30, 128 }
  0x21   : > { %3247 = vmatmul.mubr.msk.f32.vlgmr.msra.gmra.mrb[0].mxu1 %vm554_vm1, %v544_v5  ;;  %v873_v5 = vld [vmem:[%s4918_s11 + $0x38] sm:$0xff]  ;;  %v2861_v19 = vld [vmem:[%s4917_s10] ss:$0 sm:$0xff]  ;;  %v2882_v46 = vld [vmem:[%s4917_s10 + $0x1] ss:$0 sm:$0xff]  ;;  %p3908_p11 = scmp.ne.s32.totalorder %s4867_s30, %s3907_s21  ;;  %s3911_s19 = sshll.u32 %s3974_s28, 4  ;;  %s3912_s19 = int_to_ptr.vmem [resolvable:$false] %s3911_s19 }
  0x22   : > { %3257 = vmatprep.mubr.msk.f32.mxu1 %vm3972_vm0, %v3973_v4  ;;  %3607 = vmatpush3.bf16.msra.mxu1 %v3606_v18  ;;  %v3639_v18 = vpack.c.bf16 %v881_v17, %v880_v16  ;;  %v2866_v43 = vld [vmem:[%s4912_s5 + $0x20] sm:$0xff]  ;;  %s3913_s22 = scalar_lea.vmem %s3912_s19, 256  ;;  %p3914_p0 = scmp.lt.s32.totalorder %s4867_s30, %s3912_s19 }
  0x23   : > { %3608 = vmatprep.subr.bf16.mxu1 %v3971_v2  ;;  %v3642_v45 = vpack.c.bf16 %v2867_v44, %v2866_v43  ;;  %v2875_v17 = vld [vmem:[%s4914_s7 + $0x1] ss:$0 sm:$0xff]  ;;  %v2898_v43 = vld [vmem:[%s4918_s11 + $0xf0] sm:$0xff]  ;;  %v2899_v44 = vld [vmem:[%s4918_s11 + $0xf8] sm:$0xff]  ;;  %p3909_p12 = pnand %p3908_p11, %p4103_p5  ;;  %p3915_p1 = scmp.lt.s32.totalorder %s3913_s22, %s3907_s21 }
  0x25   : > { %p3910_p13 = pneg %p3909_p12  ;;  %p3916_p2 = por %p3915_p1, %p3914_p0 }
  0x26   : > { %3610 = vmatpush3.bf16.msra.mxu1 %v3609_v21 }
  0x27   : > { %3617 = vmatprep.subr.bf16.mxu1 %v3971_v2  ;;  %p3917_p3 = pnand %p3916_p2, %p3910_p13 }
  0xf4   : > { %v624_v7 = vpop.f32.mrb[0].mxu1 }
  0xf5   : > { %v625_v8 = vadd.f32 %v2853_v6, %v624_v7  ;;  %v3248_v9 = vpop.f32.mrb[1].mxu1  ;;  %v3627_v6 = vpack.c.bf16 %v873_v5, %v872_v3  ;;  %v874_v7 = vld [vmem:[%s4918_s11 + $0x40] sm:$0xff] }
  0xf7   : > { %v631_v10 = vsel %vm630_vm2, %v625_v8, 0.0 }
  0xf8   : > { %632 = vadd.xlane.f32.xlu0 %v631_v10  ;;  %v876_v10 = vld [vmem:[%s4918_s11 + $0x50] sm:$0xff] }
 0x185   : > { %v633_v11 = vpop.xlane.xlu0 %632 }
 0x186   : > { %v635_v12 = vmul.f32 0.03125, %v633_v11  ;;  %v877_v11 = vld [vmem:[%s4918_s11 + $0x58] sm:$0xff] }
 0x188   : > { %v636_v13 = vsub.f32 %v625_v8, %v635_v12  ;;  %v875_v8 = vld [vmem:[%s4918_s11 + $0x48] sm:$0xff]  ;;  %v3633_v12 = vpack.c.bf16 %v877_v11, %v876_v10  ;;  %v2879_v10 = vld [vmem:[%s4916_s9 + $0x30] sm:$0xff]  ;;  %v2880_v11 = vld [vmem:[%s4916_s9 + $0x38] sm:$0xff] }
 0x189   : > { %v3630_v9 = vpack.c.bf16 %v875_v8, %v874_v7  ;;  %v2877_v7 = vld [vmem:[%s4916_s9 + $0x20] sm:$0xff]  ;;  %v2878_v8 = vld [vmem:[%s4916_s9 + $0x28] sm:$0xff] }
 0x18a   : > { %v637_v14 = vmul.f32 %v636_v13, %v636_v13 }
 0x18c   : > { %v638_v15 = vsel %vm630_vm2, %v637_v14, 0.0  ;;  %v879_v14 = vld [vmem:[%s4918_s11 + $0x68] sm:$0xff] }
 0x18d   : > { %639 = vadd.xlane.f32.xlu0 %v638_v15 }
 0x21a   : > { %v640_v22 = vpop.xlane.xlu0 %639 }
 0x21b   : > { %v641_v23 = vmul.f32 0.03125, %v640_v22 }
 0x21d   : > { %v642_v24 = vadd.f32 1e-05, %v641_v23 }
 0x21f   : > { %3869 = vrsqrt.f32 %v642_v24 }
 0x229   : > { %v3870_v25 = vpop.eup %3869 }
 0x22a   : > { %v644_v27 = vmul.f32 %v3870_v25, %v636_v13  ;;  %v878_v13 = vld [vmem:[%s4918_s11 + $0x60] sm:$0xff] }
 0x22b   : > { %v3636_v15 = vpack.c.bf16 %v879_v14, %v878_v13 }
 0x22c   : > { %v651_v29 = vmul.f32 %v2855_v26, %v644_v27 }
 0x22e   : > { %v658_v30 = vadd.f32 %v2856_v28, %v651_v29 }
 0x230   : > { %3258 = vmatmul.mubr.msk.f32.vlgmr.msra.gmra.mrb[2].mxu1 %vm630_vm2, %v658_v30 }
 0x231   : > { %3303 = vmatprep.mubr.msk.f32.mxu1 %vm3972_vm0, %v3973_v4  ;;  %3619 = vmatpush3.bf16.msra.mxu1 %v3618_v50 }
 0x232   : > { %3620 = vmatprep.subr.bf16.mxu1 %v3971_v2 }
 0x235   : > { %3622 = vmatpush3.bf16.msra.mxu1 %v3621_v62 }
 0x236   : > { %3623 = vmatprep.subr.bf16.mxu1 %v3971_v2 }
 0x239   : > { %3625 = vmatpush3.bf16.msra.mxu1 %v3624_v1 }
 0x23a   : > { %3626 = vmatprep.subr.bf16.mxu1 %v3971_v2 }
 0x23d   : > { %3628 = vmatpush3.bf16.msra.mxu1 %v3627_v6 }
 0x23e   : > { %3629 = vmatprep.subr.bf16.mxu1 %v3971_v2 }
 0x241   : > { %3631 = vmatpush3.bf16.msra.mxu1 %v3630_v9  ;;  %v3648_v9 = vpack.c.bf16 %v2878_v8, %v2877_v7  ;;  %v2906_v8 = vld [vmem:[%s4912_s5 + $0x40] sm:$0xff] }
 0x242   : > { %3632 = vmatprep.subr.bf16.mxu1 %v3971_v2 }
 0x245   : > { %3634 = vmatpush3.bf16.msra.mxu1 %v3633_v12  ;;  %v3651_v12 = vpack.c.bf16 %v2880_v11, %v2879_v10  ;;  %v2908_v11 = vld [vmem:[%s4912_s5 + $0x50] sm:$0xff] }
 0x246   : > { %3635 = vmatprep.subr.bf16.mxu1 %v3971_v2 }
 0x249   : > { %3637 = vmatpush3.bf16.msra.mxu1 %v3636_v15 }
 0x24a   : > { %3638 = vmatprep.subr.bf16.mxu1 %v3971_v2 }
 0x24d   : > { %3640 = vmatpush3.bf16.msra.mxu1 %v3639_v18 }
 0x24e   : > { %3677 = vmatprep.subr.bf16.mxu1 %v3971_v2 }
 0x303   : > { %v739_v32 = vpop.f32.mrb[2].mxu1 }
 0x304   : > { %v740_v33 = vadd.f32 %v2857_v31, %v739_v32  ;;  %v3259_v34 = vpop.f32.mrb[3].mxu1  ;;  %v2863_v32 = vld [vmem:[%s4919_s12] ss:$0 sm:$0xff] }
 0x306   : > { %v743_v35 = vadd.f32 %v740_v33, %v658_v30 }
 0x308   : > { %v746_v36 = vsel %vm630_vm2, %v743_v35, 0.0 }
 0x309   : > { %747 = vadd.xlane.f32.xlu1 %v746_v36 }
 0x396   : > { %v748_v37 = vpop.xlane.xlu1 %747 }
 0x397   : > { %v749_v38 = vmul.f32 0.03125, %v748_v37 }
 0x399   : > { %v750_v39 = vsub.f32 %v743_v35, %v749_v38 }
 0x39b   : > { %v751_v40 = vmul.f32 %v750_v39, %v750_v39 }
 0x39d   : > { %v752_v41 = vsel %vm630_vm2, %v751_v40, 0.0 }
 0x39e   : > { %753 = vadd.xlane.f32.xlu1 %v752_v41 }
 0x42b   : > { %v754_v51 = vpop.xlane.xlu1 %753 }
 0x42c   : > { %v755_v52 = vmul.f32 0.03125, %v754_v51 }
 0x42e   : > { %v756_v53 = vadd.f32 1e-05, %v755_v52 }
 0x430   : > { %3871 = vrsqrt.f32 %v756_v53  ;;  %v2864_v53 = vld [vmem:[%s4920_s13] ss:$0 sm:$0xff] }
 0x43a   : > { %v3872_v54 = vpop.eup %3871 }
 0x43b   : > { %v758_v56 = vmul.f32 %v3872_v54, %v750_v39 }
 0x43d   : > { %v765_v58 = vmul.f32 %v2859_v55, %v758_v56  ;;  %v2865_v55 = vld [vmem:[%s4921_s14] ss:$0 sm:$0xff] }
 0x43f   : > { %v772_v59 = vadd.f32 %v2860_v57, %v765_v58  ;;  %v2871_v58 = vld [vmem:[%s4913_s6 + $0x1] ss:$0 sm:$0xff] }
 0x441   : > { %3269 = vmatmul.mubr.msk.f32.vlgmr.msra.gmra.mrb[0].mxu0 %vm630_vm2, %v772_v59 }
 0x442   : > { %3314 = vmatprep.mubr.msk.f32.mxu0 %vm3972_vm0, %v3973_v4  ;;  %3643 = vmatpush3.bf16.msra.mxu0 %v3642_v45  ;;  %v3675_v45 = vpack.c.bf16 %v2899_v44, %v2898_v43  ;;  %v2915_v44 = vld [vmem:[%s4914_s7 + $0x2] ss:$0 sm:$0xff] }
 0x443   : > { %3644 = vmatprep.subr.bf16.mxu0 %v3971_v2 }
 0x446   : > { %3646 = vmatpush3.bf16.msra.mxu0 %v3645_v48 }
 0x447   : > { %3647 = vmatprep.subr.bf16.mxu0 %v3971_v2 }
 0x514   : > { %v853_v20 = vpop.f32.mrb[0].mxu0 }
 0x515   : > { %v854_v21 = vadd.f32 %v2861_v19, %v853_v20  ;;  %v3270_v22 = vpop.f32.mrb[1].mxu0  ;;  %v2884_v19 = vld [vmem:[%s4918_s11 + $0x80] sm:$0xff]  ;;  %v2885_v20 = vld [vmem:[%s4918_s11 + $0x88] sm:$0xff] }
 0x517   : > { %v858_v23 = vmul.f32 %v854_v21, %v854_v21  ;;  %v857_v29 = vmul.f32 0.5, %v854_v21 }
 0x519   : > { %v859_v24 = vmul.f32 %v858_v23, %v854_v21  ;;  %v3654_v23 = vpack.c.bf16 %v2885_v20, %v2884_v19  ;;  %v2905_v20 = vld [vmem:[%s4921_s14 + $0x1] ss:$0 sm:$0xff] }
 0x51b   : > { %v860_v25 = vmul.f32 0.044715, %v859_v24 }
 0x51d   : > { %v861_v26 = vadd.f32 %v860_v25, %v854_v21  ;;  %v2876_v21 = vld [vmem:[%s4915_s8 + $0x1] ss:$0 sm:$0xff]  ;;  %v2886_v25 = vld [vmem:[%s4918_s11 + $0x90] sm:$0xff] }
 0x51f   : > { %v862_v27 = vmul.f32 0.7978846, %v861_v26  ;;  %v2887_v26 = vld [vmem:[%s4918_s11 + $0x98] sm:$0xff] }
 0x521   : > { %3873 = vtanh.f32 %v862_v27  ;;  %v3657_v27 = vpack.c.bf16 %v2887_v26, %v2886_v25 }
 0x52b   : > { %v3874_v28 = vpop.eup %3873 }
 0x52c   : > { %v864_v30 = vadd.f32 1.0, %v3874_v28  ;;  %v2888_v28 = vld [vmem:[%s4918_s11 + $0xa0] sm:$0xff] }
 0x52e   : > { %v865_v31 = vmul.f32 %v864_v30, %v857_v29  ;;  %v2889_v29 = vld [vmem:[%s4918_s11 + $0xa8] sm:$0xff] }
 0x52f   : > { %v3660_v30 = vpack.c.bf16 %v2889_v29, %v2888_v28 }
 0x530   : > { %3304 = vmatmul.mubr.f32.vlgmr.msra.gmra.mrb[4].mxu1 %v865_v31  ;;  %v2890_v31 = vld [vmem:[%s4918_s11 + $0xb0] sm:$0xff] }
 0x531   : > { %3371 = vmatprep.mubr.msk.f32.mxu1 %vm3972_vm0, %v3973_v4 }
 0x603   : > { %v955_v33 = vpop.f32.mrb[4].mxu1 }
 0x604   : > { %v956_v34 = vadd.f32 %v2863_v32, %v955_v33  ;;  %v3305_v35 = vpop.f32.mrb[5].mxu1  ;;  %v2891_v32 = vld [vmem:[%s4918_s11 + $0xb8] sm:$0xff] }
 0x605   : > { %v3663_v33 = vpack.c.bf16 %v2891_v32, %v2890_v31  ;;  %v2893_v35 = vld [vmem:[%s4918_s11 + $0xc8] sm:$0xff] }
 0x606   : > { %v959_v36 = vadd.f32 %v956_v34, %v772_v59  ;;  %v2892_v34 = vld [vmem:[%s4918_s11 + $0xc0] sm:$0xff] }
 0x608   : > { %v962_v37 = vsel %vm630_vm2, %v959_v36, 0.0 }
 0x609   : > { %963 = vadd.xlane.f32.xlu0 %v962_v37  ;;  %v2894_v37 = vld [vmem:[%s4918_s11 + $0xd0] sm:$0xff] }
 0x696   : > { %v964_v38 = vpop.xlane.xlu0 %963 }
 0x697   : > { %v965_v39 = vmul.f32 0.03125, %v964_v38  ;;  %v2895_v38 = vld [vmem:[%s4918_s11 + $0xd8] sm:$0xff] }
 0x699   : > { %v966_v40 = vsub.f32 %v959_v36, %v965_v39  ;;  %v3666_v36 = vpack.c.bf16 %v2893_v35, %v2892_v34  ;;  %v3669_v39 = vpack.c.bf16 %v2895_v38, %v2894_v37  ;;  %v2917_v34 = vld [vmem:[%s4916_s9 + $0x40] sm:$0xff]  ;;  %v2918_v35 = vld [vmem:[%s4916_s9 + $0x48] sm:$0xff]  ;;  %v2919_v37 = vld [vmem:[%s4916_s9 + $0x50] sm:$0xff] }
 0x69a   : > { %v2920_v38 = vld [vmem:[%s4916_s9 + $0x58] sm:$0xff] }
 0x69b   : > { %v967_v41 = vmul.f32 %v966_v40, %v966_v40 }
 0x69d   : > { %v968_v42 = vsel %vm630_vm2, %v967_v41, 0.0  ;;  %v2897_v41 = vld [vmem:[%s4918_s11 + $0xe8] sm:$0xff] }
 0x69e   : > { %969 = vadd.xlane.f32.xlu1 %v968_v42 }
 0x72b   : > { %v970_v49 = vpop.xlane.xlu1 %969 }
 0x72c   : > { %v971_v50 = vmul.f32 0.03125, %v970_v49 }
 0x72e   : > { %v972_v51 = vadd.f32 1e-05, %v971_v50 }
 0x730   : > { %3875 = vrsqrt.f32 %v972_v51 }
 0x73a   : > { %v3876_v52 = vpop.eup %3875 }
 0x73b   : > { %v974_v54 = vmul.f32 %v3876_v52, %v966_v40  ;;  %v2896_v40 = vld [vmem:[%s4918_s11 + $0xe0] sm:$0xff] }
 0x73c   : > { %v3672_v42 = vpack.c.bf16 %v2897_v41, %v2896_v40 }
 0x73d   : > { %v981_v56 = vmul.f32 %v2864_v53, %v974_v54 }
 0x73f   : > { %v988_v57 = vadd.f32 %v2865_v55, %v981_v56 }
 0x741   : > { %3315 = vmatmul.mubr.msk.f32.vlgmr.msra.gmra.mrb[2].mxu0 %vm630_vm2, %v988_v57 }
 0x742   : > { %3325 = vmatprep.mubr.msk.f32.mxu0 %vm3972_vm0, %v3973_v4  ;;  %3649 = vmatpush3.bf16.msra.mxu0 %v3648_v9  ;;  %v2907_v9 = vld [vmem:[%s4912_s5 + $0x48] sm:$0xff] }
 0x743   : > { %3650 = vmatprep.subr.bf16.mxu0 %v3971_v2  ;;  %v3678_v10 = vpack.c.bf16 %v2907_v9, %v2906_v8  ;;  %v2938_v8 = vld [vmem:[%s4918_s11 + $0x170] sm:$0xff]  ;;  %v2939_v9 = vld [vmem:[%s4918_s11 + $0x178] sm:$0xff] }
 0x745   : > { %3679 = vmatpush3.bf16.msra.mxu1 %v3678_v10  ;;  %v3711_v10 = vpack.c.bf16 %v2939_v9, %v2938_v8  ;;  %v2955_v9 = vld [vmem:[%s4914_s7 + $0x3] ss:$0 sm:$0xff] }
 0x746   : > { %3652 = vmatpush3.bf16.msra.mxu0 %v3651_v12  ;;  %3680 = vmatprep.subr.bf16.mxu1 %v3971_v2  ;;  %v2909_v12 = vld [vmem:[%s4912_s5 + $0x58] sm:$0xff] }
 0x747   : > { %3653 = vmatprep.subr.bf16.mxu0 %v3971_v2 }
 0x814   : > { %v1071_v59 = vpop.f32.mrb[2].mxu0 }
 0x815   : > { %v1072_v60 = vadd.f32 %v2871_v58, %v1071_v59  ;;  %v3316_v61 = vpop.f32.mrb[3].mxu0  ;;  %v2901_v59 = vld [vmem:[%s4919_s12 + $0x1] ss:$0 sm:$0xff] }
 0x817   : > { %v1075_v62 = vadd.f32 %v1072_v60, %v988_v57 }
 0x819   : > { %v1080_v63 = vsel %vm630_vm2, %v1075_v62, 0.0 }
 0x81a   : > { %1081 = vadd.xlane.f32.xlu0 %v1080_v63 }
 0x8a7   : > { %v1082_v0 = vpop.xlane.xlu0 %1081 }
 0x8a8   : > { %v1083_v1 = vmul.f32 0.03125, %v1082_v0 }
 0x8aa   : > { %v1084_v3 = vsub.f32 %v1075_v62, %v1083_v1 }
 0x8ac   : > { %v1085_v5 = vmul.f32 %v1084_v3, %v1084_v3 }
 0x8ae   : > { %v1086_v6 = vsel %vm630_vm2, %v1085_v5, 0.0 }
 0x8af   : > { %1087 = vadd.xlane.f32.xlu1 %v1086_v6 }
 0x93c   : > { %v1088_v13 = vpop.xlane.xlu1 %1087 }
 0x93d   : > { %v1089_v14 = vmul.f32 0.03125, %v1088_v13  ;;  %v3681_v13 = vpack.c.bf16 %v2909_v12, %v2908_v11  ;;  %v2922_v11 = vld [vmem:[%s4917_s10 + $0x2] ss:$0 sm:$0xff] }
 0x93f   : > { %v1090_v15 = vadd.f32 1e-05, %v1089_v14  ;;  %3682 = vmatpush3.bf16.msra.mxu1 %v3681_v13 }
 0x940   : > { %3683 = vmatprep.subr.bf16.mxu1 %v3971_v2 }
 0x941   : > { %3877 = vrsqrt.f32 %v1090_v15 }
 0x94b   : > { %v3878_v16 = vpop.eup %3877 }
 0x94c   : > { %v1092_v18 = vmul.f32 %v3878_v16, %v1084_v3 }
 0x94e   : > { %v1099_v22 = vmul.f32 %v2875_v17, %v1092_v18  ;;  %v2904_v18 = vld [vmem:[%s4920_s13 + $0x1] ss:$0 sm:$0xff] }
 0x950   : > { %v1106_v24 = vadd.f32 %v2876_v21, %v1099_v22 }
 0x952   : > { %3326 = vmatmul.mubr.msk.f32.vlgmr.msra.gmra.mrb[4].mxu0 %vm630_vm2, %v1106_v24 }
 0x953   : > { %3655 = vmatpush3.bf16.msra.mxu0 %v3654_v23  ;;  %3360 = vmatprep.mubr.msk.f32.mxu0 %vm3972_vm0, %v3973_v4  ;;  %v2911_v23 = vld [vmem:[%s4913_s6 + $0x2] ss:$0 sm:$0xff] }
 0x954   : > { %3656 = vmatprep.subr.bf16.mxu0 %v3971_v2 }
 0x957   : > { %3658 = vmatpush3.bf16.msra.mxu0 %v3657_v27 }
 0x958   : > { %3659 = vmatprep.subr.bf16.mxu0 %v3971_v2 }
 0x95b   : > { %3661 = vmatpush3.bf16.msra.mxu0 %v3660_v30 }
 0x95c   : > { %3662 = vmatprep.subr.bf16.mxu0 %v3971_v2 }
 0x95f   : > { %3664 = vmatpush3.bf16.msra.mxu0 %v3663_v33 }
 0x960   : > { %3665 = vmatprep.subr.bf16.mxu0 %v3971_v2 }
 0x963   : > { %3667 = vmatpush3.bf16.msra.mxu0 %v3666_v36  ;;  %v3684_v36 = vpack.c.bf16 %v2918_v35, %v2917_v34  ;;  %v2946_v35 = vld [vmem:[%s4912_s5 + $0x60] sm:$0xff] }
 0x964   : > { %3668 = vmatprep.subr.bf16.mxu0 %v3971_v2 }
 0x967   : > { %3670 = vmatpush3.bf16.msra.mxu0 %v3669_v39  ;;  %v3687_v39 = vpack.c.bf16 %v2920_v38, %v2919_v37  ;;  %v2948_v38 = vld [vmem:[%s4912_s5 + $0x70] sm:$0xff] }
 0x968   : > { %3671 = vmatprep.subr.bf16.mxu0 %v3971_v2 }
 0x96b   : > { %3673 = vmatpush3.bf16.msra.mxu0 %v3672_v42 }
 0x96c   : > { %3674 = vmatprep.subr.bf16.mxu0 %v3971_v2 }
 0x96f   : > { %3676 = vmatpush3.bf16.msra.mxu0 %v3675_v45 }
 0x970   : > { %3713 = vmatprep.subr.bf16.mxu0 %v3971_v2 }
 0xa25   : > { %v1189_v47 = vpop.f32.mrb[4].mxu0 }
 0xa26   : > { %v1190_v48 = vadd.f32 %v2882_v46, %v1189_v47  ;;  %v3327_v49 = vpop.f32.mrb[5].mxu0  ;;  %v2924_v46 = vld [vmem:[%s4918_s11 + $0x100] sm:$0xff]  ;;  %v2925_v47 = vld [vmem:[%s4918_s11 + $0x108] sm:$0xff] }
 0xa28   : > { %v1194_v50 = vmul.f32 %v1190_v48, %v1190_v48  ;;  %v1193_v56 = vmul.f32 0.5, %v1190_v48 }
 0xa2a   : > { %v1195_v51 = vmul.f32 %v1194_v50, %v1190_v48  ;;  %v3690_v50 = vpack.c.bf16 %v2925_v47, %v2924_v46  ;;  %v2945_v47 = vld [vmem:[%s4921_s14 + $0x2] ss:$0 sm:$0xff] }
 0xa2c   : > { %v1196_v52 = vmul.f32 0.044715, %v1195_v51 }
 0xa2e   : > { %v1197_v53 = vadd.f32 %v1196_v52, %v1190_v48  ;;  %v2916_v48 = vld [vmem:[%s4915_s8 + $0x2] ss:$0 sm:$0xff]  ;;  %v2926_v52 = vld [vmem:[%s4918_s11 + $0x110] sm:$0xff] }
 0xa30   : > { %v1198_v54 = vmul.f32 0.7978846, %v1197_v53  ;;  %v2927_v53 = vld [vmem:[%s4918_s11 + $0x118] sm:$0xff] }
 0xa32   : > { %3879 = vtanh.f32 %v1198_v54  ;;  %v3693_v54 = vpack.c.bf16 %v2927_v53, %v2926_v52 }
 0xa3c   : > { %v3880_v55 = vpop.eup %3879 }
 0xa3d   : > { %v1200_v57 = vadd.f32 1.0, %v3880_v55  ;;  %v2928_v55 = vld [vmem:[%s4918_s11 + $0x120] sm:$0xff] }
 0xa3f   : > { %v1201_v58 = vmul.f32 %v1200_v57, %v1193_v56  ;;  %v2929_v56 = vld [vmem:[%s4918_s11 + $0x128] sm:$0xff] }
 0xa40   : > { %v3696_v57 = vpack.c.bf16 %v2929_v56, %v2928_v55 }
 0xa41   : > { %3361 = vmatmul.mubr.f32.vlgmr.msra.gmra.mrb[6].mxu0 %v1201_v58  ;;  %v2930_v58 = vld [vmem:[%s4918_s11 + $0x130] sm:$0xff] }
 0xa42   : > { %3428 = vmatprep.mubr.msk.f32.mxu0 %vm3972_vm0, %v3973_v4 }
 0xb14   : > { %v1293_v60 = vpop.f32.mrb[6].mxu0 }
 0xb15   : > { %v1294_v61 = vadd.f32 %v2901_v59, %v1293_v60  ;;  %v3362_v62 = vpop.f32.mrb[7].mxu0  ;;  %v2931_v59 = vld [vmem:[%s4918_s11 + $0x138] sm:$0xff] }
 0xb16   : > { %v3699_v60 = vpack.c.bf16 %v2931_v59, %v2930_v58  ;;  %v2933_v62 = vld [vmem:[%s4918_s11 + $0x148] sm:$0xff] }
 0xb17   : > { %v1297_v63 = vadd.f32 %v1294_v61, %v1106_v24  ;;  %v2932_v61 = vld [vmem:[%s4918_s11 + $0x140] sm:$0xff] }
 0xb19   : > { %v1302_v0 = vsel %vm630_vm2, %v1297_v63, 0.0 }
 0xb1a   : > { %1303 = vadd.xlane.f32.xlu0 %v1302_v0  ;;  %v2934_v0 = vld [vmem:[%s4918_s11 + $0x150] sm:$0xff] }
 0xba7   : > { %v1304_v1 = vpop.xlane.xlu0 %1303 }
 0xba8   : > { %v1305_v3 = vmul.f32 0.03125, %v1304_v1  ;;  %v2935_v1 = vld [vmem:[%s4918_s11 + $0x158] sm:$0xff] }
 0xbaa   : > { %v1306_v5 = vsub.f32 %v1297_v63, %v1305_v3  ;;  %v3702_v63 = vpack.c.bf16 %v2933_v62, %v2932_v61  ;;  %v3705_v3 = vpack.c.bf16 %v2935_v1, %v2934_v0  ;;  %v2957_v61 = vld [vmem:[%s4916_s9 + $0x60] sm:$0xff]  ;;  %v2958_v62 = vld [vmem:[%s4916_s9 + $0x68] sm:$0xff]  ;;  %v2959_v0 = vld [vmem:[%s4916_s9 + $0x70] sm:$0xff] }
 0xbab   : > { %v2960_v1 = vld [vmem:[%s4916_s9 + $0x78] sm:$0xff] }
 0xbac   : > { %v1307_v6 = vmul.f32 %v1306_v5, %v1306_v5 }
 0xbae   : > { %v1308_v7 = vsel %vm630_vm2, %v1307_v6, 0.0  ;;  %v2937_v6 = vld [vmem:[%s4918_s11 + $0x168] sm:$0xff] }
 0xbaf   : > { %1309 = vadd.xlane.f32.xlu1 %v1308_v7 }
 0xc3c   : > { %v1310_v14 = vpop.xlane.xlu1 %1309 }
 0xc3d   : > { %v1311_v15 = vmul.f32 0.03125, %v1310_v14 }
 0xc3f   : > { %v1312_v16 = vadd.f32 1e-05, %v1311_v15 }
 0xc41   : > { %3881 = vrsqrt.f32 %v1312_v16 }
 0xc4b   : > { %v3882_v17 = vpop.eup %3881 }
 0xc4c   : > { %v1314_v19 = vmul.f32 %v3882_v17, %v1306_v5  ;;  %v2936_v5 = vld [vmem:[%s4918_s11 + $0x160] sm:$0xff] }
 0xc4d   : > { %v3708_v7 = vpack.c.bf16 %v2937_v6, %v2936_v5 }
 0xc4e   : > { %v1321_v21 = vmul.f32 %v2904_v18, %v1314_v19 }
 0xc50   : > { %v1328_v22 = vadd.f32 %v2905_v20, %v1321_v21 }
 0xc52   : > { %3372 = vmatmul.mubr.msk.f32.vlgmr.msra.gmra.mrb[6].mxu1 %vm630_vm2, %v1328_v22 }
 0xc53   : > { %3382 = vmatprep.mubr.msk.f32.mxu1 %vm3972_vm0, %v3973_v4  ;;  %3685 = vmatpush3.bf16.msra.mxu1 %v3684_v36  ;;  %v2947_v36 = vld [vmem:[%s4912_s5 + $0x68] sm:$0xff] }
 0xc54   : > { %3686 = vmatprep.subr.bf16.mxu1 %v3971_v2  ;;  %v3714_v37 = vpack.c.bf16 %v2947_v36, %v2946_v35  ;;  %v2978_v35 = vld [vmem:[%s4918_s11 + $0x1f0] sm:$0xff]  ;;  %v2979_v36 = vld [vmem:[%s4918_s11 + $0x1f8] sm:$0xff] }
 0xc56   : > { %3715 = vmatpush3.bf16.msra.mxu0 %v3714_v37  ;;  %v3747_v37 = vpack.c.bf16 %v2979_v36, %v2978_v35  ;;  %v2995_v36 = vld [vmem:[%s4914_s7 + $0x4] ss:$0 sm:$0xff] }
 0xc57   : > { %3688 = vmatpush3.bf16.msra.mxu1 %v3687_v39  ;;  %3716 = vmatprep.subr.bf16.mxu0 %v3971_v2  ;;  %v2949_v39 = vld [vmem:[%s4912_s5 + $0x78] sm:$0xff] }
 0xc58   : > { %3689 = vmatprep.subr.bf16.mxu1 %v3971_v2 }
 0xd25   : > { %v1411_v24 = vpop.f32.mrb[6].mxu1 }
 0xd26   : > { %v1412_v25 = vadd.f32 %v2911_v23, %v1411_v24  ;;  %v3373_v26 = vpop.f32.mrb[7].mxu1  ;;  %v2941_v24 = vld [vmem:[%s4919_s12 + $0x2] ss:$0 sm:$0xff] }
 0xd28   : > { %v1415_v27 = vadd.f32 %v1412_v25, %v1328_v22 }
 0xd2a   : > { %v1420_v28 = vsel %vm630_vm2, %v1415_v27, 0.0 }
 0xd2b   : > { %1421 = vadd.xlane.f32.xlu0 %v1420_v28 }
 0xdb8   : > { %v1422_v29 = vpop.xlane.xlu0 %1421 }
 0xdb9   : > { %v1423_v30 = vmul.f32 0.03125, %v1422_v29 }
 0xdbb   : > { %v1424_v31 = vsub.f32 %v1415_v27, %v1423_v30 }
 0xdbd   : > { %v1425_v32 = vmul.f32 %v1424_v31, %v1424_v31 }
 0xdbf   : > { %v1426_v33 = vsel %vm630_vm2, %v1425_v32, 0.0 }
 0xdc0   : > { %1427 = vadd.xlane.f32.xlu1 %v1426_v33 }
 0xe4d   : > { %v1428_v40 = vpop.xlane.xlu1 %1427 }
 0xe4e   : > { %v1429_v41 = vmul.f32 0.03125, %v1428_v40  ;;  %v3717_v40 = vpack.c.bf16 %v2949_v39, %v2948_v38  ;;  %v2962_v38 = vld [vmem:[%s4917_s10 + $0x3] ss:$0 sm:$0xff] }
 0xe50   : > { %v1430_v42 = vadd.f32 1e-05, %v1429_v41  ;;  %3718 = vmatpush3.bf16.msra.mxu0 %v3717_v40 }
 0xe51   : > { %3719 = vmatprep.subr.bf16.mxu0 %v3971_v2 }
 0xe52   : > { %3883 = vrsqrt.f32 %v1430_v42 }
 0xe5c   : > { %v3884_v43 = vpop.eup %3883 }
 0xe5d   : > { %v1432_v45 = vmul.f32 %v3884_v43, %v1424_v31 }
 0xe5f   : > { %v1439_v49 = vmul.f32 %v2915_v44, %v1432_v45  ;;  %v2944_v45 = vld [vmem:[%s4920_s13 + $0x2] ss:$0 sm:$0xff] }
 0xe61   : > { %v1446_v51 = vadd.f32 %v2916_v48, %v1439_v49 }
 0xe63   : > { %3383 = vmatmul.mubr.msk.f32.vlgmr.msra.gmra.mrb[8].mxu1 %vm630_vm2, %v1446_v51 }
 0xe64   : > { %3691 = vmatpush3.bf16.msra.mxu1 %v3690_v50  ;;  %3417 = vmatprep.mubr.msk.f32.mxu1 %vm3972_vm0, %v3973_v4  ;;  %v2951_v50 = vld [vmem:[%s4913_s6 + $0x3] ss:$0 sm:$0xff] }
 0xe65   : > { %3692 = vmatprep.subr.bf16.mxu1 %v3971_v2 }
 0xe68   : > { %3694 = vmatpush3.bf16.msra.mxu1 %v3693_v54 }
 0xe69   : > { %3695 = vmatprep.subr.bf16.mxu1 %v3971_v2 }
 0xe6c   : > { %3697 = vmatpush3.bf16.msra.mxu1 %v3696_v57 }
 0xe6d   : > { %3698 = vmatprep.subr.bf16.mxu1 %v3971_v2 }
 0xe70   : > { %3700 = vmatpush3.bf16.msra.mxu1 %v3699_v60 }
 0xe71   : > { %3701 = vmatprep.subr.bf16.mxu1 %v3971_v2 }
 0xe74   : > { %3703 = vmatpush3.bf16.msra.mxu1 %v3702_v63  ;;  %v3720_v63 = vpack.c.bf16 %v2958_v62, %v2957_v61  ;;  %v2986_v62 = vld [vmem:[%s4912_s5 + $0x80] sm:$0xff] }
 0xe75   : > { %3704 = vmatprep.subr.bf16.mxu1 %v3971_v2 }
 0xe78   : > { %3706 = vmatpush3.bf16.msra.mxu1 %v3705_v3  ;;  %v3723_v3 = vpack.c.bf16 %v2960_v1, %v2959_v0  ;;  %v2988_v1 = vld [vmem:[%s4912_s5 + $0x90] sm:$0xff] }
 0xe79   : > { %3707 = vmatprep.subr.bf16.mxu1 %v3971_v2 }
 0xe7c   : > { %3709 = vmatpush3.bf16.msra.mxu1 %v3708_v7 }
 0xe7d   : > { %3710 = vmatprep.subr.bf16.mxu1 %v3971_v2 }
 0xe80   : > { %3712 = vmatpush3.bf16.msra.mxu1 %v3711_v10 }
 0xe81   : > { %3749 = vmatprep.subr.bf16.mxu1 %v3971_v2 }
 0xf36   : > { %v1529_v12 = vpop.f32.mrb[8].mxu1 }
 0xf37   : > { %v1530_v13 = vadd.f32 %v2922_v11, %v1529_v12  ;;  %v3384_v14 = vpop.f32.mrb[9].mxu1  ;;  %v2964_v11 = vld [vmem:[%s4918_s11 + $0x180] sm:$0xff]  ;;  %v2965_v12 = vld [vmem:[%s4918_s11 + $0x188] sm:$0xff] }
 0xf39   : > { %v1534_v15 = vmul.f32 %v1530_v13, %v1530_v13  ;;  %v1533_v21 = vmul.f32 0.5, %v1530_v13 }
 0xf3b   : > { %v1535_v16 = vmul.f32 %v1534_v15, %v1530_v13  ;;  %v3726_v15 = vpack.c.bf16 %v2965_v12, %v2964_v11  ;;  %v2985_v12 = vld [vmem:[%s4921_s14 + $0x3] ss:$0 sm:$0xff] }
 0xf3d   : > { %v1536_v17 = vmul.f32 0.044715, %v1535_v16 }
 0xf3f   : > { %v1537_v18 = vadd.f32 %v1536_v17, %v1530_v13  ;;  %v2956_v13 = vld [vmem:[%s4915_s8 + $0x3] ss:$0 sm:$0xff]  ;;  %v2966_v17 = vld [vmem:[%s4918_s11 + $0x190] sm:$0xff] }
 0xf41   : > { %v1538_v19 = vmul.f32 0.7978846, %v1537_v18  ;;  %v2967_v18 = vld [vmem:[%s4918_s11 + $0x198] sm:$0xff] }
 0xf43   : > { %3885 = vtanh.f32 %v1538_v19  ;;  %v3729_v19 = vpack.c.bf16 %v2967_v18, %v2966_v17 }
 0xf4d   : > { %v3886_v20 = vpop.eup %3885 }
 0xf4e   : > { %v1540_v22 = vadd.f32 1.0, %v3886_v20  ;;  %v2968_v20 = vld [vmem:[%s4918_s11 + $0x1a0] sm:$0xff] }
 0xf50   : > { %v1541_v23 = vmul.f32 %v1540_v22, %v1533_v21  ;;  %v2969_v21 = vld [vmem:[%s4918_s11 + $0x1a8] sm:$0xff] }
 0xf51   : > { %v3732_v22 = vpack.c.bf16 %v2969_v21, %v2968_v20 }
 0xf52   : > { %3418 = vmatmul.mubr.f32.vlgmr.msra.gmra.mrb[10].mxu1 %v1541_v23  ;;  %v2970_v23 = vld [vmem:[%s4918_s11 + $0x1b0] sm:$0xff] }
 0xf53   : > { %3485 = vmatprep.mubr.msk.f32.mxu1 %vm3972_vm0, %v3973_v4 }
0x1025   : > { %v1633_v25 = vpop.f32.mrb[10].mxu1 }
0x1026   : > { %v1634_v26 = vadd.f32 %v2941_v24, %v1633_v25  ;;  %v3419_v27 = vpop.f32.mrb[11].mxu1  ;;  %v2971_v24 = vld [vmem:[%s4918_s11 + $0x1b8] sm:$0xff] }
0x1027   : > { %v3735_v25 = vpack.c.bf16 %v2971_v24, %v2970_v23  ;;  %v2973_v27 = vld [vmem:[%s4918_s11 + $0x1c8] sm:$0xff] }
0x1028   : > { %v1637_v28 = vadd.f32 %v1634_v26, %v1446_v51  ;;  %v2972_v26 = vld [vmem:[%s4918_s11 + $0x1c0] sm:$0xff] }
0x102a   : > { %v1642_v29 = vsel %vm630_vm2, %v1637_v28, 0.0 }
0x102b   : > { %1643 = vadd.xlane.f32.xlu0 %v1642_v29  ;;  %v2974_v29 = vld [vmem:[%s4918_s11 + $0x1d0] sm:$0xff] }
0x10b8   : > { %v1644_v30 = vpop.xlane.xlu0 %1643 }
0x10b9   : > { %v1645_v31 = vmul.f32 0.03125, %v1644_v30  ;;  %v2975_v30 = vld [vmem:[%s4918_s11 + $0x1d8] sm:$0xff] }
0x10bb   : > { %v1646_v32 = vsub.f32 %v1637_v28, %v1645_v31  ;;  %v3738_v28 = vpack.c.bf16 %v2973_v27, %v2972_v26  ;;  %v3741_v31 = vpack.c.bf16 %v2975_v30, %v2974_v29  ;;  %v2997_v26 = vld [vmem:[%s4916_s9 + $0x80] sm:$0xff]  ;;  %v2998_v27 = vld [vmem:[%s4916_s9 + $0x88] sm:$0xff]  ;;  %v2999_v29 = vld [vmem:[%s4916_s9 + $0x90] sm:$0xff] }
0x10bc   : > { %v3000_v30 = vld [vmem:[%s4916_s9 + $0x98] sm:$0xff] }
0x10bd   : > { %v1647_v33 = vmul.f32 %v1646_v32, %v1646_v32 }
0x10bf   : > { %v1648_v34 = vsel %vm630_vm2, %v1647_v33, 0.0  ;;  %v2977_v33 = vld [vmem:[%s4918_s11 + $0x1e8] sm:$0xff] }
0x10c0   : > { %1649 = vadd.xlane.f32.xlu1 %v1648_v34 }
0x114d   : > { %v1650_v41 = vpop.xlane.xlu1 %1649 }
0x114e   : > { %v1651_v42 = vmul.f32 0.03125, %v1650_v41 }
0x1150   : > { %v1652_v43 = vadd.f32 1e-05, %v1651_v42 }
0x1152   : > { %3887 = vrsqrt.f32 %v1652_v43 }
0x115c   : > { %v3888_v44 = vpop.eup %3887 }
0x115d   : > { %v1654_v46 = vmul.f32 %v3888_v44, %v1646_v32  ;;  %v2976_v32 = vld [vmem:[%s4918_s11 + $0x1e0] sm:$0xff] }
0x115e   : > { %v3744_v34 = vpack.c.bf16 %v2977_v33, %v2976_v32 }
0x115f   : > { %v1661_v48 = vmul.f32 %v2944_v45, %v1654_v46 }
0x1161   : > { %v1668_v49 = vadd.f32 %v2945_v47, %v1661_v48 }
0x1163   : > { %3429 = vmatmul.mubr.msk.f32.vlgmr.msra.gmra.mrb[8].mxu0 %vm630_vm2, %v1668_v49 }
0x1164   : > { %3439 = vmatprep.mubr.msk.f32.mxu0 %vm3972_vm0, %v3973_v4  ;;  %3721 = vmatpush3.bf16.msra.mxu0 %v3720_v63  ;;  %v2987_v63 = vld [vmem:[%s4912_s5 + $0x88] sm:$0xff] }
0x1165   : > { %3722 = vmatprep.subr.bf16.mxu0 %v3971_v2  ;;  %v3750_v0 = vpack.c.bf16 %v2987_v63, %v2986_v62  ;;  %v3018_v62 = vld [vmem:[%s4918_s11 + $0x270] sm:$0xff]  ;;  %v3019_v63 = vld [vmem:[%s4918_s11 + $0x278] sm:$0xff] }
0x1167   : > { %3751 = vmatpush3.bf16.msra.mxu1 %v3750_v0  ;;  %v3783_v0 = vpack.c.bf16 %v3019_v63, %v3018_v62  ;;  %v3035_v63 = vld [vmem:[%s4914_s7 + $0x5] ss:$0 sm:$0xff] }
0x1168   : > { %3724 = vmatpush3.bf16.msra.mxu0 %v3723_v3  ;;  %3752 = vmatprep.subr.bf16.mxu1 %v3971_v2  ;;  %v2989_v3 = vld [vmem:[%s4912_s5 + $0x98] sm:$0xff] }
0x1169   : > { %3725 = vmatprep.subr.bf16.mxu0 %v3971_v2 }
0x1236   : > { %v1751_v51 = vpop.f32.mrb[8].mxu0 }
0x1237   : > { %v1752_v52 = vadd.f32 %v2951_v50, %v1751_v51  ;;  %v3430_v53 = vpop.f32.mrb[9].mxu0  ;;  %v2981_v51 = vld [vmem:[%s4919_s12 + $0x3] ss:$0 sm:$0xff] }
0x1239   : > { %v1755_v54 = vadd.f32 %v1752_v52, %v1668_v49 }
0x123b   : > { %v1760_v55 = vsel %vm630_vm2, %v1755_v54, 0.0 }
0x123c   : > { %1761 = vadd.xlane.f32.xlu0 %v1760_v55 }
0x12c9   : > { %v1762_v56 = vpop.xlane.xlu0 %1761 }
0x12ca   : > { %v1763_v57 = vmul.f32 0.03125, %v1762_v56 }
0x12cc   : > { %v1764_v58 = vsub.f32 %v1755_v54, %v1763_v57 }
0x12ce   : > { %v1765_v59 = vmul.f32 %v1764_v58, %v1764_v58 }
0x12d0   : > { %v1766_v60 = vsel %vm630_vm2, %v1765_v59, 0.0 }
0x12d1   : > { %1767 = vadd.xlane.f32.xlu1 %v1766_v60 }
0x135e   : > { %v1768_v5 = vpop.xlane.xlu1 %1767 }
0x135f   : > { %v1769_v6 = vmul.f32 0.03125, %v1768_v5  ;;  %v3753_v5 = vpack.c.bf16 %v2989_v3, %v2988_v1  ;;  %v3002_v1 = vld [vmem:[%s4917_s10 + $0x4] ss:$0 sm:$0xff] }
0x1361   : > { %v1770_v7 = vadd.f32 1e-05, %v1769_v6  ;;  %3754 = vmatpush3.bf16.msra.mxu1 %v3753_v5 }
0x1362   : > { %3755 = vmatprep.subr.bf16.mxu1 %v3971_v2 }
0x1363   : > { %3889 = vrsqrt.f32 %v1770_v7 }
0x136d   : > { %v3890_v8 = vpop.eup %3889 }
0x136e   : > { %v1772_v10 = vmul.f32 %v3890_v8, %v1764_v58 }
0x1370   : > { %v1779_v14 = vmul.f32 %v2955_v9, %v1772_v10  ;;  %v2984_v10 = vld [vmem:[%s4920_s13 + $0x3] ss:$0 sm:$0xff] }
0x1372   : > { %v1786_v16 = vadd.f32 %v2956_v13, %v1779_v14 }
0x1374   : > { %3440 = vmatmul.mubr.msk.f32.vlgmr.msra.gmra.mrb[10].mxu0 %vm630_vm2, %v1786_v16 }
0x1375   : > { %3727 = vmatpush3.bf16.msra.mxu0 %v3726_v15  ;;  %3474 = vmatprep.mubr.msk.f32.mxu0 %vm3972_vm0, %v3973_v4  ;;  %v2991_v15 = vld [vmem:[%s4913_s6 + $0x4] ss:$0 sm:$0xff] }
0x1376   : > { %3728 = vmatprep.subr.bf16.mxu0 %v3971_v2 }
0x1379   : > { %3730 = vmatpush3.bf16.msra.mxu0 %v3729_v19 }
0x137a   : > { %3731 = vmatprep.subr.bf16.mxu0 %v3971_v2 }
0x137d   : > { %3733 = vmatpush3.bf16.msra.mxu0 %v3732_v22 }
0x137e   : > { %3734 = vmatprep.subr.bf16.mxu0 %v3971_v2 }
0x1381   : > { %3736 = vmatpush3.bf16.msra.mxu0 %v3735_v25 }
0x1382   : > { %3737 = vmatprep.subr.bf16.mxu0 %v3971_v2 }
0x1385   : > { %3739 = vmatpush3.bf16.msra.mxu0 %v3738_v28  ;;  %v3756_v28 = vpack.c.bf16 %v2998_v27, %v2997_v26  ;;  %v3026_v27 = vld [vmem:[%s4912_s5 + $0xa0] sm:$0xff] }
0x1386   : > { %3740 = vmatprep.subr.bf16.mxu0 %v3971_v2 }
0x1389   : > { %3742 = vmatpush3.bf16.msra.mxu0 %v3741_v31  ;;  %v3759_v31 = vpack.c.bf16 %v3000_v30, %v2999_v29  ;;  %v3028_v30 = vld [vmem:[%s4912_s5 + $0xb0] sm:$0xff] }
0x138a   : > { %3743 = vmatprep.subr.bf16.mxu0 %v3971_v2 }
0x138d   : > { %3745 = vmatpush3.bf16.msra.mxu0 %v3744_v34 }
0x138e   : > { %3746 = vmatprep.subr.bf16.mxu0 %v3971_v2 }
0x1391   : > { %3748 = vmatpush3.bf16.msra.mxu0 %v3747_v37 }
0x1392   : > { %3785 = vmatprep.subr.bf16.mxu0 %v3971_v2 }
0x1447   : > { %v1869_v39 = vpop.f32.mrb[10].mxu0 }
0x1448   : > { %v1870_v40 = vadd.f32 %v2962_v38, %v1869_v39  ;;  %v3441_v41 = vpop.f32.mrb[11].mxu0  ;;  %v3004_v38 = vld [vmem:[%s4918_s11 + $0x200] sm:$0xff]  ;;  %v3005_v39 = vld [vmem:[%s4918_s11 + $0x208] sm:$0xff] }
0x144a   : > { %v1874_v42 = vmul.f32 %v1870_v40, %v1870_v40  ;;  %v1873_v48 = vmul.f32 0.5, %v1870_v40 }
0x144c   : > { %v1875_v43 = vmul.f32 %v1874_v42, %v1870_v40  ;;  %v3762_v42 = vpack.c.bf16 %v3005_v39, %v3004_v38  ;;  %v3025_v39 = vld [vmem:[%s4921_s14 + $0x4] ss:$0 sm:$0xff] }
0x144e   : > { %v1876_v44 = vmul.f32 0.044715, %v1875_v43 }
0x1450   : > { %v1877_v45 = vadd.f32 %v1876_v44, %v1870_v40  ;;  %v2996_v40 = vld [vmem:[%s4915_s8 + $0x4] ss:$0 sm:$0xff]  ;;  %v3006_v44 = vld [vmem:[%s4918_s11 + $0x210] sm:$0xff] }
0x1452   : > { %v1878_v46 = vmul.f32 0.7978846, %v1877_v45  ;;  %v3007_v45 = vld [vmem:[%s4918_s11 + $0x218] sm:$0xff] }
0x1454   : > { %3891 = vtanh.f32 %v1878_v46  ;;  %v3765_v46 = vpack.c.bf16 %v3007_v45, %v3006_v44 }
0x145e   : > { %v3892_v47 = vpop.eup %3891 }
0x145f   : > { %v1880_v49 = vadd.f32 1.0, %v3892_v47  ;;  %v3008_v47 = vld [vmem:[%s4918_s11 + $0x220] sm:$0xff] }
0x1461   : > { %v1881_v50 = vmul.f32 %v1880_v49, %v1873_v48  ;;  %v3009_v48 = vld [vmem:[%s4918_s11 + $0x228] sm:$0xff] }
0x1462   : > { %v3768_v49 = vpack.c.bf16 %v3009_v48, %v3008_v47 }
0x1463   : > { %3475 = vmatmul.mubr.f32.vlgmr.msra.gmra.mrb[12].mxu0 %v1881_v50  ;;  %v3010_v50 = vld [vmem:[%s4918_s11 + $0x230] sm:$0xff] }
0x1464   : > { %3542 = vmatprep.mubr.msk.f32.mxu0 %vm3972_vm0, %v3973_v4 }
0x1536   : > { %v1973_v52 = vpop.f32.mrb[12].mxu0 }
0x1537   : > { %v1974_v53 = vadd.f32 %v2981_v51, %v1973_v52  ;;  %v3476_v54 = vpop.f32.mrb[13].mxu0  ;;  %v3011_v51 = vld [vmem:[%s4918_s11 + $0x238] sm:$0xff] }
0x1538   : > { %v3771_v52 = vpack.c.bf16 %v3011_v51, %v3010_v50  ;;  %v3013_v54 = vld [vmem:[%s4918_s11 + $0x248] sm:$0xff] }
0x1539   : > { %v1977_v55 = vadd.f32 %v1974_v53, %v1786_v16  ;;  %v3012_v53 = vld [vmem:[%s4918_s11 + $0x240] sm:$0xff] }
0x153b   : > { %v1982_v56 = vsel %vm630_vm2, %v1977_v55, 0.0 }
0x153c   : > { %1983 = vadd.xlane.f32.xlu0 %v1982_v56  ;;  %v3014_v56 = vld [vmem:[%s4918_s11 + $0x250] sm:$0xff] }
0x15c9   : > { %v1984_v57 = vpop.xlane.xlu0 %1983 }
0x15ca   : > { %v1985_v58 = vmul.f32 0.03125, %v1984_v57  ;;  %v3015_v57 = vld [vmem:[%s4918_s11 + $0x258] sm:$0xff] }
0x15cc   : > { %v1986_v59 = vsub.f32 %v1977_v55, %v1985_v58  ;;  %v3774_v55 = vpack.c.bf16 %v3013_v54, %v3012_v53  ;;  %v3777_v58 = vpack.c.bf16 %v3015_v57, %v3014_v56  ;;  %v3037_v53 = vld [vmem:[%s4916_s9 + $0xa0] sm:$0xff]  ;;  %v3038_v54 = vld [vmem:[%s4916_s9 + $0xa8] sm:$0xff]  ;;  %v3039_v56 = vld [vmem:[%s4916_s9 + $0xb0] sm:$0xff] }
0x15cd   : > { %v3040_v57 = vld [vmem:[%s4916_s9 + $0xb8] sm:$0xff] }
0x15ce   : > { %v1987_v60 = vmul.f32 %v1986_v59, %v1986_v59 }
0x15d0   : > { %v1988_v61 = vsel %vm630_vm2, %v1987_v60, 0.0  ;;  %v3017_v60 = vld [vmem:[%s4918_s11 + $0x268] sm:$0xff] }
0x15d1   : > { %1989 = vadd.xlane.f32.xlu1 %v1988_v61 }
0x165e   : > { %v1990_v6 = vpop.xlane.xlu1 %1989 }
0x165f   : > { %v1991_v7 = vmul.f32 0.03125, %v1990_v6 }
0x1661   : > { %v1992_v8 = vadd.f32 1e-05, %v1991_v7 }
0x1663   : > { %3893 = vrsqrt.f32 %v1992_v8 }
0x166d   : > { %v3894_v9 = vpop.eup %3893 }
0x166e   : > { %v1994_v11 = vmul.f32 %v3894_v9, %v1986_v59  ;;  %v3016_v59 = vld [vmem:[%s4918_s11 + $0x260] sm:$0xff] }
0x166f   : > { %v3780_v61 = vpack.c.bf16 %v3017_v60, %v3016_v59 }
0x1670   : > { %v2001_v13 = vmul.f32 %v2984_v10, %v1994_v11 }
0x1672   : > { %v2008_v14 = vadd.f32 %v2985_v12, %v2001_v13 }
0x1674   : > { %3486 = vmatmul.mubr.msk.f32.vlgmr.msra.gmra.mrb[12].mxu1 %vm630_vm2, %v2008_v14 }
0x1675   : > { %3496 = vmatprep.mubr.msk.f32.mxu1 %vm3972_vm0, %v3973_v4  ;;  %3757 = vmatpush3.bf16.msra.mxu1 %v3756_v28  ;;  %v3027_v28 = vld [vmem:[%s4912_s5 + $0xa8] sm:$0xff] }
0x1676   : > { %3758 = vmatprep.subr.bf16.mxu1 %v3971_v2  ;;  %v3786_v29 = vpack.c.bf16 %v3027_v28, %v3026_v27  ;;  %v3059_v27 = vld [vmem:[%s4918_s11 + $0x2f8] sm:$0xff] }
0x1678   : > { %3787 = vmatpush3.bf16.msra.mxu0 %v3786_v29  ;;  %v3042_v29 = vld [vmem:[%s4917_s10 + $0x5] ss:$0 sm:$0xff] }
0x1679   : > { %3760 = vmatpush3.bf16.msra.mxu1 %v3759_v31  ;;  %3788 = vmatprep.subr.bf16.mxu0 %v3971_v2  ;;  %v3029_v31 = vld [vmem:[%s4912_s5 + $0xb8] sm:$0xff] }
0x167a   : > { %3761 = vmatprep.subr.bf16.mxu1 %v3971_v2 }
0x1747   : > { %v2091_v16 = vpop.f32.mrb[12].mxu1 }
0x1748   : > { %v2092_v17 = vadd.f32 %v2991_v15, %v2091_v16  ;;  %v3487_v18 = vpop.f32.mrb[13].mxu1  ;;  %v3021_v16 = vld [vmem:[%s4919_s12 + $0x4] ss:$0 sm:$0xff] }
0x174a   : > { %v2095_v19 = vadd.f32 %v2092_v17, %v2008_v14 }
0x174c   : > { %v2100_v20 = vsel %vm630_vm2, %v2095_v19, 0.0 }
0x174d   : > { %2101 = vadd.xlane.f32.xlu0 %v2100_v20 }
0x17da   : > { %v2102_v21 = vpop.xlane.xlu0 %2101 }
0x17db   : > { %v2103_v22 = vmul.f32 0.03125, %v2102_v21 }
0x17dd   : > { %v2104_v23 = vsub.f32 %v2095_v19, %v2103_v22 }
0x17df   : > { %v2105_v24 = vmul.f32 %v2104_v23, %v2104_v23 }
0x17e1   : > { %v2106_v25 = vsel %vm630_vm2, %v2105_v24, 0.0 }
0x17e2   : > { %2107 = vadd.xlane.f32.xlu1 %v2106_v25 }
0x186f   : > { %v2108_v32 = vpop.xlane.xlu1 %2107 }
0x1870   : > { %v2109_v33 = vmul.f32 0.03125, %v2108_v32  ;;  %v3789_v32 = vpack.c.bf16 %v3029_v31, %v3028_v30 }
0x1872   : > { %v2110_v34 = vadd.f32 1e-05, %v2109_v33  ;;  %3790 = vmatpush3.bf16.msra.mxu0 %v3789_v32 }
0x1873   : > { %3791 = vmatprep.subr.bf16.mxu0 %v3971_v2 }
0x1874   : > { %3895 = vrsqrt.f32 %v2110_v34 }
0x187e   : > { %v3896_v35 = vpop.eup %3895 }
0x187f   : > { %v2112_v37 = vmul.f32 %v3896_v35, %v2104_v23 }
0x1881   : > { %v2119_v41 = vmul.f32 %v2995_v36, %v2112_v37  ;;  %v3024_v37 = vld [vmem:[%s4920_s13 + $0x4] ss:$0 sm:$0xff] }
0x1883   : > { %v2126_v43 = vadd.f32 %v2996_v40, %v2119_v41 }
0x1885   : > { %3497 = vmatmul.mubr.msk.f32.vlgmr.msra.gmra.mrb[14].mxu1 %vm630_vm2, %v2126_v43 }
0x1886   : > { %3763 = vmatpush3.bf16.msra.mxu1 %v3762_v42  ;;  %3531 = vmatprep.mubr.msk.f32.mxu1 %vm3972_vm0, %v3973_v4  ;;  %v3031_v42 = vld [vmem:[%s4913_s6 + $0x5] ss:$0 sm:$0xff] }
0x1887   : > { %3764 = vmatprep.subr.bf16.mxu1 %v3971_v2 }
0x188a   : > { %3766 = vmatpush3.bf16.msra.mxu1 %v3765_v46 }
0x188b   : > { %3767 = vmatprep.subr.bf16.mxu1 %v3971_v2 }
0x188e   : > { %3769 = vmatpush3.bf16.msra.mxu1 %v3768_v49 }
0x188f   : > { %3770 = vmatprep.subr.bf16.mxu1 %v3971_v2 }
0x1892   : > { %3772 = vmatpush3.bf16.msra.mxu1 %v3771_v52 }
0x1893   : > { %3773 = vmatprep.subr.bf16.mxu1 %v3971_v2 }
0x1896   : > { %3775 = vmatpush3.bf16.msra.mxu1 %v3774_v55  ;;  %v3792_v55 = vpack.c.bf16 %v3038_v54, %v3037_v53  ;;  %v2689_v53 = vld [vmem:[%s4922_s15] sm:$0xff]  ;;  %v2690_v54 = vld [vmem:[%s4922_s15 + $0x8] sm:$0xff] }
0x1897   : > { %3776 = vmatprep.subr.bf16.mxu1 %v3971_v2 }
0x189a   : > { %3778 = vmatpush3.bf16.msra.mxu1 %v3777_v58  ;;  %v3795_v58 = vpack.c.bf16 %v3040_v57, %v3039_v56  ;;  %v2691_v56 = vld [vmem:[%s4922_s15 + $0x10] sm:$0xff]  ;;  %v2692_v57 = vld [vmem:[%s4922_s15 + $0x18] sm:$0xff] }
0x189b   : > { %3779 = vmatprep.subr.bf16.mxu1 %v3971_v2 }
0x189e   : > { %3781 = vmatpush3.bf16.msra.mxu1 %v3780_v61 }
0x189f   : > { %3782 = vmatprep.subr.bf16.mxu1 %v3971_v2 }
0x18a2   : > { %3784 = vmatpush3.bf16.msra.mxu1 %v3783_v0 }
0x18a3   : > { %3821 = vmatprep.subr.bf16.mxu1 %v3971_v2 }
0x1958   : > { %v2209_v3 = vpop.f32.mrb[14].mxu1 }
0x1959   : > { %v2210_v5 = vadd.f32 %v3002_v1, %v2209_v3  ;;  %v3498_v6 = vpop.f32.mrb[15].mxu1  ;;  %v3044_v1 = vld [vmem:[%s4918_s11 + $0x280] sm:$0xff]  ;;  %v3045_v3 = vld [vmem:[%s4918_s11 + $0x288] sm:$0xff] }
0x195b   : > { %v2214_v7 = vmul.f32 %v2210_v5, %v2210_v5  ;;  %v2213_v13 = vmul.f32 0.5, %v2210_v5 }
0x195d   : > { %v2215_v8 = vmul.f32 %v2214_v7, %v2210_v5  ;;  %v3798_v7 = vpack.c.bf16 %v3045_v3, %v3044_v1 }
0x195f   : > { %v2216_v9 = vmul.f32 0.044715, %v2215_v8 }
0x1961   : > { %v2217_v10 = vadd.f32 %v2216_v9, %v2210_v5  ;;  %v3036_v5 = vld [vmem:[%s4915_s8 + $0x5] ss:$0 sm:$0xff]  ;;  %v3046_v9 = vld [vmem:[%s4918_s11 + $0x290] sm:$0xff] }
0x1963   : > { %v2218_v11 = vmul.f32 0.7978846, %v2217_v10  ;;  %v3047_v10 = vld [vmem:[%s4918_s11 + $0x298] sm:$0xff] }
0x1965   : > { %3897 = vtanh.f32 %v2218_v11  ;;  %v3801_v11 = vpack.c.bf16 %v3047_v10, %v3046_v9 }
0x196f   : > { %v3898_v12 = vpop.eup %3897 }
0x1970   : > { %v2220_v14 = vadd.f32 1.0, %v3898_v12  ;;  %v3048_v12 = vld [vmem:[%s4918_s11 + $0x2a0] sm:$0xff] }
0x1972   : > { %v2221_v15 = vmul.f32 %v2220_v14, %v2213_v13  ;;  %v3050_v14 = vld [vmem:[%s4918_s11 + $0x2b0] sm:$0xff] }
0x1974   : > { %3532 = vmatmul.mubr.f32.vlgmr.msra.gmra.mrb[16].mxu1 %v2221_v15  ;;  %v3051_v15 = vld [vmem:[%s4918_s11 + $0x2b8] sm:$0xff] }
0x1975   : > { %3599 = vmatprep.mubr.msk.f32.mxu1 %vm3972_vm0, %v3973_v4 }
0x1a47   : > { %v2313_v17 = vpop.f32.mrb[16].mxu1 }
0x1a48   : > { %v2314_v18 = vadd.f32 %v3021_v16, %v2313_v17  ;;  %v3533_v19 = vpop.f32.mrb[17].mxu1  ;;  %v3807_v16 = vpack.c.bf16 %v3051_v15, %v3050_v14  ;;  %v3052_v17 = vld [vmem:[%s4918_s11 + $0x2c0] sm:$0xff] }
0x1a4a   : > { %v2317_v20 = vadd.f32 %v2314_v18, %v2126_v43  ;;  %v3053_v18 = vld [vmem:[%s4918_s11 + $0x2c8] sm:$0xff] }
0x1a4b   : > { %v3810_v19 = vpack.c.bf16 %v3053_v18, %v3052_v17 }
0x1a4c   : > { %v2322_v21 = vsel %vm630_vm2, %v2317_v20, 0.0 }
0x1a4d   : > { %2323 = vadd.xlane.f32.xlu0 %v2322_v21  ;;  %v3055_v21 = vld [vmem:[%s4918_s11 + $0x2d8] sm:$0xff] }
0x1ada   : > { %v2324_v22 = vpop.xlane.xlu0 %2323 }
0x1adb   : > { %v2325_v23 = vmul.f32 0.03125, %v2324_v22 }
0x1add   : > { %v2326_v24 = vsub.f32 %v2317_v20, %v2325_v23  ;;  %v3054_v20 = vld [vmem:[%s4918_s11 + $0x2d0] sm:$0xff]  ;;  %v3056_v23 = vld [vmem:[%s4918_s11 + $0x2e0] sm:$0xff] }
0x1ade   : > { %v3813_v22 = vpack.c.bf16 %v3055_v21, %v3054_v20 }
0x1adf   : > { %v2327_v25 = vmul.f32 %v2326_v24, %v2326_v24 }
0x1ae1   : > { %v2328_v26 = vsel %vm630_vm2, %v2327_v25, 0.0 }
0x1ae2   : > { %2329 = vadd.xlane.f32.xlu1 %v2328_v26  ;;  %v3058_v26 = vld [vmem:[%s4918_s11 + $0x2f0] sm:$0xff] }
0x1ae3   : > { %v3819_v28 = vpack.c.bf16 %v3059_v27, %v3058_v26 }
0x1b6f   : > { %v2330_v33 = vpop.xlane.xlu1 %2329 }
0x1b70   : > { %v2331_v34 = vmul.f32 0.03125, %v2330_v33 }
0x1b72   : > { %v2332_v35 = vadd.f32 1e-05, %v2331_v34 }
0x1b74   : > { %3899 = vrsqrt.f32 %v2332_v35 }
0x1b7e   : > { %v3900_v36 = vpop.eup %3899 }
0x1b7f   : > { %v2334_v38 = vmul.f32 %v3900_v36, %v2326_v24  ;;  %v3057_v24 = vld [vmem:[%s4918_s11 + $0x2e8] sm:$0xff] }
0x1b80   : > { %v3816_v25 = vpack.c.bf16 %v3057_v24, %v3056_v23 }
0x1b81   : > { %v2341_v40 = vmul.f32 %v3024_v37, %v2334_v38 }
0x1b83   : > { %v2348_v41 = vadd.f32 %v3025_v39, %v2341_v40 }
0x1b85   : > { %3543 = vmatmul.mubr.msk.f32.vlgmr.msra.gmra.mrb[14].mxu0 %vm630_vm2, %v2348_v41 }
0x1b86   : > { %3553 = vmatprep.mubr.msk.f32.mxu0 %vm3972_vm0, %v3973_v4  ;;  %3793 = vmatpush3.bf16.msra.mxu0 %v3792_v55  ;;  %v3822_v55 = vpack.c.bf16 %v2690_v54, %v2689_v53 }
0x1b87   : > { %3794 = vmatprep.subr.bf16.mxu0 %v3971_v2 }
0x1b88   : > { %3823 = vmatpush3.bf16.msra.mxu1 %v3822_v55 }
0x1b89   : > { %3824 = vmatprep.subr.bf16.mxu1 %v3971_v2 }
0x1b8a   : > { %3796 = vmatpush3.bf16.msra.mxu0 %v3795_v58  ;;  %v3825_v58 = vpack.c.bf16 %v2692_v57, %v2691_v56 }
0x1b8b   : > { %3797 = vmatprep.subr.bf16.mxu0 %v3971_v2 }
0x1b8c   : > { %3826 = vmatpush3.bf16.msra.mxu1 %v3825_v58 }
0x1c58   : > { %v2431_v43 = vpop.f32.mrb[14].mxu0 }
0x1c59   : > { %v2432_v44 = vadd.f32 %v3031_v42, %v2431_v43  ;;  %v3544_v45 = vpop.f32.mrb[15].mxu0  ;;  %v3061_v42 = vld [vmem:[%s4919_s12 + $0x5] ss:$0 sm:$0xff] }
0x1c5b   : > { %v2435_v46 = vadd.f32 %v2432_v44, %v2348_v41 }
0x1c5d   : > { %v2440_v47 = vsel %vm630_vm2, %v2435_v46, 0.0 }
0x1c5e   : > { %2441 = vadd.xlane.f32.xlu0 %v2440_v47 }
0x1ceb   : > { %v2442_v48 = vpop.xlane.xlu0 %2441 }
0x1cec   : > { %v2443_v49 = vmul.f32 0.03125, %v2442_v48 }
0x1cee   : > { %v2444_v50 = vsub.f32 %v2435_v46, %v2443_v49 }
0x1cf0   : > { %v2445_v51 = vmul.f32 %v2444_v50, %v2444_v50 }
0x1cf2   : > { %v2446_v52 = vsel %vm630_vm2, %v2445_v51, 0.0 }
0x1cf3   : > { %2447 = vadd.xlane.f32.xlu1 %v2446_v52 }
0x1d80   : > { %v2448_v59 = vpop.xlane.xlu1 %2447 }
0x1d81   : > { %v2449_v60 = vmul.f32 0.03125, %v2448_v59 }
0x1d83   : > { %v2450_v61 = vadd.f32 1e-05, %v2449_v60 }
0x1d85   : > { %3901 = vrsqrt.f32 %v2450_v61 }
0x1d8f   : > { %v3902_v62 = vpop.eup %3901 }
0x1d90   : > { %v2452_v0 = vmul.f32 %v3902_v62, %v2444_v50 }
0x1d92   : > { %v2459_v6 = vmul.f32 %v3035_v63, %v2452_v0  ;;  %v3065_v0 = vld [vmem:[%s4921_s14 + $0x5] ss:$0 sm:$0xff] }
0x1d94   : > { %v2466_v8 = vadd.f32 %v3036_v5, %v2459_v6  ;;  %v3066_v5 = vld [vmem:[%s4923_s16] ss:$0 sm:$0xff] }
0x1d96   : > { %3554 = vmatmul.mubr.msk.f32.vlgmr.msra.gmra.mrb[16].mxu0 %vm630_vm2, %v2466_v8 }
0x1d97   : > { %3799 = vmatpush3.bf16.msra.mxu0 %v3798_v7  ;;  %3588 = vmatprep.mubr.msk.f32.mxu0 %vm3972_vm0, %v3973_v4  ;;  %v3049_v4 = vld [vmem:[%s4918_s11 + $0x2a8] sm:$0xff] }
0x1d98   : > { %3800 = vmatprep.subr.bf16.mxu0 %v3971_v2  ;;  %v3804_v13 = vpack.c.bf16 %v3049_v4, %v3048_v12 }
0x1d9b   : > { %3802 = vmatpush3.bf16.msra.mxu0 %v3801_v11 }
0x1d9c   : > { %3803 = vmatprep.subr.bf16.mxu0 %v3971_v2 }
0x1d9f   : > { %3805 = vmatpush3.bf16.msra.mxu0 %v3804_v13 }
0x1da0   : > { %3806 = vmatprep.subr.bf16.mxu0 %v3971_v2 }
0x1da3   : > { %3808 = vmatpush3.bf16.msra.mxu0 %v3807_v16 }
0x1da4   : > { %3809 = vmatprep.subr.bf16.mxu0 %v3971_v2 }
0x1da7   : > { %3811 = vmatpush3.bf16.msra.mxu0 %v3810_v19 }
0x1da8   : > { %3812 = vmatprep.subr.bf16.mxu0 %v3971_v2 }
0x1dab   : > { %3814 = vmatpush3.bf16.msra.mxu0 %v3813_v22 }
0x1dac   : > { %3815 = vmatprep.subr.bf16.mxu0 %v3971_v2 }
0x1daf   : > { %3817 = vmatpush3.bf16.msra.mxu0 %v3816_v25 }
0x1db0   : > { %3818 = vmatprep.subr.bf16.mxu0 %v3971_v2  ;;  %v3064_v2 = vld [vmem:[%s4920_s13 + $0x5] ss:$0 sm:$0xff] }
0x1db3   : > { %3820 = vmatpush3.bf16.msra.mxu0 %v3819_v28 }
0x1e69   : > { %v2549_v30 = vpop.f32.mrb[16].mxu0 }
0x1e6a   : > { %v2550_v31 = vadd.f32 %v3042_v29, %v2549_v30  ;;  %v3555_v32 = vpop.f32.mrb[17].mxu0 }
0x1e6c   : > { %v2554_v33 = vmul.f32 %v2550_v31, %v2550_v31  ;;  %v2553_v39 = vmul.f32 0.5, %v2550_v31 }
0x1e6e   : > { %v2555_v34 = vmul.f32 %v2554_v33, %v2550_v31 }
0x1e70   : > { %v2556_v35 = vmul.f32 0.044715, %v2555_v34 }
0x1e72   : > { %v2557_v36 = vadd.f32 %v2556_v35, %v2550_v31 }
0x1e74   : > { %v2558_v37 = vmul.f32 0.7978846, %v2557_v36 }
0x1e76   : > { %3903 = vtanh.f32 %v2558_v37 }
0x1e80   : > { %v3904_v38 = vpop.eup %3903 }
0x1e81   : > { %v2560_v40 = vadd.f32 1.0, %v3904_v38 }
0x1e83   : > { %v2561_v41 = vmul.f32 %v2560_v40, %v2553_v39 }
0x1e85   : > { %3589 = vmatmul.mubr.f32.vlgmr.msra.gmra.mrb[18].mxu0 %v2561_v41 }
0x1f58   : > { %v2653_v43 = vpop.f32.mrb[18].mxu0 }
0x1f59   : > { %v2654_v44 = vadd.f32 %v3061_v42, %v2653_v43  ;;  %v3590_v45 = vpop.f32.mrb[19].mxu0 }
0x1f5b   : > { %v2657_v46 = vadd.f32 %v2654_v44, %v2466_v8 }
0x1f5d   : > { %v2662_v47 = vsel %vm630_vm2, %v2657_v46, 0.0 }
0x1f5e   : > { %2663 = vadd.xlane.f32.xlu0 %v2662_v47 }
0x1feb   : > { %v2664_v48 = vpop.xlane.xlu0 %2663 }
0x1fec   : > { %v2665_v49 = vmul.f32 0.03125, %v2664_v48 }
0x1fee   : > { %v2666_v50 = vsub.f32 %v2657_v46, %v2665_v49 }
0x1ff0   : > { %v2667_v51 = vmul.f32 %v2666_v50, %v2666_v50 }
0x1ff2   : > { %v2668_v52 = vsel %vm630_vm2, %v2667_v51, 0.0 }
0x1ff3   : > { %2669 = vadd.xlane.f32.xlu1 %v2668_v52 }
0x2080   : > { %v2670_v59 = vpop.xlane.xlu1 %2669 }
0x2081   : > { %v2671_v60 = vmul.f32 0.03125, %v2670_v59 }
0x2083   : > { %v2672_v61 = vadd.f32 1e-05, %v2671_v60 }
0x2085   : > { %3905 = vrsqrt.f32 %v2672_v61 }
0x208f   : > { %v3906_v62 = vpop.eup %3905 }
0x2090   : > { %v2674_v63 = vmul.f32 %v3906_v62, %v2666_v50 }
0x2092   : > { %v2681_v1 = vmul.f32 %v3064_v2, %v2674_v63 }
0x2094   : > { %v2688_v3 = vadd.f32 %v3065_v0, %v2681_v1 }
0x2096   : > { %3600 = vmatmul.mubr.msk.f32.vlgmr.msra.gmra.mrb[18].mxu1 %vm630_vm2, %v2688_v3 }
0x2169   : > { %v2769_v6 = vpop.f32.mrb[18].mxu1 }
0x216a   : > { %v2770_v7 = vadd.f32 %v3066_v5, %v2769_v6  ;;  %v3601_v8 = vpop.f32.mrb[19].mxu1 }
0x216c   : > { %2773 = vst [vmem:[%s539_s3] sm:$0xff] %v2770_v7 }
0x216d   : > { %3920 = shalt.err (!%p3917_p3)
}
0x216e   : > { %s3921_s3 = scalar_lea.hbm %s4865_s18, 128  ;;  %s3925_s23 = scalar_lea.hbm %s4924_s17, 256 }
0x216f   : > { %p3922_p4 = scmp.ne.s32.totalorder %s4865_s18, %s3921_s3  ;;  %p3926_p9 = scmp.lt.u32.totalorder %s4865_s18, %s4924_s17 }
0x2170   : > { %p3927_p10 = scmp.lt.u32.totalorder %s3925_s23, %s3921_s3  ;;  %p3929_p12 = scmp.lt.u32.totalorder %s3921_s3, %s4865_s18 }
0x2171   : > { %p3923_p7 = pnand %p3922_p4, %p4103_p5 }
0x2172   : > { %p3928_p11 = por %p3927_p10, %p3926_p9 }
0x2173   : > { %p3924_p8 = pneg %p3923_p7 }
0x2174   : > { %p3930_p13 = por %p3929_p12, %p3928_p11 }
0x2176   : > { %p3931_p0 = pnand %p3930_p13, %p3924_p8 }
0x2178   : > { %3934 = shalt.err (!%p3931_p0)
}
0x2179   : > { %3827 = dma.vmem_to_hbm [thread:$0]  (%p4103_p5), %s4867_s30, 128, %s4865_s18, %s2775_s4  }
0x217a PF: > { %p3833_p1 = scmp.ge.s32.totalorder %s3969_s27, 2  ;;  %s2800_s21 = sand.u32 1, %s3957_s24  }
0x217b   : > { %s2801_s19 = scalar_lea.sflag [#allocation3], %s2800_s21 }
0x217c   : > { %p3830_p2 = pnand %p3833_p1, %p4107_p6 }
0x217e   : > { %3952 = dma.done.wait (!%p3830_p2), %s2801_s19, 128  }
0x217f   : > { %3954 = vsyncadd (!%p3830_p2), %s2801_s19, 4294967168  ;;  %s4942_s22 = sld [smem:[#allocation5_spill]]  ;;  %s4943_s26 = sld [smem:[#allocation6_spill]] }
0x2180   : > { %p27_p3 = scmp.ge.s32.totalorder %s4090_s0, 4   ;;  %s4944_s24 = smov %s3961_s25 }
0x2181   : > { %s4946_s27 = smov %s4090_s0 }
0x2182   :  { %29 = sbr.rel (!%p27_p3) target bundleno = 9 (0x9), region = 173 }
0x2185   : > { %s4945_s25 = smov %s4942_s22 }
0x2189   :  { %2806 = vsyncpa [#allocation3], 1 }
0x218a   :  { %2808 = vsyncpa [#allocation3 + $0x1], 1 }

</bundles_post_ra>
